<compile_context>
chip_gen: v6e
topology: v6e:2x2x1
jax: 0.10.0
libtpu: 0.0.40
codegen_flags: <defaults>
</compile_context>

<pallas_src>
import functools

import jax
import jax.numpy as jnp
from jax.experimental import pallas as pl
from jax.experimental.pallas import tpu as pltpu

EPS = 1e-5
LANE = 128  # lane width: channel dim is padded to a multiple of this


# --------------------------------------------------------------------------- #
# In-kernel helpers
# --------------------------------------------------------------------------- #
def _conv3x3_tile(pad_ref, w_ref, b_ref):
    """3x3 'same' conv on one zero-haloed (1, H+2, W+2, Cp) tile.

    Per-dy fusion: the three dx-shifted patches are concatenated along channels
    so each dy is ONE (H*W, 3*Cp) x (3*Cp, Cp) MXU matmul (K = 3*128).
    Returns the flat (H*W, Cp) f32 result with bias added.
    """
    _, Hp, Wp, Cp = pad_ref.shape
    H, W = Hp - 2, Wp - 2
    acc = jnp.zeros((H * W, Cp), jnp.float32)
    for dy in range(3):
        cols = [pad_ref[:, dy:dy + H, dx:dx + W, :].reshape(H * W, Cp)
                for dx in range(3)]
        slab = jnp.concatenate(cols, axis=-1)                  # (H*W, 3*Cp)
        acc = acc + jnp.dot(slab, w_ref[dy],                    # (3*Cp, Cp)
                            preferred_element_type=jnp.float32)
    return acc + b_ref[...]                                     # (1, Cp) broadcast


def _store_partial_stats(ps_ref, y2d):
    """Single pass over y: per-channel sum and sum-of-squares for this tile."""
    cp = y2d.shape[-1]
    ps_ref[:, 0:1, :] = jnp.sum(y2d, axis=0, keepdims=True).reshape(1, 1, cp)
    ps_ref[:, 1:2, :] = jnp.sum(y2d * y2d, axis=0, keepdims=True).reshape(1, 1, cp)


def _scale_shift(ps_ref, g_ref, be_ref, inv_count):
    """Fold training-mode BN (batch stats from per-tile partials) into one FMA."""
    s = jnp.sum(ps_ref[:, 0:1, :], axis=0)                      # (1, Cp)
    ss = jnp.sum(ps_ref[:, 1:2, :], axis=0)                     # (1, Cp)
    mean = s * inv_count
    var = ss * inv_count - mean * mean                          # one-pass variance
    scale = g_ref[...] * jax.lax.rsqrt(var + EPS)               # EUP rsqrt
    shift = be_ref[...] - mean * scale
    return scale, shift


# --------------------------------------------------------------------------- #
# Kernels (grid over batch, one image tile per step)
# --------------------------------------------------------------------------- #
def _conv1_kernel(x_ref, w_ref, b_ref, y_ref, ps_ref, pad_ref):
    """conv1 + bias; emit raw conv output + per-tile BN1 partial stats."""
    _, Hp, Wp, Cp = pad_ref.shape
    H, W = Hp - 2, Wp - 2
    pad_ref[...] = jnp.zeros_like(pad_ref)          # keep halo zero (lane-dense stores)
    pad_ref[:, 1:H + 1, 1:W + 1, :] = x_ref[...]
    y = _conv3x3_tile(pad_ref, w_ref, b_ref)        # (H*W, Cp) f32
    y_ref[...] = y.reshape(1, H, W, Cp)
    _store_partial_stats(ps_ref, y)


def _bn_relu_conv2_kernel(y1_ref, ps1_ref, g1_ref, be1_ref, w2_ref, b2_ref,
                          y2_ref, ps2_ref, pad_ref, *, inv_count):
    """BN1 (folded scale/shift FMA) + relu + conv2 + bias; emit BN2 partials."""
    _, Hp, Wp, Cp = pad_ref.shape
    H, W = Hp - 2, Wp - 2
    scale, shift = _scale_shift(ps1_ref, g1_ref, be1_ref, inv_count)
    y1n = jnp.maximum(y1_ref[...] * scale + shift, 0.0)
    pad_ref[...] = jnp.zeros_like(pad_ref)
    pad_ref[:, 1:H + 1, 1:W + 1, :] = y1n
    y2 = _conv3x3_tile(pad_ref, w2_ref, b2_ref)
    y2_ref[...] = y2.reshape(1, H, W, Cp)
    _store_partial_stats(ps2_ref, y2)


def _bn_residual_kernel(y2_ref, ps2_ref, g2_ref, be2_ref, x_ref, o_ref, *, inv_count):
    """BN2 (folded FMA) + residual add + relu, purely elementwise per tile."""
    scale, shift = _scale_shift(ps2_ref, g2_ref, be2_ref, inv_count)
    o_ref[...] = jnp.maximum(y2_ref[...] * scale + shift + x_ref[...], 0.0)


# --------------------------------------------------------------------------- #
# Wrapper
# --------------------------------------------------------------------------- #
def _pad_last(a, cp):
    return jnp.pad(a, [(0, 0)] * (a.ndim - 1) + [(0, cp - a.shape[-1])])


@jax.jit
def residual_forward(x_nchw, w1, b1, g1, be1, w2, b2, g2, be2):
    """x: (N, C, H, W) f32 (PyTorch NCHW); w*: (Cout, Cin, 3, 3) OIHW."""
    N, C, H, W = x_nchw.shape
    Cp = max(LANE, ((C + LANE - 1) // LANE) * LANE)
    inv_count = 1.0 / float(N * H * W)

    # Layout plumbing: NHWC + channels padded to lane width. Padded channels
    # carry zeros end-to-end (zero weights/bias/gamma/beta) so semantics are
    # unchanged; they are sliced off before returning.
    x = jnp.transpose(x_nchw, (0, 2, 3, 1))                      # NHWC
    xp = _pad_last(x, Cp)

    def prep_w(w_oihw):
        w_hwio = jnp.transpose(w_oihw, (2, 3, 1, 0))             # (3,3,Cin,Cout)
        wp = jnp.pad(w_hwio, ((0, 0), (0, 0), (0, Cp - C), (0, Cp - C)))
        return wp.reshape(3, 3 * Cp, Cp)                         # row = dx*Cp + cin

    w1p, w2p = prep_w(w1), prep_w(w2)
    b1p, g1p, be1p, b2p, g2p, be2p = (
        _pad_last(v, Cp).reshape(1, Cp) for v in (b1, g1, be1, b2, g2, be2))

    # Block specs: one image per grid step; weights/params as full small blocks.
    tile = pl.BlockSpec((1, H, W, Cp), lambda i: (i, 0, 0, 0))
    wspec = pl.BlockSpec((3, 3 * Cp, Cp), lambda i: (0, 0, 0))
    vspec = pl.BlockSpec((1, Cp), lambda i: (0, 0))
    ps_tile = pl.BlockSpec((1, 2, Cp), lambda i: (i, 0, 0))
    ps_full = pl.BlockSpec((N, 2, Cp), lambda i: (0, 0, 0))

    act_shape = jax.ShapeDtypeStruct((N, H, W, Cp), jnp.float32)
    ps_shape = jax.ShapeDtypeStruct((N, 2, Cp), jnp.float32)
    pad_scratch = pltpu.VMEM((1, H + 2, W + 2, Cp), jnp.float32)
    # Each output block is written exactly once per grid step -> "parallel"
    # (lets v7x's two TensorCores split the batch). Per-step working set is a
    # few MB, well under every generation's scoped-VMEM default.
    cparams = pltpu.CompilerParams(dimension_semantics=("parallel",))

    # Pass 1: conv1 + bias, per-tile BN1 partial stats.
    y1_raw, ps1 = pl.pallas_call(
        _conv1_kernel,
        grid=(N,),
        in_specs=[tile, wspec, vspec],
        out_specs=[tile, ps_tile],
        out_shape=[act_shape, ps_shape],
        scratch_shapes=[pad_scratch],
        compiler_params=cparams,
    )(xp, w1p, b1p)

    # Pass 2: BN1 (folded) + relu + conv2 + bias, per-tile BN2 partial stats.
    y2_raw, ps2 = pl.pallas_call(
        functools.partial(_bn_relu_conv2_kernel, inv_count=inv_count),
        grid=(N,),
        in_specs=[tile, ps_full, vspec, vspec, wspec, vspec],
        out_specs=[tile, ps_tile],
        out_shape=[act_shape, ps_shape],
        scratch_shapes=[pad_scratch],
        compiler_params=cparams,
    )(y1_raw, ps1, g1p, be1p, w2p, b2p)

    # Pass 3: BN2 (folded) + residual add + relu.
    outp = pl.pallas_call(
        functools.partial(_bn_residual_kernel, inv_count=inv_count),
        grid=(N,),
        in_specs=[tile, ps_full, vspec, vspec, tile],
        out_specs=tile,
        out_shape=act_shape,
        compiler_params=cparams,
    )(y2_raw, ps2, g2p, be2p, xp)

    out = outp[..., :C]                                          # drop padded channels
    return jnp.transpose(out, (0, 3, 1, 2))                      # back to NCHW


# --------------------------------------------------------------------------- #
# Pure-JAX reference (NCHW, matches the PyTorch module in train() mode)
# --------------------------------------------------------------------------- #
def _residual_ref(x, w1, b1, g1, be1, w2, b2, g2, be2):
    def conv(x, w, b):
        y = jax.lax.conv_general_dilated(
            x, w, window_strides=(1, 1), padding="SAME",
            dimension_numbers=("NCHW", "OIHW", "NCHW"))
        return y + b[None, :, None, None]

    def bn(y, g, be):
        m = jnp.mean(y, axis=(0, 2, 3), keepdims=True)
        v = jnp.mean((y - m) ** 2, axis=(0, 2, 3), keepdims=True)
        return (y - m) / jnp.sqrt(v + EPS) * g[None, :, None, None] \
               + be[None, :, None, None]

    y = jax.nn.relu(bn(conv(x, w1, b1), g1, be1))
    y = bn(conv(y, w2, b2), g2, be2)
    return jax.nn.relu(y + x)


if __name__ == "__main__":
    N, C, H, W = 2, 4, 16, 16
    key = jax.random.PRNGKey(0)
    kx, k1, kb1, k2, kb2 = jax.random.split(key, 5)

    x = jax.random.normal(kx, (N, C, H, W), dtype=jnp.float32)            # NCHW
    w1 = 0.1 * jax.random.normal(k1, (C, C, 3, 3), dtype=jnp.float32)     # OIHW
    b1 = 0.05 * jax.random.normal(kb1, (C,), dtype=jnp.float32)
    w2 = 0.1 * jax.random.normal(k2, (C, C, 3, 3), dtype=jnp.float32)
    b2 = 0.05 * jax.random.normal(kb2, (C,), dtype=jnp.float32)
    # BatchNorm init matches PyTorch defaults: gamma=1, beta=0
    g1 = jnp.ones((C,), jnp.float32)
    be1 = jnp.zeros((C,), jnp.float32)
    g2 = jnp.ones((C,), jnp.float32)
    be2 = jnp.zeros((C,), jnp.float32)

    out = residual_forward(x, w1, b1, g1, be1, w2, b2, g2, be2)
    out = jax.block_until_ready(out)

    ref = _residual_ref(x, w1, b1, g1, be1, w2, b2, g2, be2)
    assert out.shape == (N, C, H, W)
    assert jnp.allclose(out, ref, atol=2e-3, rtol=2e-3), "mismatch vs reference"

    print("KERNEL_OK")
</pallas_src>

<mosaic_0001>
module attributes {stable_mosaic.version = 11 : i64} {
  func.func @_conv1_kernel(%arg0: i32, %arg1: memref<1x16x16x128xf32, #tpu.memory_space<vmem>>, %arg2: memref<3x384x128xf32, #tpu.memory_space<vmem>>, %arg3: memref<1x128xf32, #tpu.memory_space<vmem>>, %arg4: memref<1x16x16x128xf32, #tpu.memory_space<vmem>>, %arg5: memref<1x2x128xf32, #tpu.memory_space<vmem>>, %arg6: memref<1x18x18x128xf32, #tpu.memory_space<vmem>>) attributes {dimension_semantics = [#tpu.dimension_semantics<parallel>], iteration_bounds = array<i64: 2>, scalar_prefetch = 0 : i64, scratch_operands = 1 : i64, tpu.core_type = #tpu.core_type<tc>, window_params = [{transform_indices = @transform_0, window_bounds = array<i64: 1, 16, 16, 128>}, {pipeline_mode = #tpu.pipeline_mode<synchronous>, transform_indices = @transform_1, window_bounds = array<i64: 3, 384, 128>}, {pipeline_mode = #tpu.pipeline_mode<synchronous>, transform_indices = @transform_2, window_bounds = array<i64: 1, 128>}, {transform_indices = @transform_3, window_bounds = array<i64: 1, 16, 16, 128>}, {transform_indices = @transform_4, window_bounds = array<i64: 1, 2, 128>}]} {
    %cst = arith.constant 0.000000e+00 : f32
    %0 = vector.broadcast %cst : f32 to vector<1x18x18x128xf32>
    %c0 = arith.constant 0 : index
    %c0_0 = arith.constant 0 : index
    %c0_1 = arith.constant 0 : index
    %c0_2 = arith.constant 0 : index
    %1 = vector.load %arg6[%c0, %c0_0, %c0_1, %c0_2] : memref<1x18x18x128xf32, #tpu.memory_space<vmem>>, vector<1x18x18x128xf32>
    tpu.vector_store %arg6[%c0, %c0_0, %c0_1, %c0_2], %0 {strides = array<i32>} : memref<1x18x18x128xf32, #tpu.memory_space<vmem>>, vector<1x18x18x128xf32>,
    %c0_3 = arith.constant 0 : index
    %c0_4 = arith.constant 0 : index
    %c0_5 = arith.constant 0 : index
    %c0_6 = arith.constant 0 : index
    %2 = vector.load %arg1[%c0_3, %c0_4, %c0_5, %c0_6] : memref<1x16x16x128xf32, #tpu.memory_space<vmem>>, vector<1x16x16x128xf32>
    %c0_7 = arith.constant 0 : index
    %c1 = arith.constant 1 : index
    %c1_8 = arith.constant 1 : index
    %c0_9 = arith.constant 0 : index
    %3 = vector.load %arg6[%c0_7, %c1, %c1_8, %c0_9] : memref<1x18x18x128xf32, #tpu.memory_space<vmem>>, vector<1x16x16x128xf32>
    tpu.vector_store %arg6[%c0_7, %c1, %c1_8, %c0_9], %2 {strides = array<i32>} : memref<1x18x18x128xf32, #tpu.memory_space<vmem>>, vector<1x16x16x128xf32>,
    %cst_10 = arith.constant 0.000000e+00 : f32
    %4 = vector.broadcast %cst_10 : f32 to vector<256x128xf32>
    %c0_11 = arith.constant 0 : index
    %c0_12 = arith.constant 0 : index
    %c0_13 = arith.constant 0 : index
    %c0_14 = arith.constant 0 : index
    %5 = vector.load %arg6[%c0_11, %c0_12, %c0_13, %c0_14] : memref<1x18x18x128xf32, #tpu.memory_space<vmem>>, vector<1x16x16x128xf32>
    %6 = vector.shape_cast %5 : vector<1x16x16x128xf32> to vector<256x128xf32>
    %c0_15 = arith.constant 0 : index
    %c0_16 = arith.constant 0 : index
    %c1_17 = arith.constant 1 : index
    %c0_18 = arith.constant 0 : index
    %7 = vector.load %arg6[%c0_15, %c0_16, %c1_17, %c0_18] : memref<1x18x18x128xf32, #tpu.memory_space<vmem>>, vector<1x16x16x128xf32>
    %8 = vector.shape_cast %7 : vector<1x16x16x128xf32> to vector<256x128xf32>
    %c0_19 = arith.constant 0 : index
    %c0_20 = arith.constant 0 : index
    %c2 = arith.constant 2 : index
    %c0_21 = arith.constant 0 : index
    %9 = vector.load %arg6[%c0_19, %c0_20, %c2, %c0_21] : memref<1x18x18x128xf32, #tpu.memory_space<vmem>>, vector<1x16x16x128xf32>
    %10 = vector.shape_cast %9 : vector<1x16x16x128xf32> to vector<256x128xf32>
    %11 = tpu.concatenate %6, %8, %10 in 1 : vector<256x128xf32>, vector<256x128xf32>, vector<256x128xf32> -> vector<256x384xf32>
    %c0_22 = arith.constant 0 : index
    %c0_23 = arith.constant 0 : index
    %c0_24 = arith.constant 0 : index
    %12 = vector.load %arg2[%c0_22, %c0_23, %c0_24] : memref<3x384x128xf32, #tpu.memory_space<vmem>>, vector<1x384x128xf32>
    %13 = vector.shape_cast %12 : vector<1x384x128xf32> to vector<384x128xf32>
    %cst_25 = arith.constant dense<0.000000e+00> : vector<256x128xf32>
    %14 = tpu.matmul %11, %13, %cst_25 {dimension_numbers = #tpu.dot_dimension_numbers<[1], [0], [0], [1], [0, 0, 1, 1], [], []>} : vector<256x384xf32>, vector<384x128xf32>, vector<256x128xf32> -> vector<256x128xf32>
    %15 = arith.addf %4, %14 : vector<256x128xf32>
    %c0_26 = arith.constant 0 : index
    %c1_27 = arith.constant 1 : index
    %c0_28 = arith.constant 0 : index
    %c0_29 = arith.constant 0 : index
    %16 = vector.load %arg6[%c0_26, %c1_27, %c0_28, %c0_29] : memref<1x18x18x128xf32, #tpu.memory_space<vmem>>, vector<1x16x16x128xf32>
    %17 = vector.shape_cast %16 : vector<1x16x16x128xf32> to vector<256x128xf32>
    %c0_30 = arith.constant 0 : index
    %c1_31 = arith.constant 1 : index
    %c1_32 = arith.constant 1 : index
    %c0_33 = arith.constant 0 : index
    %18 = vector.load %arg6[%c0_30, %c1_31, %c1_32, %c0_33] : memref<1x18x18x128xf32, #tpu.memory_space<vmem>>, vector<1x16x16x128xf32>
    %19 = vector.shape_cast %18 : vector<1x16x16x128xf32> to vector<256x128xf32>
    %c0_34 = arith.constant 0 : index
    %c1_35 = arith.constant 1 : index
    %c2_36 = arith.constant 2 : index
    %c0_37 = arith.constant 0 : index
    %20 = vector.load %arg6[%c0_34, %c1_35, %c2_36, %c0_37] : memref<1x18x18x128xf32, #tpu.memory_space<vmem>>, vector<1x16x16x128xf32>
    %21 = vector.shape_cast %20 : vector<1x16x16x128xf32> to vector<256x128xf32>
    %22 = tpu.concatenate %17, %19, %21 in 1 : vector<256x128xf32>, vector<256x128xf32>, vector<256x128xf32> -> vector<256x384xf32>
    %c1_38 = arith.constant 1 : index
    %c0_39 = arith.constant 0 : index
    %c0_40 = arith.constant 0 : index
    %23 = vector.load %arg2[%c1_38, %c0_39, %c0_40] : memref<3x384x128xf32, #tpu.memory_space<vmem>>, vector<1x384x128xf32>
    %24 = vector.shape_cast %23 : vector<1x384x128xf32> to vector<384x128xf32>
    %cst_41 = arith.constant dense<0.000000e+00> : vector<256x128xf32>
    %25 = tpu.matmul %22, %24, %cst_41 {dimension_numbers = #tpu.dot_dimension_numbers<[1], [0], [0], [1], [0, 0, 1, 1], [], []>} : vector<256x384xf32>, vector<384x128xf32>, vector<256x128xf32> -> vector<256x128xf32>
    %26 = arith.addf %15, %25 : vector<256x128xf32>
    %c0_42 = arith.constant 0 : index
    %c2_43 = arith.constant 2 : index
    %c0_44 = arith.constant 0 : index
    %c0_45 = arith.constant 0 : index
    %27 = vector.load %arg6[%c0_42, %c2_43, %c0_44, %c0_45] : memref<1x18x18x128xf32, #tpu.memory_space<vmem>>, vector<1x16x16x128xf32>
    %28 = vector.shape_cast %27 : vector<1x16x16x128xf32> to vector<256x128xf32>
    %c0_46 = arith.constant 0 : index
    %c2_47 = arith.constant 2 : index
    %c1_48 = arith.constant 1 : index
    %c0_49 = arith.constant 0 : index
    %29 = vector.load %arg6[%c0_46, %c2_47, %c1_48, %c0_49] : memref<1x18x18x128xf32, #tpu.memory_space<vmem>>, vector<1x16x16x128xf32>
    %30 = vector.shape_cast %29 : vector<1x16x16x128xf32> to vector<256x128xf32>
    %c0_50 = arith.constant 0 : index
    %c2_51 = arith.constant 2 : index
    %c2_52 = arith.constant 2 : index
    %c0_53 = arith.constant 0 : index
    %31 = vector.load %arg6[%c0_50, %c2_51, %c2_52, %c0_53] : memref<1x18x18x128xf32, #tpu.memory_space<vmem>>, vector<1x16x16x128xf32>
    %32 = vector.shape_cast %31 : vector<1x16x16x128xf32> to vector<256x128xf32>
    %33 = tpu.concatenate %28, %30, %32 in 1 : vector<256x128xf32>, vector<256x128xf32>, vector<256x128xf32> -> vector<256x384xf32>
    %c2_54 = arith.constant 2 : index
    %c0_55 = arith.constant 0 : index
    %c0_56 = arith.constant 0 : index
    %34 = vector.load %arg2[%c2_54, %c0_55, %c0_56] : memref<3x384x128xf32, #tpu.memory_space<vmem>>, vector<1x384x128xf32>
    %35 = vector.shape_cast %34 : vector<1x384x128xf32> to vector<384x128xf32>
    %cst_57 = arith.constant dense<0.000000e+00> : vector<256x128xf32>
    %36 = tpu.matmul %33, %35, %cst_57 {dimension_numbers = #tpu.dot_dimension_numbers<[1], [0], [0], [1], [0, 0, 1, 1], [], []>} : vector<256x384xf32>, vector<384x128xf32>, vector<256x128xf32> -> vector<256x128xf32>
    %37 = arith.addf %26, %36 : vector<256x128xf32>
    %c0_58 = arith.constant 0 : index
    %c0_59 = arith.constant 0 : index
    %38 = vector.load %arg3[%c0_58, %c0_59] : memref<1x128xf32, #tpu.memory_space<vmem>>, vector<1x128xf32>
    %39 = vector.broadcast %38 : vector<1x128xf32> to vector<256x128xf32>
    %40 = arith.addf %37, %39 : vector<256x128xf32>
    %41 = vector.shape_cast %40 : vector<256x128xf32> to vector<1x16x16x128xf32>
    %c0_60 = arith.constant 0 : index
    %c0_61 = arith.constant 0 : index
    %c0_62 = arith.constant 0 : index
    %c0_63 = arith.constant 0 : index
    %42 = vector.load %arg4[%c0_60, %c0_61, %c0_62, %c0_63] : memref<1x16x16x128xf32, #tpu.memory_space<vmem>>, vector<1x16x16x128xf32>
    tpu.vector_store %arg4[%c0_60, %c0_61, %c0_62, %c0_63], %41 {strides = array<i32>} : memref<1x16x16x128xf32, #tpu.memory_space<vmem>>, vector<1x16x16x128xf32>,
    %cst_64 = arith.constant dense<0.000000e+00> : vector<128xf32>
    %43 = vector.multi_reduction <add>, %40, %cst_64 [0] : vector<256x128xf32> to vector<128xf32>
    %44 = vector.shape_cast %43 : vector<128xf32> to vector<1x128xf32>
    %45 = vector.shape_cast %44 : vector<1x128xf32> to vector<1x1x128xf32>
    %c0_65 = arith.constant 0 : index
    %c0_66 = arith.constant 0 : index
    %c0_67 = arith.constant 0 : index
    %46 = vector.load %arg5[%c0_65, %c0_66, %c0_67] : memref<1x2x128xf32, #tpu.memory_space<vmem>>, vector<1x1x128xf32>
    tpu.vector_store %arg5[%c0_65, %c0_66, %c0_67], %45 {strides = array<i32>} : memref<1x2x128xf32, #tpu.memory_space<vmem>>, vector<1x1x128xf32>,
    %47 = arith.mulf %40, %40 : vector<256x128xf32>
    %cst_68 = arith.constant dense<0.000000e+00> : vector<128xf32>
    %48 = vector.multi_reduction <add>, %47, %cst_68 [0] : vector<256x128xf32> to vector<128xf32>
    %49 = vector.shape_cast %48 : vector<128xf32> to vector<1x128xf32>
    %50 = vector.shape_cast %49 : vector<1x128xf32> to vector<1x1x128xf32>
    %c0_69 = arith.constant 0 : index
    %c1_70 = arith.constant 1 : index
    %c0_71 = arith.constant 0 : index
    %51 = vector.load %arg5[%c0_69, %c1_70, %c0_71] : memref<1x2x128xf32, #tpu.memory_space<vmem>>, vector<1x1x128xf32>
    tpu.vector_store %arg5[%c0_69, %c1_70, %c0_71], %50 {strides = array<i32>} : memref<1x2x128xf32, #tpu.memory_space<vmem>>, vector<1x1x128xf32>,
    return
  }
  func.func @transform_0(%arg0: i32) -> (i32, i32, i32, i32) {
    %c0_i32 = arith.constant 0 : i32
    %c0_i32_0 = arith.constant 0 : i32
    %c0_i32_1 = arith.constant 0 : i32
    %c0_i32_2 = arith.constant 0 : i32
    return %arg0, %c0_i32, %c0_i32_0, %c0_i32_1 : i32, i32, i32, i32
  }
  func.func @transform_1(%arg0: i32) -> (i32, i32, i32) {
    %c0_i32 = arith.constant 0 : i32
    %c0_i32_0 = arith.constant 0 : i32
    %c0_i32_1 = arith.constant 0 : i32
    %c0_i32_2 = arith.constant 0 : i32
    return %c0_i32, %c0_i32_0, %c0_i32_1 : i32, i32, i32
  }
  func.func @transform_2(%arg0: i32) -> (i32, i32) {
    %c0_i32 = arith.constant 0 : i32
    %c0_i32_0 = arith.constant 0 : i32
    %c0_i32_1 = arith.constant 0 : i32
    return %c0_i32, %c0_i32_0 : i32, i32
  }
  func.func @transform_3(%arg0: i32) -> (i32, i32, i32, i32) {
    %c0_i32 = arith.constant 0 : i32
    %c0_i32_0 = arith.constant 0 : i32
    %c0_i32_1 = arith.constant 0 : i32
    %c0_i32_2 = arith.constant 0 : i32
    return %arg0, %c0_i32, %c0_i32_0, %c0_i32_1 : i32, i32, i32, i32
  }
  func.func @transform_4(%arg0: i32) -> (i32, i32, i32) {
    %c0_i32 = arith.constant 0 : i32
    %c0_i32_0 = arith.constant 0 : i32
    %c0_i32_1 = arith.constant 0 : i32
    return %arg0, %c0_i32, %c0_i32_0 : i32, i32, i32
  }
}

module attributes {stable_mosaic.version = 11 : i64} {
  func.func @_bn_residual_kernel(%arg0: i32, %arg1: memref<1x16x16x128xf32, #tpu.memory_space<vmem>>, %arg2: memref<2x2x128xf32, #tpu.memory_space<vmem>>, %arg3: memref<1x128xf32, #tpu.memory_space<vmem>>, %arg4: memref<1x128xf32, #tpu.memory_space<vmem>>, %arg5: memref<1x16x16x128xf32, #tpu.memory_space<vmem>>, %arg6: memref<1x16x16x128xf32, #tpu.memory_space<vmem>>) attributes {dimension_semantics = [#tpu.dimension_semantics<parallel>], iteration_bounds = array<i64: 2>, scalar_prefetch = 0 : i64, scratch_operands = 0 : i64, tpu.core_type = #tpu.core_type<tc>, window_params = [{transform_indices = @transform_0, window_bounds = array<i64: 1, 16, 16, 128>}, {pipeline_mode = #tpu.pipeline_mode<synchronous>, transform_indices = @transform_1, window_bounds = array<i64: 2, 2, 128>}, {pipeline_mode = #tpu.pipeline_mode<synchronous>, transform_indices = @transform_2, window_bounds = array<i64: 1, 128>}, {pipeline_mode = #tpu.pipeline_mode<synchronous>, transform_indices = @transform_3, window_bounds = array<i64: 1, 128>}, {transform_indices = @transform_4, window_bounds = array<i64: 1, 16, 16, 128>}, {transform_indices = @transform_5, window_bounds = array<i64: 1, 16, 16, 128>}]} {
    %c0 = arith.constant 0 : index
    %c0_0 = arith.constant 0 : index
    %c0_1 = arith.constant 0 : index
    %0 = vector.load %arg2[%c0, %c0_0, %c0_1] : memref<2x2x128xf32, #tpu.memory_space<vmem>>, vector<2x1x128xf32>
    %cst = arith.constant dense<0.000000e+00> : vector<1x128xf32>
    %1 = vector.multi_reduction <add>, %0, %cst [0] : vector<2x1x128xf32> to vector<1x128xf32>
    %c0_2 = arith.constant 0 : index
    %c1 = arith.constant 1 : index
    %c0_3 = arith.constant 0 : index
    %2 = vector.load %arg2[%c0_2, %c1, %c0_3] : memref<2x2x128xf32, #tpu.memory_space<vmem>>, vector<2x1x128xf32>
    %cst_4 = arith.constant dense<0.000000e+00> : vector<1x128xf32>
    %3 = vector.multi_reduction <add>, %2, %cst_4 [0] : vector<2x1x128xf32> to vector<1x128xf32>
    %cst_5 = arith.constant 0.001953125 : f32
    %4 = vector.broadcast %cst_5 : f32 to vector<1x128xf32>
    %5 = arith.mulf %1, %4 : vector<1x128xf32>
    %cst_6 = arith.constant 0.001953125 : f32
    %6 = vector.broadcast %cst_6 : f32 to vector<1x128xf32>
    %7 = arith.mulf %3, %6 : vector<1x128xf32>
    %8 = arith.mulf %5, %5 : vector<1x128xf32>
    %9 = arith.subf %7, %8 : vector<1x128xf32>
    %c0_7 = arith.constant 0 : index
    %c0_8 = arith.constant 0 : index
    %10 = vector.load %arg3[%c0_7, %c0_8] : memref<1x128xf32, #tpu.memory_space<vmem>>, vector<1x128xf32>
    %cst_9 = arith.constant 9.99999974E-6 : f32
    %11 = vector.broadcast %cst_9 : f32 to vector<1x128xf32>
    %12 = arith.addf %9, %11 : vector<1x128xf32>
    %13 = math.rsqrt %12 : vector<1x128xf32>
    %14 = arith.mulf %10, %13 : vector<1x128xf32>
    %c0_10 = arith.constant 0 : index
    %c0_11 = arith.constant 0 : index
    %15 = vector.load %arg4[%c0_10, %c0_11] : memref<1x128xf32, #tpu.memory_space<vmem>>, vector<1x128xf32>
    %16 = arith.mulf %5, %14 : vector<1x128xf32>
    %17 = arith.subf %15, %16 : vector<1x128xf32>
    %c0_12 = arith.constant 0 : index
    %c0_13 = arith.constant 0 : index
    %c0_14 = arith.constant 0 : index
    %c0_15 = arith.constant 0 : index
    %18 = vector.load %arg1[%c0_12, %c0_13, %c0_14, %c0_15] : memref<1x16x16x128xf32, #tpu.memory_space<vmem>>, vector<1x16x16x128xf32>
    %19 = vector.shape_cast %14 : vector<1x128xf32> to vector<1x1x1x128xf32>
    %20 = vector.broadcast %19 : vector<1x1x1x128xf32> to vector<1x16x16x128xf32>
    %21 = arith.mulf %18, %20 : vector<1x16x16x128xf32>
    %22 = vector.shape_cast %17 : vector<1x128xf32> to vector<1x1x1x128xf32>
    %23 = vector.broadcast %22 : vector<1x1x1x128xf32> to vector<1x16x16x128xf32>
    %24 = arith.addf %21, %23 : vector<1x16x16x128xf32>
    %c0_16 = arith.constant 0 : index
    %c0_17 = arith.constant 0 : index
    %c0_18 = arith.constant 0 : index
    %c0_19 = arith.constant 0 : index
    %25 = vector.load %arg5[%c0_16, %c0_17, %c0_18, %c0_19] : memref<1x16x16x128xf32, #tpu.memory_space<vmem>>, vector<1x16x16x128xf32>
    %26 = arith.addf %24, %25 : vector<1x16x16x128xf32>
    %cst_20 = arith.constant 0.000000e+00 : f32
    %27 = vector.broadcast %cst_20 : f32 to vector<1x16x16x128xf32>
    %28 = arith.maximumf %26, %27 : vector<1x16x16x128xf32>
    %c0_21 = arith.constant 0 : index
    %c0_22 = arith.constant 0 : index
    %c0_23 = arith.constant 0 : index
    %c0_24 = arith.constant 0 : index
    %29 = vector.load %arg6[%c0_21, %c0_22, %c0_23, %c0_24] : memref<1x16x16x128xf32, #tpu.memory_space<vmem>>, vector<1x16x16x128xf32>
    tpu.vector_store %arg6[%c0_21, %c0_22, %c0_23, %c0_24], %28 {strides = array<i32>} : memref<1x16x16x128xf32, #tpu.memory_space<vmem>>, vector<1x16x16x128xf32>,
    return
  }
  func.func @transform_0(%arg0: i32) -> (i32, i32, i32, i32) {
    %c0_i32 = arith.constant 0 : i32
    %c0_i32_0 = arith.constant 0 : i32
    %c0_i32_1 = arith.constant 0 : i32
    %c0_i32_2 = arith.constant 0 : i32
    return %arg0, %c0_i32, %c0_i32_0, %c0_i32_1 : i32, i32, i32, i32
  }
  func.func @transform_1(%arg0: i32) -> (i32, i32, i32) {
    %c0_i32 = arith.constant 0 : i32
    %c0_i32_0 = arith.constant 0 : i32
    %c0_i32_1 = arith.constant 0 : i32
    %c0_i32_2 = arith.constant 0 : i32
    return %c0_i32, %c0_i32_0, %c0_i32_1 : i32, i32, i32
  }
  func.func @transform_2(%arg0: i32) -> (i32, i32) {
    %c0_i32 = arith.constant 0 : i32
    %c0_i32_0 = arith.constant 0 : i32
    %c0_i32_1 = arith.constant 0 : i32
    return %c0_i32, %c0_i32_0 : i32, i32
  }
  func.func @transform_3(%arg0: i32) -> (i32, i32) {
    %c0_i32 = arith.constant 0 : i32
    %c0_i32_0 = arith.constant 0 : i32
    %c0_i32_1 = arith.constant 0 : i32
    return %c0_i32, %c0_i32_0 : i32, i32
  }
  func.func @transform_4(%arg0: i32) -> (i32, i32, i32, i32) {
    %c0_i32 = arith.constant 0 : i32
    %c0_i32_0 = arith.constant 0 : i32
    %c0_i32_1 = arith.constant 0 : i32
    %c0_i32_2 = arith.constant 0 : i32
    return %arg0, %c0_i32, %c0_i32_0, %c0_i32_1 : i32, i32, i32, i32
  }
  func.func @transform_5(%arg0: i32) -> (i32, i32, i32, i32) {
    %c0_i32 = arith.constant 0 : i32
    %c0_i32_0 = arith.constant 0 : i32
    %c0_i32_1 = arith.constant 0 : i32
    %c0_i32_2 = arith.constant 0 : i32
    return %arg0, %c0_i32, %c0_i32_0, %c0_i32_1 : i32, i32, i32, i32
  }
}

module attributes {stable_mosaic.version = 11 : i64} {
  func.func @_bn_relu_conv2_kernel(%arg0: i32, %arg1: memref<1x16x16x128xf32, #tpu.memory_space<vmem>>, %arg2: memref<2x2x128xf32, #tpu.memory_space<vmem>>, %arg3: memref<1x128xf32, #tpu.memory_space<vmem>>, %arg4: memref<1x128xf32, #tpu.memory_space<vmem>>, %arg5: memref<3x384x128xf32, #tpu.memory_space<vmem>>, %arg6: memref<1x128xf32, #tpu.memory_space<vmem>>, %arg7: memref<1x16x16x128xf32, #tpu.memory_space<vmem>>, %arg8: memref<1x2x128xf32, #tpu.memory_space<vmem>>, %arg9: memref<1x18x18x128xf32, #tpu.memory_space<vmem>>) attributes {dimension_semantics = [#tpu.dimension_semantics<parallel>], iteration_bounds = array<i64: 2>, scalar_prefetch = 0 : i64, scratch_operands = 1 : i64, tpu.core_type = #tpu.core_type<tc>, window_params = [{transform_indices = @transform_0, window_bounds = array<i64: 1, 16, 16, 128>}, {pipeline_mode = #tpu.pipeline_mode<synchronous>, transform_indices = @transform_1, window_bounds = array<i64: 2, 2, 128>}, {pipeline_mode = #tpu.pipeline_mode<synchronous>, transform_indices = @transform_2, window_bounds = array<i64: 1, 128>}, {pipeline_mode = #tpu.pipeline_mode<synchronous>, transform_indices = @transform_3, window_bounds = array<i64: 1, 128>}, {pipeline_mode = #tpu.pipeline_mode<synchronous>, transform_indices = @transform_4, window_bounds = array<i64: 3, 384, 128>}, {pipeline_mode = #tpu.pipeline_mode<synchronous>, transform_indices = @transform_5, window_bounds = array<i64: 1, 128>}, {transform_indices = @transform_6, window_bounds = array<i64: 1, 16, 16, 128>}, {transform_indices = @transform_7, window_bounds = array<i64: 1, 2, 128>}]} {
    %c0 = arith.constant 0 : index
    %c0_0 = arith.constant 0 : index
    %c0_1 = arith.constant 0 : index
    %0 = vector.load %arg2[%c0, %c0_0, %c0_1] : memref<2x2x128xf32, #tpu.memory_space<vmem>>, vector<2x1x128xf32>
    %cst = arith.constant dense<0.000000e+00> : vector<1x128xf32>
    %1 = vector.multi_reduction <add>, %0, %cst [0] : vector<2x1x128xf32> to vector<1x128xf32>
    %c0_2 = arith.constant 0 : index
    %c1 = arith.constant 1 : index
    %c0_3 = arith.constant 0 : index
    %2 = vector.load %arg2[%c0_2, %c1, %c0_3] : memref<2x2x128xf32, #tpu.memory_space<vmem>>, vector<2x1x128xf32>
    %cst_4 = arith.constant dense<0.000000e+00> : vector<1x128xf32>
    %3 = vector.multi_reduction <add>, %2, %cst_4 [0] : vector<2x1x128xf32> to vector<1x128xf32>
    %cst_5 = arith.constant 0.001953125 : f32
    %4 = vector.broadcast %cst_5 : f32 to vector<1x128xf32>
    %5 = arith.mulf %1, %4 : vector<1x128xf32>
    %cst_6 = arith.constant 0.001953125 : f32
    %6 = vector.broadcast %cst_6 : f32 to vector<1x128xf32>
    %7 = arith.mulf %3, %6 : vector<1x128xf32>
    %8 = arith.mulf %5, %5 : vector<1x128xf32>
    %9 = arith.subf %7, %8 : vector<1x128xf32>
    %c0_7 = arith.constant 0 : index
    %c0_8 = arith.constant 0 : index
    %10 = vector.load %arg3[%c0_7, %c0_8] : memref<1x128xf32, #tpu.memory_space<vmem>>, vector<1x128xf32>
    %cst_9 = arith.constant 9.99999974E-6 : f32
    %11 = vector.broadcast %cst_9 : f32 to vector<1x128xf32>
    %12 = arith.addf %9, %11 : vector<1x128xf32>
    %13 = math.rsqrt %12 : vector<1x128xf32>
    %14 = arith.mulf %10, %13 : vector<1x128xf32>
    %c0_10 = arith.constant 0 : index
    %c0_11 = arith.constant 0 : index
    %15 = vector.load %arg4[%c0_10, %c0_11] : memref<1x128xf32, #tpu.memory_space<vmem>>, vector<1x128xf32>
    %16 = arith.mulf %5, %14 : vector<1x128xf32>
    %17 = arith.subf %15, %16 : vector<1x128xf32>
    %c0_12 = arith.constant 0 : index
    %c0_13 = arith.constant 0 : index
    %c0_14 = arith.constant 0 : index
    %c0_15 = arith.constant 0 : index
    %18 = vector.load %arg1[%c0_12, %c0_13, %c0_14, %c0_15] : memref<1x16x16x128xf32, #tpu.memory_space<vmem>>, vector<1x16x16x128xf32>
    %19 = vector.shape_cast %14 : vector<1x128xf32> to vector<1x1x1x128xf32>
    %20 = vector.broadcast %19 : vector<1x1x1x128xf32> to vector<1x16x16x128xf32>
    %21 = arith.mulf %18, %20 : vector<1x16x16x128xf32>
    %22 = vector.shape_cast %17 : vector<1x128xf32> to vector<1x1x1x128xf32>
    %23 = vector.broadcast %22 : vector<1x1x1x128xf32> to vector<1x16x16x128xf32>
    %24 = arith.addf %21, %23 : vector<1x16x16x128xf32>
    %cst_16 = arith.constant 0.000000e+00 : f32
    %25 = vector.broadcast %cst_16 : f32 to vector<1x16x16x128xf32>
    %26 = arith.maximumf %24, %25 : vector<1x16x16x128xf32>
    %cst_17 = arith.constant 0.000000e+00 : f32
    %27 = vector.broadcast %cst_17 : f32 to vector<1x18x18x128xf32>
    %c0_18 = arith.constant 0 : index
    %c0_19 = arith.constant 0 : index
    %c0_20 = arith.constant 0 : index
    %c0_21 = arith.constant 0 : index
    %28 = vector.load %arg9[%c0_18, %c0_19, %c0_20, %c0_21] : memref<1x18x18x128xf32, #tpu.memory_space<vmem>>, vector<1x18x18x128xf32>
    tpu.vector_store %arg9[%c0_18, %c0_19, %c0_20, %c0_21], %27 {strides = array<i32>} : memref<1x18x18x128xf32, #tpu.memory_space<vmem>>, vector<1x18x18x128xf32>,
    %c0_22 = arith.constant 0 : index
    %c1_23 = arith.constant 1 : index
    %c1_24 = arith.constant 1 : index
    %c0_25 = arith.constant 0 : index
    %29 = vector.load %arg9[%c0_22, %c1_23, %c1_24, %c0_25] : memref<1x18x18x128xf32, #tpu.memory_space<vmem>>, vector<1x16x16x128xf32>
    tpu.vector_store %arg9[%c0_22, %c1_23, %c1_24, %c0_25], %26 {strides = array<i32>} : memref<1x18x18x128xf32, #tpu.memory_space<vmem>>, vector<1x16x16x128xf32>,
    %cst_26 = arith.constant 0.000000e+00 : f32
    %30 = vector.broadcast %cst_26 : f32 to vector<256x128xf32>
    %c0_27 = arith.constant 0 : index
    %c0_28 = arith.constant 0 : index
    %c0_29 = arith.constant 0 : index
    %c0_30 = arith.constant 0 : index
    %31 = vector.load %arg9[%c0_27, %c0_28, %c0_29, %c0_30] : memref<1x18x18x128xf32, #tpu.memory_space<vmem>>, vector<1x16x16x128xf32>
    %32 = vector.shape_cast %31 : vector<1x16x16x128xf32> to vector<256x128xf32>
    %c0_31 = arith.constant 0 : index
    %c0_32 = arith.constant 0 : index
    %c1_33 = arith.constant 1 : index
    %c0_34 = arith.constant 0 : index
    %33 = vector.load %arg9[%c0_31, %c0_32, %c1_33, %c0_34] : memref<1x18x18x128xf32, #tpu.memory_space<vmem>>, vector<1x16x16x128xf32>
    %34 = vector.shape_cast %33 : vector<1x16x16x128xf32> to vector<256x128xf32>
    %c0_35 = arith.constant 0 : index
    %c0_36 = arith.constant 0 : index
    %c2 = arith.constant 2 : index
    %c0_37 = arith.constant 0 : index
    %35 = vector.load %arg9[%c0_35, %c0_36, %c2, %c0_37] : memref<1x18x18x128xf32, #tpu.memory_space<vmem>>, vector<1x16x16x128xf32>
    %36 = vector.shape_cast %35 : vector<1x16x16x128xf32> to vector<256x128xf32>
    %37 = tpu.concatenate %32, %34, %36 in 1 : vector<256x128xf32>, vector<256x128xf32>, vector<256x128xf32> -> vector<256x384xf32>
    %c0_38 = arith.constant 0 : index
    %c0_39 = arith.constant 0 : index
    %c0_40 = arith.constant 0 : index
    %38 = vector.load %arg5[%c0_38, %c0_39, %c0_40] : memref<3x384x128xf32, #tpu.memory_space<vmem>>, vector<1x384x128xf32>
    %39 = vector.shape_cast %38 : vector<1x384x128xf32> to vector<384x128xf32>
    %cst_41 = arith.constant dense<0.000000e+00> : vector<256x128xf32>
    %40 = tpu.matmul %37, %39, %cst_41 {dimension_numbers = #tpu.dot_dimension_numbers<[1], [0], [0], [1], [0, 0, 1, 1], [], []>} : vector<256x384xf32>, vector<384x128xf32>, vector<256x128xf32> -> vector<256x128xf32>
    %41 = arith.addf %30, %40 : vector<256x128xf32>
    %c0_42 = arith.constant 0 : index
    %c1_43 = arith.constant 1 : index
    %c0_44 = arith.constant 0 : index
    %c0_45 = arith.constant 0 : index
    %42 = vector.load %arg9[%c0_42, %c1_43, %c0_44, %c0_45] : memref<1x18x18x128xf32, #tpu.memory_space<vmem>>, vector<1x16x16x128xf32>
    %43 = vector.shape_cast %42 : vector<1x16x16x128xf32> to vector<256x128xf32>
    %c0_46 = arith.constant 0 : index
    %c1_47 = arith.constant 1 : index
    %c1_48 = arith.constant 1 : index
    %c0_49 = arith.constant 0 : index
    %44 = vector.load %arg9[%c0_46, %c1_47, %c1_48, %c0_49] : memref<1x18x18x128xf32, #tpu.memory_space<vmem>>, vector<1x16x16x128xf32>
    %45 = vector.shape_cast %44 : vector<1x16x16x128xf32> to vector<256x128xf32>
    %c0_50 = arith.constant 0 : index
    %c1_51 = arith.constant 1 : index
    %c2_52 = arith.constant 2 : index
    %c0_53 = arith.constant 0 : index
    %46 = vector.load %arg9[%c0_50, %c1_51, %c2_52, %c0_53] : memref<1x18x18x128xf32, #tpu.memory_space<vmem>>, vector<1x16x16x128xf32>
    %47 = vector.shape_cast %46 : vector<1x16x16x128xf32> to vector<256x128xf32>
    %48 = tpu.concatenate %43, %45, %47 in 1 : vector<256x128xf32>, vector<256x128xf32>, vector<256x128xf32> -> vector<256x384xf32>
    %c1_54 = arith.constant 1 : index
    %c0_55 = arith.constant 0 : index
    %c0_56 = arith.constant 0 : index
    %49 = vector.load %arg5[%c1_54, %c0_55, %c0_56] : memref<3x384x128xf32, #tpu.memory_space<vmem>>, vector<1x384x128xf32>
    %50 = vector.shape_cast %49 : vector<1x384x128xf32> to vector<384x128xf32>
    %cst_57 = arith.constant dense<0.000000e+00> : vector<256x128xf32>
    %51 = tpu.matmul %48, %50, %cst_57 {dimension_numbers = #tpu.dot_dimension_numbers<[1], [0], [0], [1], [0, 0, 1, 1], [], []>} : vector<256x384xf32>, vector<384x128xf32>, vector<256x128xf32> -> vector<256x128xf32>
    %52 = arith.addf %41, %51 : vector<256x128xf32>
    %c0_58 = arith.constant 0 : index
    %c2_59 = arith.constant 2 : index
    %c0_60 = arith.constant 0 : index
    %c0_61 = arith.constant 0 : index
    %53 = vector.load %arg9[%c0_58, %c2_59, %c0_60, %c0_61] : memref<1x18x18x128xf32, #tpu.memory_space<vmem>>, vector<1x16x16x128xf32>
    %54 = vector.shape_cast %53 : vector<1x16x16x128xf32> to vector<256x128xf32>
    %c0_62 = arith.constant 0 : index
    %c2_63 = arith.constant 2 : index
    %c1_64 = arith.constant 1 : index
    %c0_65 = arith.constant 0 : index
    %55 = vector.load %arg9[%c0_62, %c2_63, %c1_64, %c0_65] : memref<1x18x18x128xf32, #tpu.memory_space<vmem>>, vector<1x16x16x128xf32>
    %56 = vector.shape_cast %55 : vector<1x16x16x128xf32> to vector<256x128xf32>
    %c0_66 = arith.constant 0 : index
    %c2_67 = arith.constant 2 : index
    %c2_68 = arith.constant 2 : index
    %c0_69 = arith.constant 0 : index
    %57 = vector.load %arg9[%c0_66, %c2_67, %c2_68, %c0_69] : memref<1x18x18x128xf32, #tpu.memory_space<vmem>>, vector<1x16x16x128xf32>
    %58 = vector.shape_cast %57 : vector<1x16x16x128xf32> to vector<256x128xf32>
    %59 = tpu.concatenate %54, %56, %58 in 1 : vector<256x128xf32>, vector<256x128xf32>, vector<256x128xf32> -> vector<256x384xf32>
    %c2_70 = arith.constant 2 : index
    %c0_71 = arith.constant 0 : index
    %c0_72 = arith.constant 0 : index
    %60 = vector.load %arg5[%c2_70, %c0_71, %c0_72] : memref<3x384x128xf32, #tpu.memory_space<vmem>>, vector<1x384x128xf32>
    %61 = vector.shape_cast %60 : vector<1x384x128xf32> to vector<384x128xf32>
    %cst_73 = arith.constant dense<0.000000e+00> : vector<256x128xf32>
    %62 = tpu.matmul %59, %61, %cst_73 {dimension_numbers = #tpu.dot_dimension_numbers<[1], [0], [0], [1], [0, 0, 1, 1], [], []>} : vector<256x384xf32>, vector<384x128xf32>, vector<256x128xf32> -> vector<256x128xf32>
    %63 = arith.addf %52, %62 : vector<256x128xf32>
    %c0_74 = arith.constant 0 : index
    %c0_75 = arith.constant 0 : index
    %64 = vector.load %arg6[%c0_74, %c0_75] : memref<1x128xf32, #tpu.memory_space<vmem>>, vector<1x128xf32>
    %65 = vector.broadcast %64 : vector<1x128xf32> to vector<256x128xf32>
    %66 = arith.addf %63, %65 : vector<256x128xf32>
    %67 = vector.shape_cast %66 : vector<256x128xf32> to vector<1x16x16x128xf32>
    %c0_76 = arith.constant 0 : index
    %c0_77 = arith.constant 0 : index
    %c0_78 = arith.constant 0 : index
    %c0_79 = arith.constant 0 : index
    %68 = vector.load %arg7[%c0_76, %c0_77, %c0_78, %c0_79] : memref<1x16x16x128xf32, #tpu.memory_space<vmem>>, vector<1x16x16x128xf32>
    tpu.vector_store %arg7[%c0_76, %c0_77, %c0_78, %c0_79], %67 {strides = array<i32>} : memref<1x16x16x128xf32, #tpu.memory_space<vmem>>, vector<1x16x16x128xf32>,
    %cst_80 = arith.constant dense<0.000000e+00> : vector<128xf32>
    %69 = vector.multi_reduction <add>, %66, %cst_80 [0] : vector<256x128xf32> to vector<128xf32>
    %70 = vector.shape_cast %69 : vector<128xf32> to vector<1x128xf32>
    %71 = vector.shape_cast %70 : vector<1x128xf32> to vector<1x1x128xf32>
    %c0_81 = arith.constant 0 : index
    %c0_82 = arith.constant 0 : index
    %c0_83 = arith.constant 0 : index
    %72 = vector.load %arg8[%c0_81, %c0_82, %c0_83] : memref<1x2x128xf32, #tpu.memory_space<vmem>>, vector<1x1x128xf32>
    tpu.vector_store %arg8[%c0_81, %c0_82, %c0_83], %71 {strides = array<i32>} : memref<1x2x128xf32, #tpu.memory_space<vmem>>, vector<1x1x128xf32>,
    %73 = arith.mulf %66, %66 : vector<256x128xf32>
    %cst_84 = arith.constant dense<0.000000e+00> : vector<128xf32>
    %74 = vector.multi_reduction <add>, %73, %cst_84 [0] : vector<256x128xf32> to vector<128xf32>
    %75 = vector.shape_cast %74 : vector<128xf32> to vector<1x128xf32>
    %76 = vector.shape_cast %75 : vector<1x128xf32> to vector<1x1x128xf32>
    %c0_85 = arith.constant 0 : index
    %c1_86 = arith.constant 1 : index
    %c0_87 = arith.constant 0 : index
    %77 = vector.load %arg8[%c0_85, %c1_86, %c0_87] : memref<1x2x128xf32, #tpu.memory_space<vmem>>, vector<1x1x128xf32>
    tpu.vector_store %arg8[%c0_85, %c1_86, %c0_87], %76 {strides = array<i32>} : memref<1x2x128xf32, #tpu.memory_space<vmem>>, vector<1x1x128xf32>,
    return
  }
  func.func @transform_0(%arg0: i32) -> (i32, i32, i32, i32) {
    %c0_i32 = arith.constant 0 : i32
    %c0_i32_0 = arith.constant 0 : i32
    %c0_i32_1 = arith.constant 0 : i32
    %c0_i32_2 = arith.constant 0 : i32
    return %arg0, %c0_i32, %c0_i32_0, %c0_i32_1 : i32, i32, i32, i32
  }
  func.func @transform_1(%arg0: i32) -> (i32, i32, i32) {
    %c0_i32 = arith.constant 0 : i32
    %c0_i32_0 = arith.constant 0 : i32
    %c0_i32_1 = arith.constant 0 : i32
    %c0_i32_2 = arith.constant 0 : i32
    return %c0_i32, %c0_i32_0, %c0_i32_1 : i32, i32, i32
  }
  func.func @transform_2(%arg0: i32) -> (i32, i32) {
    %c0_i32 = arith.constant 0 : i32
    %c0_i32_0 = arith.constant 0 : i32
    %c0_i32_1 = arith.constant 0 : i32
    return %c0_i32, %c0_i32_0 : i32, i32
  }
  func.func @transform_3(%arg0: i32) -> (i32, i32) {
    %c0_i32 = arith.constant 0 : i32
    %c0_i32_0 = arith.constant 0 : i32
    %c0_i32_1 = arith.constant 0 : i32
    return %c0_i32, %c0_i32_0 : i32, i32
  }
  func.func @transform_4(%arg0: i32) -> (i32, i32, i32) {
    %c0_i32 = arith.constant 0 : i32
    %c0_i32_0 = arith.constant 0 : i32
    %c0_i32_1 = arith.constant 0 : i32
    %c0_i32_2 = arith.constant 0 : i32
    return %c0_i32, %c0_i32_0, %c0_i32_1 : i32, i32, i32
  }
  func.func @transform_5(%arg0: i32) -> (i32, i32) {
    %c0_i32 = arith.constant 0 : i32
    %c0_i32_0 = arith.constant 0 : i32
    %c0_i32_1 = arith.constant 0 : i32
    return %c0_i32, %c0_i32_0 : i32, i32
  }
  func.func @transform_6(%arg0: i32) -> (i32, i32, i32, i32) {
    %c0_i32 = arith.constant 0 : i32
    %c0_i32_0 = arith.constant 0 : i32
    %c0_i32_1 = arith.constant 0 : i32
    %c0_i32_2 = arith.constant 0 : i32
    return %arg0, %c0_i32, %c0_i32_0, %c0_i32_1 : i32, i32, i32, i32
  }
  func.func @transform_7(%arg0: i32) -> (i32, i32, i32) {
    %c0_i32 = arith.constant 0 : i32
    %c0_i32_0 = arith.constant 0 : i32
    %c0_i32_1 = arith.constant 0 : i32
    return %arg0, %c0_i32, %c0_i32_0 : i32, i32, i32
  }
}

</mosaic_0001>

<bundles_post_ra>
// kernel: residual_forward.5
= control target key start
LH: loop header
LB: loop body
LE: loop exit
PB: predicated region body
PF: predicated region fallthrough
CT: control target
= control target key end

     0   :  { %s634_s18 = smov 0   ;;  %s847_s0 = inlined_call_operand.vmem [shape: f32[2,16,16,128], index: 0, kind: input, shape index: {}]   ;;  %s848_s1 = inlined_call_operand.vmem [shape: f32[2,2,128], index: 1, kind: input, shape index: {}]   ;;  %s849_s2 = inlined_call_operand.vmem [shape: f32[1,128], index: 2, kind: input, shape index: {}]   ;;  %s850_s3 = inlined_call_operand.vmem [shape: f32[1,128], index: 3, kind: input, shape index: {}]   ;;  %s851_s4 = inlined_call_operand.vmem [shape: f32[2,16,16,128], index: 4, kind: input, shape index: {}]   ;;  %s852_s5 = inlined_call_operand.vmem [shape: f32[2,16,16,128], index: 5, kind: output, shape index: {}]  }
   0x1 LB: > { %s570_s19 = sadd.s32 4294967295, %s602_s18   ;;  %p574_p0 = scmp.ge.s32.totalorder %s602_s18, 1  ;;  %s602_s18 = sphi %s634_s18, %s15_s18  }
   0x2   : > { %p197_p1 = scmp.lt.s32.totalorder %s602_s18, 3 }
   0x4   : > { %p198_p2 = pnand %p574_p0, %p197_p1 }
   0x5   : > { %p230_p3 = scmp.lt.s32.totalorder (!%p198_p2), %s570_s19, 1 }
   0x6   : > { %201 = sbr.rel (%p198_p2) target bundleno = 80 (0x50), region = 40 }
   0xb   : > { %v245_v0 = vld [vmem:[%s848_s1] sm:$0x1]  ;;  %v246_v1 = vld [vmem:[%s848_s1 + $0x2] sm:$0x1]  ;;  %vm247_vm0 = vcmask 1040384   ;;  %s854_s19 = smov (!%p230_p3, %s570_s19), 1  ;;  %v300_v15 = vlaneseq }
   0xc   : > { %v248_v2 = vsel %vm247_vm0, %v245_v0, 0.0  ;;  %v249_v3 = vsel %vm247_vm0, %v246_v1, 0.0  ;;  %v251_v4 = vld [vmem:[%s848_s1 + $0x1] sm:$0x1]  ;;  %v252_v5 = vld [vmem:[%s848_s1 + $0x3] sm:$0x1] }
   0xd   : > { %v250_v6 = vadd.f32 %v249_v3, %v248_v2  ;;  %v253_v7 = vsel %vm247_vm0, %v251_v4, 0.0  ;;  %v254_v8 = vsel %vm247_vm0, %v252_v5, 0.0  ;;  %s654_s28 = sshll.u32 %s854_s19, 8  ;;  %v301_v16 = vshrl.u32 %v300_v15, 7  ;;  %v260_v17 = vld [vmem:[%s849_s2] sm:$0x1] }
   0xe   : > { %v255_v9 = vadd.f32 %v254_v8, %v253_v7  ;;  %s660_s6 = scalar_lea.vmem %s847_s0, %s654_s28  ;;  %v264_v21 = vld [vmem:[%s850_s3] sm:$0x1]  ;;  %s682_s13 = scalar_lea.vmem %s851_s4, %s654_s28 }
   0xf   : > { %v256_v10 = vmul.f32 0.001953125, %v250_v6  ;;  %v302_v18 = vsub.s32 0, %v301_v16  ;;  %v267_v22 = vld [vmem:[%s660_s6] sm:$0xff]  ;;  %v268_v23 = vld [vmem:[%s660_s6 + $0x8] sm:$0xff]  ;;  %v269_v24 = vld [vmem:[%s660_s6 + $0x10] sm:$0xff]  ;;  %s726_s16 = scalar_lea.vmem %s852_s5, %s654_s28 }
  0x10   : > { %v257_v11 = vmul.f32 0.001953125, %v255_v9  ;;  %v270_v25 = vld [vmem:[%s660_s6 + $0x18] sm:$0xff]  ;;  %v271_v26 = vld [vmem:[%s660_s6 + $0x20] sm:$0xff]  ;;  %v272_v29 = vld [vmem:[%s660_s6 + $0x28] sm:$0xff] }
  0x11   : > { %v258_v12 = vmul.f32 %v256_v10, %v256_v10  ;;  %v273_v30 = vld [vmem:[%s660_s6 + $0x30] sm:$0xff]  ;;  %v274_v31 = vld [vmem:[%s660_s6 + $0x38] sm:$0xff]  ;;  %v275_v32 = vld [vmem:[%s660_s6 + $0x40] sm:$0xff] }
  0x12   : > { %v276_v33 = vld [vmem:[%s660_s6 + $0x48] sm:$0xff]  ;;  %v277_v34 = vld [vmem:[%s660_s6 + $0x50] sm:$0xff]  ;;  %v278_v39 = vld [vmem:[%s660_s6 + $0x58] sm:$0xff] }
  0x13   : > { %v259_v13 = vsub.f32 %v257_v11, %v258_v12  ;;  %v279_v40 = vld [vmem:[%s660_s6 + $0x60] sm:$0xff]  ;;  %v280_v41 = vld [vmem:[%s660_s6 + $0x68] sm:$0xff]  ;;  %v377_v52 = vld [vmem:[%s682_s13 + $0x10] sm:$0xff] }
  0x14   : > { %v375_v47 = vld [vmem:[%s682_s13] sm:$0xff]  ;;  %v376_v48 = vld [vmem:[%s682_s13 + $0x8] sm:$0xff]  ;;  %v378_v53 = vld [vmem:[%s682_s13 + $0x18] sm:$0xff] }
  0x15   : > { %v261_v14 = vadd.f32 1e-05, %v259_v13  ;;  %v379_v54 = vld [vmem:[%s682_s13 + $0x20] sm:$0xff]  ;;  %v380_v63 = vld [vmem:[%s682_s13 + $0x28] sm:$0xff]  ;;  %v381_v0 = vld [vmem:[%s682_s13 + $0x30] sm:$0xff] }
  0x16   : > { %v382_v1 = vld [vmem:[%s682_s13 + $0x38] sm:$0xff]  ;;  %v384_v15 = vld [vmem:[%s682_s13 + $0x48] sm:$0xff] }
  0x17   : > { %594 = vrsqrt.f32 %v261_v14  ;;  %v383_v14 = vld [vmem:[%s682_s13 + $0x40] sm:$0xff] }
  0x24   : > { %v595_v19 = vpop.eup %594 }
  0x25   : > { %v263_v20 = vmul.f32 %v595_v19, %v260_v17 }
  0x27   : > { %v265_v27 = vmul.f32 %v263_v20, %v256_v10  ;;  %v673_v28 = vrot.slane %v263_v20, %v302_v18  ;;  %v281_v20 = vld [vmem:[%s660_s6 + $0x70] sm:$0xff] }
  0x29   : > { %v266_v35 = vsub.f32 %v264_v21, %v265_v27  ;;  %v305_v36 = vmul.f32 %v673_v28, %v267_v22  ;;  %v306_v37 = vmul.f32 %v673_v28, %v268_v23  ;;  %v307_v38 = vmul.f32 %v673_v28, %v269_v24  ;;  %v282_v21 = vld [vmem:[%s660_s6 + $0x78] sm:$0xff] }
  0x2a   : > { %v308_v42 = vmul.f32 %v673_v28, %v270_v25  ;;  %v309_v43 = vmul.f32 %v673_v28, %v271_v26  ;;  %v310_v44 = vmul.f32 %v673_v28, %v272_v29  ;;  %v311_v45 = vmul.f32 %v673_v28, %v273_v30  ;;  %v385_v26 = vld [vmem:[%s682_s13 + $0x50] sm:$0xff]  ;;  %v386_v27 = vld [vmem:[%s682_s13 + $0x58] sm:$0xff] }
  0x2b   : > { %v697_v46 = vrot.slane %v266_v35, %v302_v18  ;;  %v312_v49 = vmul.f32 %v673_v28, %v274_v31  ;;  %v313_v50 = vmul.f32 %v673_v28, %v275_v32  ;;  %v314_v51 = vmul.f32 %v673_v28, %v276_v33  ;;  %v387_v33 = vld [vmem:[%s682_s13 + $0x60] sm:$0xff] }
  0x2c   : > { %v315_v55 = vmul.f32 %v673_v28, %v277_v34  ;;  %v316_v56 = vmul.f32 %v673_v28, %v278_v39  ;;  %v317_v57 = vmul.f32 %v673_v28, %v279_v40  ;;  %v318_v58 = vmul.f32 %v673_v28, %v280_v41  ;;  %v388_v34 = vld [vmem:[%s682_s13 + $0x68] sm:$0xff] }
  0x2d   : > { %v343_v59 = vadd.f32 %v697_v46, %v305_v36  ;;  %v344_v60 = vadd.f32 %v697_v46, %v306_v37  ;;  %v345_v61 = vadd.f32 %v697_v46, %v307_v38  ;;  %v346_v62 = vadd.f32 %v697_v46, %v308_v42 }
  0x2e   : > { %v347_v2 = vadd.f32 %v697_v46, %v309_v43  ;;  %v348_v3 = vadd.f32 %v697_v46, %v310_v44  ;;  %v349_v4 = vadd.f32 %v697_v46, %v311_v45  ;;  %v350_v5 = vadd.f32 %v697_v46, %v312_v49  ;;  %v389_v43 = vld [vmem:[%s682_s13 + $0x70] sm:$0xff]  ;;  %v390_v44 = vld [vmem:[%s682_s13 + $0x78] sm:$0xff]  ;;  %v283_v45 = vld [vmem:[%s660_s6 + $0x80] sm:$0xff] }
  0x2f   : > { %v407_v6 = vadd.f32 %v375_v47, %v343_v59  ;;  %v408_v7 = vadd.f32 %v376_v48, %v344_v60  ;;  %v409_v8 = vadd.f32 %v377_v52, %v345_v61  ;;  %v410_v9 = vadd.f32 %v378_v53, %v346_v62  ;;  %v285_v52 = vld [vmem:[%s660_s6 + $0x90] sm:$0xff]  ;;  %v286_v53 = vld [vmem:[%s660_s6 + $0x98] sm:$0xff]  ;;  %v288_v59 = vld [vmem:[%s660_s6 + $0xa8] sm:$0xff] }
  0x30   : > { %v411_v10 = vadd.f32 %v379_v54, %v347_v2  ;;  %v412_v11 = vadd.f32 %v380_v63, %v348_v3  ;;  %v413_v12 = vadd.f32 %v381_v0, %v349_v4  ;;  %v414_v13 = vadd.f32 %v382_v1, %v350_v5  ;;  %v391_v1 = vld [vmem:[%s682_s13 + $0x80] sm:$0xff]  ;;  %v289_v5 = vld [vmem:[%s660_s6 + $0xb0] sm:$0xff] }
  0x31   : > { %v439_v16 = vmax.f32 %v407_v6, 0.0  ;;  %v440_v17 = vmax.f32 %v408_v7, 0.0  ;;  %v441_v18 = vmax.f32 %v409_v8, 0.0  ;;  %v442_v19 = vmax.f32 %v410_v9, 0.0  ;;  %v290_v6 = vld [vmem:[%s660_s6 + $0xb8] sm:$0xff]  ;;  %v392_v9 = vld [vmem:[%s682_s13 + $0x88] sm:$0xff] }
  0x32   : > { %v443_v22 = vmax.f32 %v411_v10, 0.0  ;;  %v444_v23 = vmax.f32 %v412_v11, 0.0  ;;  %v445_v24 = vmax.f32 %v413_v12, 0.0  ;;  %v446_v25 = vmax.f32 %v414_v13, 0.0  ;;  %v393_v10 = vld [vmem:[%s682_s13 + $0x90] sm:$0xff]  ;;  %v394_v11 = vld [vmem:[%s682_s13 + $0x98] sm:$0xff] }
  0x33   : > { %471 = vst [vmem:[%s726_s16] sm:$0xff] %v439_v16  ;;  %472 = vst [vmem:[%s726_s16 + $0x8] sm:$0xff] %v440_v17  ;;  %v351_v29 = vadd.f32 %v697_v46, %v313_v50  ;;  %v352_v30 = vadd.f32 %v697_v46, %v314_v51  ;;  %v353_v31 = vadd.f32 %v697_v46, %v315_v55  ;;  %v284_v51 = vld [vmem:[%s660_s6 + $0x88] sm:$0xff] }
  0x34   : > { %473 = vst [vmem:[%s726_s16 + $0x10] sm:$0xff] %v441_v18  ;;  %474 = vst [vmem:[%s726_s16 + $0x18] sm:$0xff] %v442_v19  ;;  %v354_v32 = vadd.f32 %v697_v46, %v316_v56  ;;  %v355_v35 = vadd.f32 %v697_v46, %v317_v57  ;;  %v356_v36 = vadd.f32 %v697_v46, %v318_v58  ;;  %v287_v58 = vld [vmem:[%s660_s6 + $0xa0] sm:$0xff]  ;;  %v396_v19 = vld [vmem:[%s682_s13 + $0xa8] sm:$0xff] }
  0x35   : > { %475 = vst [vmem:[%s726_s16 + $0x20] sm:$0xff] %v443_v22  ;;  %476 = vst [vmem:[%s726_s16 + $0x28] sm:$0xff] %v444_v23  ;;  %v319_v37 = vmul.f32 %v673_v28, %v281_v20  ;;  %v320_v38 = vmul.f32 %v673_v28, %v282_v21  ;;  %v415_v39 = vadd.f32 %v383_v14, %v351_v29  ;;  %v395_v18 = vld [vmem:[%s682_s13 + $0xa0] sm:$0xff]  ;;  %v397_v29 = vld [vmem:[%s682_s13 + $0xb0] sm:$0xff] }
  0x36   : > { %477 = vst [vmem:[%s726_s16 + $0x30] sm:$0xff] %v445_v24  ;;  %478 = vst [vmem:[%s726_s16 + $0x38] sm:$0xff] %v446_v25  ;;  %v416_v40 = vadd.f32 %v384_v15, %v352_v30  ;;  %v417_v41 = vadd.f32 %v385_v26, %v353_v31  ;;  %v418_v42 = vadd.f32 %v386_v27, %v354_v32  ;;  %v398_v30 = vld [vmem:[%s682_s13 + $0xb8] sm:$0xff]  ;;  %v291_v31 = vld [vmem:[%s660_s6 + $0xc0] sm:$0xff] }
  0x37   : > { %v419_v47 = vadd.f32 %v387_v33, %v355_v35  ;;  %v420_v48 = vadd.f32 %v388_v34, %v356_v36  ;;  %v357_v49 = vadd.f32 %v697_v46, %v319_v37  ;;  %v358_v50 = vadd.f32 %v697_v46, %v320_v38  ;;  %v292_v36 = vld [vmem:[%s660_s6 + $0xc8] sm:$0xff]  ;;  %v293_v37 = vld [vmem:[%s660_s6 + $0xd0] sm:$0xff]  ;;  %v294_v38 = vld [vmem:[%s660_s6 + $0xd8] sm:$0xff] }
  0x38   : > { %v447_v54 = vmax.f32 %v415_v39, 0.0  ;;  %v448_v55 = vmax.f32 %v416_v40, 0.0  ;;  %v449_v56 = vmax.f32 %v417_v41, 0.0  ;;  %v450_v57 = vmax.f32 %v418_v42, 0.0 }
  0x39   : > { %v451_v60 = vmax.f32 %v419_v47, 0.0  ;;  %v452_v61 = vmax.f32 %v420_v48, 0.0  ;;  %v421_v62 = vadd.f32 %v389_v43, %v357_v49  ;;  %v422_v63 = vadd.f32 %v390_v44, %v358_v50  ;;  %v295_v43 = vld [vmem:[%s660_s6 + $0xe0] sm:$0xff]  ;;  %v296_v44 = vld [vmem:[%s660_s6 + $0xe8] sm:$0xff] }
  0x3a   : > { %479 = vst [vmem:[%s726_s16 + $0x40] sm:$0xff] %v447_v54  ;;  %480 = vst [vmem:[%s726_s16 + $0x48] sm:$0xff] %v448_v55  ;;  %v321_v0 = vmul.f32 %v673_v28, %v283_v45  ;;  %v322_v2 = vmul.f32 %v673_v28, %v284_v51  ;;  %v323_v3 = vmul.f32 %v673_v28, %v285_v52  ;;  %v399_v51 = vld [vmem:[%s682_s13 + $0xc0] sm:$0xff]  ;;  %v297_v55 = vld [vmem:[%s660_s6 + $0xf0] sm:$0xff] }
  0x3b   : > { %481 = vst [vmem:[%s726_s16 + $0x50] sm:$0xff] %v449_v56  ;;  %482 = vst [vmem:[%s726_s16 + $0x58] sm:$0xff] %v450_v57  ;;  %v324_v4 = vmul.f32 %v673_v28, %v286_v53  ;;  %v453_v7 = vmax.f32 %v421_v62, 0.0  ;;  %v454_v8 = vmax.f32 %v422_v63, 0.0  ;;  %v325_v12 = vmul.f32 %v673_v28, %v287_v58  ;;  %v298_v56 = vld [vmem:[%s660_s6 + $0xf8] sm:$0xff] }
  0x3c   : > { %483 = vst [vmem:[%s726_s16 + $0x60] sm:$0xff] %v451_v60  ;;  %484 = vst [vmem:[%s726_s16 + $0x68] sm:$0xff] %v452_v61  ;;  %v326_v13 = vmul.f32 %v673_v28, %v288_v59  ;;  %v359_v14 = vadd.f32 %v697_v46, %v321_v0  ;;  %v360_v15 = vadd.f32 %v697_v46, %v322_v2  ;;  %v400_v59 = vld [vmem:[%s682_s13 + $0xc8] sm:$0xff]  ;;  %v401_v60 = vld [vmem:[%s682_s13 + $0xd0] sm:$0xff] }
  0x3d   : > { %v361_v16 = vadd.f32 %v697_v46, %v323_v3  ;;  %v362_v17 = vadd.f32 %v697_v46, %v324_v4  ;;  %485 = vst [vmem:[%s726_s16 + $0x70] sm:$0xff] %v453_v7  ;;  %486 = vst [vmem:[%s726_s16 + $0x78] sm:$0xff] %v454_v8  ;;  %v363_v20 = vadd.f32 %v697_v46, %v325_v12  ;;  %v402_v61 = vld [vmem:[%s682_s13 + $0xd8] sm:$0xff]  ;;  %v403_v4 = vld [vmem:[%s682_s13 + $0xe0] sm:$0xff] }
  0x3e   : > { %v364_v21 = vadd.f32 %v697_v46, %v326_v13  ;;  %v327_v22 = vmul.f32 %v673_v28, %v289_v5  ;;  %v328_v23 = vmul.f32 %v673_v28, %v290_v6  ;;  %v423_v24 = vadd.f32 %v391_v1, %v359_v14  ;;  %v404_v5 = vld [vmem:[%s682_s13 + $0xe8] sm:$0xff]  ;;  %v405_v14 = vld [vmem:[%s682_s13 + $0xf0] sm:$0xff] }
  0x3f   : > { %v424_v25 = vadd.f32 %v392_v9, %v360_v15  ;;  %v425_v26 = vadd.f32 %v393_v10, %v361_v16  ;;  %v426_v27 = vadd.f32 %v394_v11, %v362_v17  ;;  %v427_v32 = vadd.f32 %v395_v18, %v363_v20  ;;  %v406_v15 = vld [vmem:[%s682_s13 + $0xf8] sm:$0xff] }
  0x40   : > { %v428_v33 = vadd.f32 %v396_v19, %v364_v21  ;;  %v365_v34 = vadd.f32 %v697_v46, %v327_v22  ;;  %v366_v35 = vadd.f32 %v697_v46, %v328_v23  ;;  %v455_v39 = vmax.f32 %v423_v24, 0.0 }
  0x41   : > { %v456_v40 = vmax.f32 %v424_v25, 0.0  ;;  %v457_v41 = vmax.f32 %v425_v26, 0.0  ;;  %v458_v42 = vmax.f32 %v426_v27, 0.0  ;;  %v459_v45 = vmax.f32 %v427_v32, 0.0 }
  0x42   : > { %v460_v47 = vmax.f32 %v428_v33, 0.0  ;;  %v429_v48 = vadd.f32 %v397_v29, %v365_v34  ;;  %v430_v49 = vadd.f32 %v398_v30, %v366_v35  ;;  %487 = vst [vmem:[%s726_s16 + $0x80] sm:$0xff] %v455_v39  ;;  %v329_v50 = vmul.f32 %v673_v28, %v291_v31 }
  0x43   : > { %488 = vst [vmem:[%s726_s16 + $0x88] sm:$0xff] %v456_v40  ;;  %489 = vst [vmem:[%s726_s16 + $0x90] sm:$0xff] %v457_v41  ;;  %v330_v52 = vmul.f32 %v673_v28, %v292_v36  ;;  %v331_v53 = vmul.f32 %v673_v28, %v293_v37  ;;  %v332_v54 = vmul.f32 %v673_v28, %v294_v38 }
  0x44   : > { %490 = vst [vmem:[%s726_s16 + $0x98] sm:$0xff] %v458_v42  ;;  %491 = vst [vmem:[%s726_s16 + $0xa0] sm:$0xff] %v459_v45  ;;  %v461_v57 = vmax.f32 %v429_v48, 0.0  ;;  %v462_v58 = vmax.f32 %v430_v49, 0.0  ;;  %v333_v62 = vmul.f32 %v673_v28, %v295_v43  ;;  %v334_v63 = vmul.f32 %v673_v28, %v296_v44 }
  0x45   : > { %492 = vst [vmem:[%s726_s16 + $0xa8] sm:$0xff] %v460_v47  ;;  %v367_v0 = vadd.f32 %v697_v46, %v329_v50  ;;  %v368_v1 = vadd.f32 %v697_v46, %v330_v52  ;;  %v369_v2 = vadd.f32 %v697_v46, %v331_v53  ;;  %v370_v3 = vadd.f32 %v697_v46, %v332_v54 }
  0x46   : > { %493 = vst [vmem:[%s726_s16 + $0xb0] sm:$0xff] %v461_v57  ;;  %494 = vst [vmem:[%s726_s16 + $0xb8] sm:$0xff] %v462_v58  ;;  %v371_v6 = vadd.f32 %v697_v46, %v333_v62  ;;  %v372_v7 = vadd.f32 %v697_v46, %v334_v63  ;;  %v335_v8 = vmul.f32 %v673_v28, %v297_v55 }
  0x47   : > { %v336_v9 = vmul.f32 %v673_v28, %v298_v56  ;;  %v431_v10 = vadd.f32 %v399_v51, %v367_v0  ;;  %v432_v11 = vadd.f32 %v400_v59, %v368_v1  ;;  %v433_v12 = vadd.f32 %v401_v60, %v369_v2 }
  0x48   : > { %v434_v13 = vadd.f32 %v402_v61, %v370_v3  ;;  %v435_v16 = vadd.f32 %v403_v4, %v371_v6  ;;  %v436_v17 = vadd.f32 %v404_v5, %v372_v7  ;;  %v373_v18 = vadd.f32 %v697_v46, %v335_v8 }
  0x49   : > { %v374_v19 = vadd.f32 %v697_v46, %v336_v9  ;;  %v463_v20 = vmax.f32 %v431_v10, 0.0  ;;  %v464_v28 = vmax.f32 %v432_v11, 0.0  ;;  %v465_v21 = vmax.f32 %v433_v12, 0.0 }
  0x4a   : > { %v466_v22 = vmax.f32 %v434_v13, 0.0  ;;  %v467_v23 = vmax.f32 %v435_v16, 0.0  ;;  %v468_v24 = vmax.f32 %v436_v17, 0.0  ;;  %v437_v25 = vadd.f32 %v405_v14, %v373_v18 }
  0x4b   : > { %v438_v26 = vadd.f32 %v406_v15, %v374_v19  ;;  %495 = vst [vmem:[%s726_s16 + $0xc0] sm:$0xff] %v463_v20  ;;  %496 = vst [vmem:[%s726_s16 + $0xc8] sm:$0xff] %v464_v28 }
  0x4c   : > { %497 = vst [vmem:[%s726_s16 + $0xd0] sm:$0xff] %v465_v21  ;;  %498 = vst [vmem:[%s726_s16 + $0xd8] sm:$0xff] %v466_v22  ;;  %v469_v27 = vmax.f32 %v437_v25, 0.0 }
  0x4d   : > { %499 = vst [vmem:[%s726_s16 + $0xe0] sm:$0xff] %v467_v23  ;;  %500 = vst [vmem:[%s726_s16 + $0xe8] sm:$0xff] %v468_v24  ;;  %v470_v29 = vmax.f32 %v438_v26, 0.0 }
  0x4e   : > { %501 = vst [vmem:[%s726_s16 + $0xf0] sm:$0xff] %v469_v27 }
  0x4f   : > { %502 = vst [vmem:[%s726_s16 + $0xf8] sm:$0xff] %v470_v29 }
  0x50 PF: > { %s15_s18 = sadd.s32 1, %s602_s18  }
  0x51   : > { %p12_p4 = scmp.ge.s32.totalorder %s15_s18, 4  }
  0x53   :  { %14 = sbr.rel (!%p12_p4) target bundleno = 1 (0x1), region = 73 }

// kernel: residual_forward.3
= control target key start
LH: loop header
LB: loop body
LE: loop exit
PB: predicated region body
PF: predicated region fallthrough
CT: control target
= control target key end

     0   :  { %s2952_s15 = smov 0   ;;  %s4456_s0 = inlined_call_operand.vmem [shape: f32[2,16,16,128], index: 0, kind: input, shape index: {}]   ;;  %s4457_s1 = inlined_call_operand.vmem [shape: f32[3,384,128], index: 1, kind: input, shape index: {}]   ;;  %s4458_s2 = inlined_call_operand.vmem [shape: f32[1,128], index: 2, kind: input, shape index: {}]   ;;  %s4459_s3 = inlined_call_operand.vmem [shape: f32[2,16,16,128], index: 3, kind: output, shape index: {0}]   ;;  %s4460_s4 = inlined_call_operand.vmem [shape: f32[2,2,128], index: 4, kind: output, shape index: {1}]  }
   0x1 LB: > { %s2410_s16 = sadd.s32 4294967295, %s2924_s15   ;;  %p2414_p0 = scmp.ge.s32.totalorder %s2924_s15, 1  ;;  %s2924_s15 = sphi %s2952_s15, %s15_s15  }
   0x2   : > { %p165_p1 = scmp.lt.s32.totalorder %s2924_s15, 3 }
   0x4   : > { %p166_p2 = pnand %p2414_p0, %p165_p1 }
   0x6   : > { %169 = sbr.rel (%p166_p2) target bundleno = 587 (0x24b), region = 32 }
   0xb   : > { %v2467_v0 = vld [vmem:[%s4457_s1 + $0x2f8] sm:$0xff]  ;;  %v2969_v2 = vld [vmem:[%s4457_s1 + $0x2f0] sm:$0xff]  ;;  %p2973_p3 = scmp.lt.s32.totalorder %s2410_s16, 1  ;;  %v2926_v3 = vmov 0.0   ;;  %v2465_v5 = vld [vmem:[%s4457_s1 + $0x2e8] sm:$0xff] }
   0xc   : > { %v2435_v1 = vld [vmem:[%s4457_s1 + $0x1f8] sm:$0xff]  ;;  %617 = vmatprep.subr.mxu0 %v2926_v3  ;;  %209 = vst [vmem:[#allocation2] sm:$0xff] %v2926_v3  ;;  %210 = vst [vmem:[#allocation2 + $0x8] sm:$0xff] %v2926_v3  ;;  %2665 = vmatprep.subr.mxu1 %v2467_v0  ;;  %v2434_v4 = vld [vmem:[%s4457_s1 + $0x1f0] sm:$0xff] }
   0xd   : > { %211 = vst [vmem:[#allocation2 + $0x10] sm:$0x3] %v2926_v3  ;;  %212 = vst [vmem:[#allocation2 + $0x18] sm:$0xff] %v2926_v3  ;;  %618 = vmatpush1.msra.mxu0 %v2435_v1  ;;  %2666 = vmatpush3.msra.mxu1 %v2467_v0  ;;  %s4494_s16 = smov (!%p2973_p3, %s2410_s16), 1  ;;  %v2433_v6 = vld [vmem:[%s4457_s1 + $0x1e8] sm:$0xff]  ;;  %v2464_v7 = vld [vmem:[%s4457_s1 + $0x2e0] sm:$0xff] }
   0xe   : > { %213 = vst [vmem:[#allocation2 + $0x20] sm:$0xff] %v2926_v3  ;;  %214 = vst [vmem:[#allocation2 + $0x28] sm:$0x3] %v2926_v3  ;;  %619 = vmatprep.subr.mxu0 %v2926_v3  ;;  %2667 = vmatprep.subr.mxu1 %v2969_v2  ;;  %s2519_s6 = sshll.u32 %s4494_s16, 8  ;;  %v2432_v8 = vld [vmem:[%s4457_s1 + $0x1e0] sm:$0xff]  ;;  %v2463_v9 = vld [vmem:[%s4457_s1 + $0x2d8] sm:$0xff] }
   0xf   : > { %215 = vst [vmem:[#allocation2 + $0x30] sm:$0xff] %v2926_v3  ;;  %216 = vst [vmem:[#allocation2 + $0x38] sm:$0xff] %v2926_v3  ;;  %620 = vmatpush1.msra.mxu0 %v2434_v4  ;;  %2668 = vmatpush3.msra.mxu1 %v2969_v2  ;;  %v2431_v10 = vld [vmem:[%s4457_s1 + $0x1d8] sm:$0xff]  ;;  %s3070_s17 = scalar_lea.vmem %s4456_s0, %s2519_s6  ;;  %v2462_v11 = vld [vmem:[%s4457_s1 + $0x2d0] sm:$0xff]  ;;  %s4347_s14 = scalar_lea.vmem %s4459_s3, %s2519_s6 }
  0x10   : > { %217 = vst [vmem:[#allocation2 + $0x40] sm:$0x3] %v2926_v3  ;;  %218 = vst [vmem:[#allocation2 + $0x48] sm:$0xff] %v2926_v3  ;;  %621 = vmatprep.subr.mxu0 %v2926_v3  ;;  %2669 = vmatprep.subr.mxu1 %v2465_v5  ;;  %v2430_v12 = vld [vmem:[%s4457_s1 + $0x1d0] sm:$0xff]  ;;  %v2461_v13 = vld [vmem:[%s4457_s1 + $0x2c8] sm:$0xff]  ;;  %s2419_s6 = sshll.u32 %s4494_s16, 1 }
  0x11   : > { %219 = vst [vmem:[#allocation2 + $0x50] sm:$0xff] %v2926_v3  ;;  %220 = vst [vmem:[#allocation2 + $0x58] sm:$0x3] %v2926_v3  ;;  %622 = vmatpush1.msra.mxu0 %v2433_v6  ;;  %2670 = vmatpush3.msra.mxu1 %v2465_v5  ;;  %v3083_v14 = vld [vmem:[%s3070_s17] sm:$0xff]  ;;  %v2429_v15 = vld [vmem:[%s4457_s1 + $0x1c8] sm:$0xff]  ;;  %s208_s20 = scalar_lea.vmem %s4460_s4, %s2419_s6 }
  0x12   : > { %221 = vst [vmem:[#allocation2 + $0x60] sm:$0xff] %v2926_v3  ;;  %222 = vst [vmem:[#allocation2 + $0x68] sm:$0xff] %v2926_v3  ;;  %623 = vmatprep.subr.mxu0 %v2926_v3  ;;  %2671 = vmatprep.subr.mxu1 %v2464_v7  ;;  %v3090_v16 = vld [vmem:[%s3070_s17 + $0x8] sm:$0xff]  ;;  %v2460_v17 = vld [vmem:[%s4457_s1 + $0x2c0] sm:$0xff] }
  0x13   : > { %223 = vst [vmem:[#allocation2 + $0x70] sm:$0x3] %v2926_v3  ;;  %224 = vst [vmem:[#allocation2 + $0x78] sm:$0xff] %v2926_v3  ;;  %624 = vmatpush1.msra.mxu0 %v2432_v8  ;;  %2672 = vmatpush3.msra.mxu1 %v2464_v7  ;;  %v3098_v18 = vld [vmem:[%s3070_s17 + $0x10] sm:$0xff]  ;;  %v3101_v19 = vld [vmem:[%s3070_s17 + $0x18] sm:$0xff] }
  0x14   : > { %225 = vst [vmem:[#allocation2 + $0x80] sm:$0xff] %v2926_v3  ;;  %226 = vst [vmem:[#allocation2 + $0x88] sm:$0x3] %v2926_v3  ;;  %625 = vmatprep.subr.mxu0 %v2926_v3  ;;  %2673 = vmatprep.subr.mxu1 %v2463_v9  ;;  %v2428_v20 = vld [vmem:[%s4457_s1 + $0x1c0] sm:$0xff]  ;;  %v2459_v21 = vld [vmem:[%s4457_s1 + $0x2b8] sm:$0xff] }
  0x15   : > { %227 = vst [vmem:[#allocation2 + $0x90] sm:$0xff] %v2926_v3  ;;  %228 = vst [vmem:[#allocation2 + $0x98] sm:$0xff] %v2926_v3  ;;  %626 = vmatpush1.msra.mxu0 %v2431_v10  ;;  %2674 = vmatpush3.msra.mxu1 %v2463_v9  ;;  %v3113_v22 = vld [vmem:[%s3070_s17 + $0x20] sm:$0xff]  ;;  %v3116_v23 = vld [vmem:[%s3070_s17 + $0x28] sm:$0xff] }
  0x16   : > { %229 = vst [vmem:[#allocation2 + $0xa0] sm:$0x3] %v2926_v3  ;;  %230 = vst [vmem:[#allocation2 + $0xa8] sm:$0xff] %v2926_v3  ;;  %627 = vmatprep.subr.mxu0 %v2926_v3  ;;  %2675 = vmatprep.subr.mxu1 %v2462_v11  ;;  %v2427_v24 = vld [vmem:[%s4457_s1 + $0x1b8] sm:$0xff]  ;;  %v2458_v25 = vld [vmem:[%s4457_s1 + $0x2b0] sm:$0xff] }
  0x17   : > { %231 = vst [vmem:[#allocation2 + $0xb0] sm:$0xff] %v2926_v3  ;;  %232 = vst [vmem:[#allocation2 + $0xb8] sm:$0x3] %v2926_v3  ;;  %628 = vmatpush1.msra.mxu0 %v2430_v12  ;;  %2676 = vmatpush3.msra.mxu1 %v2462_v11  ;;  %v3128_v26 = vld [vmem:[%s3070_s17 + $0x30] sm:$0xff]  ;;  %v3131_v27 = vld [vmem:[%s3070_s17 + $0x38] sm:$0xff] }
  0x18   : > { %233 = vst [vmem:[#allocation2 + $0xc0] sm:$0xff] %v2926_v3  ;;  %234 = vst [vmem:[#allocation2 + $0xc8] sm:$0xff] %v2926_v3  ;;  %629 = vmatprep.subr.mxu0 %v2926_v3  ;;  %2677 = vmatprep.subr.mxu1 %v2461_v13  ;;  %v2426_v28 = vld [vmem:[%s4457_s1 + $0x1b0] sm:$0xff]  ;;  %v2457_v29 = vld [vmem:[%s4457_s1 + $0x2a8] sm:$0xff] }
  0x19   : > { %235 = vst [vmem:[#allocation2 + $0xd0] sm:$0x3] %v2926_v3  ;;  %236 = vst [vmem:[#allocation2 + $0xd8] sm:$0xff] %v2926_v3  ;;  %630 = vmatpush1.msra.mxu0 %v2429_v15  ;;  %2678 = vmatpush3.msra.mxu1 %v2461_v13  ;;  %v3143_v30 = vld [vmem:[%s3070_s17 + $0x40] sm:$0xff]  ;;  %v3146_v31 = vld [vmem:[%s3070_s17 + $0x48] sm:$0xff] }
  0x1a   : > { %237 = vst [vmem:[#allocation2 + $0xe0] sm:$0xff] %v2926_v3  ;;  %238 = vst [vmem:[#allocation2 + $0xe8] sm:$0x3] %v2926_v3  ;;  %631 = vmatprep.subr.mxu0 %v2926_v3  ;;  %2679 = vmatprep.subr.mxu1 %v2460_v17  ;;  %v2425_v32 = vld [vmem:[%s4457_s1 + $0x1a8] sm:$0xff]  ;;  %v2456_v33 = vld [vmem:[%s4457_s1 + $0x2a0] sm:$0xff] }
  0x1b   : > { %239 = vst [vmem:[#allocation2 + $0xf0] sm:$0xff] %v2926_v3  ;;  %240 = vst [vmem:[#allocation2 + $0xf8] sm:$0xff] %v2926_v3  ;;  %632 = vmatpush1.msra.mxu0 %v2428_v20  ;;  %2680 = vmatpush3.msra.mxu1 %v2460_v17  ;;  %v2424_v34 = vld [vmem:[%s4457_s1 + $0x1a0] sm:$0xff]  ;;  %v3162_v35 = vld [vmem:[%s3070_s17 + $0x50] sm:$0xff] }
  0x1c   : > { %241 = vst [vmem:[#allocation2 + $0x100] sm:$0x3] %v2926_v3  ;;  %242 = vst [vmem:[#allocation2 + $0x108] sm:$0xff] %v2926_v3  ;;  %633 = vmatprep.subr.mxu0 %v2926_v3  ;;  %2681 = vmatprep.subr.mxu1 %v2459_v21  ;;  %v2455_v36 = vld [vmem:[%s4457_s1 + $0x298] sm:$0xff]  ;;  %v2454_v39 = vld [vmem:[%s4457_s1 + $0x290] sm:$0xff] }
  0x1d   : > { %243 = vst [vmem:[#allocation2 + $0x110] sm:$0xff] %v2926_v3  ;;  %244 = vst [vmem:[#allocation2 + $0x118] sm:$0x3] %v2926_v3  ;;  %634 = vmatpush1.msra.mxu0 %v2427_v24  ;;  %2682 = vmatpush3.msra.mxu1 %v2459_v21  ;;  %v3168_v37 = vld [vmem:[%s3070_s17 + $0x58] sm:$0xff]  ;;  %v2422_v40 = vld [vmem:[%s4457_s1 + $0x190] sm:$0xff] }
  0x1e   : > { %245 = vst [vmem:[#allocation2 + $0x120] sm:$0xff] %v2926_v3  ;;  %246 = vst [vmem:[#allocation2 + $0x128] sm:$0xff] %v2926_v3  ;;  %635 = vmatprep.subr.mxu0 %v2926_v3  ;;  %2683 = vmatprep.subr.mxu1 %v2458_v25  ;;  %v2423_v38 = vld [vmem:[%s4457_s1 + $0x198] sm:$0xff]  ;;  %v3184_v41 = vld [vmem:[%s3070_s17 + $0x60] sm:$0xff] }
  0x1f   : > { %247 = vst [vmem:[#allocation2 + $0x130] sm:$0x3] %v2926_v3  ;;  %248 = vst [vmem:[#allocation2 + $0x138] sm:$0xff] %v2926_v3  ;;  %636 = vmatpush1.msra.mxu0 %v2426_v28  ;;  %2684 = vmatpush3.msra.mxu1 %v2458_v25  ;;  %v3187_v42 = vld [vmem:[%s3070_s17 + $0x68] sm:$0xff]  ;;  %v3199_v45 = vld [vmem:[%s3070_s17 + $0x70] sm:$0xff] }
  0x20   : > { %249 = vst [vmem:[#allocation2 + $0x140] sm:$0xff] %v2926_v3  ;;  %250 = vst [vmem:[#allocation2 + $0x148] sm:$0x3] %v2926_v3  ;;  %637 = vmatprep.subr.mxu0 %v2926_v3  ;;  %2685 = vmatprep.subr.mxu1 %v2457_v29  ;;  %v2453_v43 = vld [vmem:[%s4457_s1 + $0x288] sm:$0xff]  ;;  %v2452_v46 = vld [vmem:[%s4457_s1 + $0x280] sm:$0xff] }
  0x21   : > { %251 = vst [vmem:[#allocation2 + $0x150] sm:$0xff] %v2926_v3  ;;  %252 = vst [vmem:[#allocation2 + $0x158] sm:$0xff] %v2926_v3  ;;  %638 = vmatpush1.msra.mxu0 %v2425_v32  ;;  %2686 = vmatpush3.msra.mxu1 %v2457_v29  ;;  %v2421_v44 = vld [vmem:[%s4457_s1 + $0x188] sm:$0xff]  ;;  %v3205_v47 = vld [vmem:[%s3070_s17 + $0x78] sm:$0xff] }
  0x22   : > { %253 = vst [vmem:[#allocation2 + $0x160] sm:$0x3] %v2926_v3  ;;  %254 = vst [vmem:[#allocation2 + $0x168] sm:$0xff] %v2926_v3  ;;  %639 = vmatprep.subr.mxu0 %v2926_v3  ;;  %2687 = vmatprep.subr.mxu1 %v2456_v33  ;;  %v2420_v48 = vld [vmem:[%s4457_s1 + $0x180] sm:$0xff]  ;;  %v3217_v51 = vld [vmem:[%s3070_s17 + $0x88] sm:$0xff] }
  0x23   : > { %255 = vst [vmem:[#allocation2 + $0x170] sm:$0xff] %v2926_v3  ;;  %256 = vst [vmem:[#allocation2 + $0x178] sm:$0x3] %v2926_v3  ;;  %640 = vmatpush1.msra.mxu0 %v2424_v34  ;;  %2688 = vmatpush3.msra.mxu1 %v2456_v33  ;;  %v3214_v49 = vld [vmem:[%s3070_s17 + $0x80] sm:$0xff]  ;;  %v2451_v53 = vld [vmem:[%s4457_s1 + $0x278] sm:$0xff] }
  0x24   : > { %257 = vst [vmem:[#allocation2 + $0x180] sm:$0xff] %v2926_v3  ;;  %258 = vst [vmem:[#allocation2 + $0x188] sm:$0xff] %v2926_v3  ;;  %641 = vmatprep.subr.mxu0 %v2926_v3  ;;  %2689 = vmatprep.subr.mxu1 %v2455_v36  ;;  %v439_v54 = vld [vmem:[%s4457_s1 + $0x78] sm:$0xff]  ;;  %v3229_v55 = vld [vmem:[%s3070_s17 + $0x90] sm:$0xff] }
  0x25   : > { %259 = vst [vmem:[#allocation2 + $0x190] sm:$0x3] %v2926_v3  ;;  %260 = vst [vmem:[#allocation2 + $0x198] sm:$0xff] %v2926_v3  ;;  %642 = vmatpush1.msra.mxu0 %v2423_v38  ;;  %2690 = vmatpush3.msra.mxu1 %v2455_v36  ;;  %v3232_v56 = vld [vmem:[%s3070_s17 + $0x98] sm:$0xff]  ;;  %v2450_v57 = vld [vmem:[%s4457_s1 + $0x270] sm:$0xff] }
  0x26   : > { %261 = vst [vmem:[#allocation2 + $0x1a0] sm:$0xff] %v2926_v3  ;;  %262 = vst [vmem:[#allocation2 + $0x1a8] sm:$0x3] %v2926_v3  ;;  %643 = vmatprep.subr.mxu0 %v2926_v3  ;;  %2691 = vmatprep.subr.mxu1 %v2454_v39  ;;  %v3242_v59 = vld [vmem:[%s3070_s17 + $0xa0] sm:$0xff]  ;;  %v3245_v60 = vld [vmem:[%s3070_s17 + $0xa8] sm:$0xff] }
  0x27   : > { %296 = vst [vmem:[#allocation2 + $0x19] sm:$0xff] %v3083_v14  ;;  %297 = vst [vmem:[#allocation2 + $0x21] sm:$0xff] %v3090_v16  ;;  %644 = vmatpush1.msra.mxu0 %v2422_v40  ;;  %2692 = vmatpush3.msra.mxu1 %v2454_v39  ;;  %v438_v61 = vld [vmem:[%s4457_s1 + $0x70] sm:$0xff]  ;;  %v2449_v0 = vld [vmem:[%s4457_s1 + $0x268] sm:$0xff] }
  0x28   : > { %298 = vst [vmem:[#allocation2 + $0x31] sm:$0xff] %v3098_v18  ;;  %299 = vst [vmem:[#allocation2 + $0x39] sm:$0xff] %v3101_v19  ;;  %645 = vmatprep.subr.mxu0 %v2926_v3  ;;  %2693 = vmatprep.subr.mxu1 %v2453_v43  ;;  %v3255_v63 = vld [vmem:[%s3070_s17 + $0xb0] sm:$0xff]  ;;  %v437_v1 = vld [vmem:[%s4457_s1 + $0x68] sm:$0xff] }
  0x29   : > { %300 = vst [vmem:[#allocation2 + $0x49] sm:$0xff] %v3113_v22  ;;  %301 = vst [vmem:[#allocation2 + $0x51] sm:$0xff] %v3116_v23  ;;  %646 = vmatpush1.msra.mxu0 %v2421_v44  ;;  %2694 = vmatpush3.msra.mxu1 %v2453_v43  ;;  %v3264_v2 = vld [vmem:[%s3070_s17 + $0xb8] sm:$0xff]  ;;  %v2448_v4 = vld [vmem:[%s4457_s1 + $0x260] sm:$0xff] }
  0x2a   : > { %302 = vst [vmem:[#allocation2 + $0x61] sm:$0xff] %v3128_v26  ;;  %303 = vst [vmem:[#allocation2 + $0x69] sm:$0xff] %v3131_v27  ;;  %647 = vmatprep.subr.mxu0 %v2926_v3  ;;  %2695 = vmatprep.subr.mxu1 %v2452_v46  ;;  %v3274_v6 = vld [vmem:[%s3070_s17 + $0xc0] sm:$0xff]  ;;  %v3277_v7 = vld [vmem:[%s3070_s17 + $0xc8] sm:$0xff] }
  0x2b   : > { %304 = vst [vmem:[#allocation2 + $0x79] sm:$0xff] %v3143_v30  ;;  %305 = vst [vmem:[#allocation2 + $0x81] sm:$0xff] %v3146_v31  ;;  %648 = vmatpush1.msra.mxu0 %v2420_v48  ;;  %2696 = vmatpush3.msra.mxu1 %v2452_v46  ;;  %v436_v8 = vld [vmem:[%s4457_s1 + $0x60] sm:$0xff]  ;;  %v3287_v10 = vld [vmem:[%s3070_s17 + $0xd0] sm:$0xff] }
  0x2c   : > { %306 = vst [vmem:[#allocation2 + $0x91] sm:$0xff] %v3162_v35  ;;  %307 = vst [vmem:[#allocation2 + $0x99] sm:$0xff] %v3168_v37  ;;  %649 = vmatprep.subr.mxu0 %v2926_v3  ;;  %1067 = vmatprep.subr.mxu1 %v2926_v3  ;;  %v3290_v11 = vld [vmem:[%s3070_s17 + $0xd8] sm:$0xff]  ;;  %v3302_v15 = vld [vmem:[%s3070_s17 + $0xe0] sm:$0xff] }
  0x2d   : > { %308 = vst [vmem:[#allocation2 + $0xa9] sm:$0xff] %v3184_v41  ;;  %309 = vst [vmem:[#allocation2 + $0xb1] sm:$0xff] %v3187_v42  ;;  %650 = vmatpush2.msra.mxu0 %v2451_v53  ;;  %v2447_v12 = vld [vmem:[%s4457_s1 + $0x258] sm:$0xff]  ;;  %v2446_v17 = vld [vmem:[%s4457_s1 + $0x250] sm:$0xff]  ;;  %681 = vmatprep.mubr.f32.mxu0 %v3083_v14 }
  0x2e   : > { %310 = vst [vmem:[#allocation2 + $0xc1] sm:$0xff] %v3199_v45  ;;  %311 = vst [vmem:[#allocation2 + $0xc9] sm:$0xff] %v3205_v47  ;;  %v536_v50 = vld [vmem:[#allocation2 + $0x1a] sm:$0xff]  ;;  %v537_v52 = vld [vmem:[#allocation2 + $0x22] sm:$0xff]  ;;  %651 = vmatprep.subr.mxu0 %v2926_v3 }
  0x2f   : > { %312 = vst [vmem:[#allocation2 + $0xd9] sm:$0xff] %v3214_v49  ;;  %313 = vst [vmem:[#allocation2 + $0xe1] sm:$0xff] %v3217_v51  ;;  %2697 = vmatprep.mubr.f32.mxu1 %v536_v50  ;;  %v538_v58 = vld [vmem:[#allocation2 + $0x32] sm:$0xff]  ;;  %v539_v62 = vld [vmem:[#allocation2 + $0x3a] sm:$0xff]  ;;  %652 = vmatpush2.msra.mxu0 %v2450_v57 }
  0x30   : > { %314 = vst [vmem:[#allocation2 + $0xf1] sm:$0xff] %v3229_v55  ;;  %315 = vst [vmem:[#allocation2 + $0xf9] sm:$0xff] %v3232_v56  ;;  %2698 = vmatmul.mubr.f32.vlgmr.msra.gmra.mxu1 %v537_v52  ;;  %653 = vmatprep.subr.mxu0 %v2926_v3  ;;  %v540_v5 = vld [vmem:[#allocation2 + $0x4a] sm:$0xff]  ;;  %v541_v9 = vld [vmem:[#allocation2 + $0x52] sm:$0xff] }
  0x31   : > { %1068 = vmatpush1.msra.mxu1 %v439_v54  ;;  %316 = vst [vmem:[#allocation2 + $0x109] sm:$0xff] %v3242_v59  ;;  %317 = vst [vmem:[#allocation2 + $0x111] sm:$0xff] %v3245_v60  ;;  %2700 = vmatprep.mubr.f32.mxu1 %v538_v58  ;;  %v435_v13 = vld [vmem:[%s4457_s1 + $0x58] sm:$0xff]  ;;  %v542_v20 = vld [vmem:[#allocation2 + $0x62] sm:$0xff] }
  0x32   : > { %1069 = vmatprep.subr.mxu1 %v2926_v3  ;;  %318 = vst [vmem:[#allocation2 + $0x121] sm:$0xff] %v3255_v63  ;;  %319 = vst [vmem:[#allocation2 + $0x129] sm:$0xff] %v3264_v2  ;;  %654 = vmatpush2.msra.mxu0 %v2449_v0  ;;  %v3309_v21 = vld [vmem:[%s3070_s17 + $0xe8] sm:$0xff]  ;;  %v434_v24 = vld [vmem:[%s4457_s1 + $0x50] sm:$0xff] }
  0x33   : > { %1070 = vmatpush1.msra.mxu1 %v438_v61  ;;  %320 = vst [vmem:[#allocation2 + $0x139] sm:$0xff] %v3274_v6  ;;  %321 = vst [vmem:[#allocation2 + $0x141] sm:$0xff] %v3277_v7  ;;  %655 = vmatprep.subr.mxu0 %v2926_v3  ;;  %v543_v25 = vld [vmem:[#allocation2 + $0x6a] sm:$0xff]  ;;  %v3322_v29 = vld [vmem:[%s3070_s17 + $0xf8] sm:$0xff] }
  0x34   : > { %2701 = vmatmul.mubr.f32.gmra.mxu1 %v539_v62  ;;  %1071 = vmatprep.subr.mxu1 %v2926_v3  ;;  %322 = vst [vmem:[#allocation2 + $0x151] sm:$0xff] %v3287_v10  ;;  %323 = vst [vmem:[#allocation2 + $0x159] sm:$0xff] %v3290_v11  ;;  %v3319_v28 = vld [vmem:[%s3070_s17 + $0xf0] sm:$0xff]  ;;  %v2445_v32 = vld [vmem:[%s4457_s1 + $0x248] sm:$0xff] }
  0x35   : > { %1072 = vmatpush1.msra.mxu1 %v437_v1  ;;  %656 = vmatpush2.msra.mxu0 %v2448_v4  ;;  %324 = vst [vmem:[#allocation2 + $0x169] sm:$0xff] %v3302_v15  ;;  %325 = vst [vmem:[#allocation2 + $0x171] sm:$0xff] %v3309_v21  ;;  %v433_v33 = vld [vmem:[%s4457_s1 + $0x48] sm:$0xff]  ;;  %v2444_v34 = vld [vmem:[%s4457_s1 + $0x240] sm:$0xff] }
  0x36   : > { %1073 = vmatprep.subr.mxu1 %v2926_v3  ;;  %2703 = vmatprep.mubr.f32.mxu1 %v540_v5  ;;  %326 = vst [vmem:[#allocation2 + $0x181] sm:$0xff] %v3319_v28  ;;  %327 = vst [vmem:[#allocation2 + $0x189] sm:$0xff] %v3322_v29  ;;  %v544_v36 = vld [vmem:[#allocation2 + $0x7a] sm:$0xff]  ;;  %v545_v39 = vld [vmem:[#allocation2 + $0x82] sm:$0xff] }
  0x37   : > { %1074 = vmatpush1.msra.mxu1 %v436_v8  ;;  %657 = vmatprep.subr.mxu0 %v2926_v3  ;;  %v432_v38 = vld [vmem:[%s4457_s1 + $0x40] sm:$0xff]  ;;  %v2443_v40 = vld [vmem:[%s4457_s1 + $0x238] sm:$0xff]  ;;  %v2442_v44 = vld [vmem:[%s4457_s1 + $0x230] sm:$0xff] }
  0x38   : > { %2704 = vmatmul.mubr.f32.gmra.mxu1 %v541_v9  ;;  %1075 = vmatprep.subr.mxu1 %v2926_v3  ;;  %v431_v43 = vld [vmem:[%s4457_s1 + $0x38] sm:$0xff]  ;;  %v430_v48 = vld [vmem:[%s4457_s1 + $0x30] sm:$0xff]  ;;  %v2441_v52 = vld [vmem:[%s4457_s1 + $0x228] sm:$0xff] }
  0x39   : > { %658 = vmatpush2.msra.mxu0 %v2447_v12  ;;  %1076 = vmatpush1.msra.mxu1 %v435_v13  ;;  %v546_v46 = vld [vmem:[#allocation2 + $0x92] sm:$0xff]  ;;  %v547_v50 = vld [vmem:[#allocation2 + $0x9a] sm:$0xff]  ;;  %v429_v53 = vld [vmem:[%s4457_s1 + $0x28] sm:$0xff] }
  0x3a   : > { %659 = vmatprep.subr.mxu0 %v2926_v3  ;;  %1077 = vmatprep.subr.mxu1 %v2926_v3  ;;  %v2440_v54 = vld [vmem:[%s4457_s1 + $0x220] sm:$0xff]  ;;  %v548_v57 = vld [vmem:[#allocation2 + $0xaa] sm:$0xff]  ;;  %v549_v61 = vld [vmem:[#allocation2 + $0xb2] sm:$0xff] }
  0x3b   : > { %660 = vmatpush2.msra.mxu0 %v2446_v17  ;;  %2706 = vmatprep.mubr.f32.mxu1 %v542_v20  ;;  %v428_v58 = vld [vmem:[%s4457_s1 + $0x20] sm:$0xff]  ;;  %v2439_v62 = vld [vmem:[%s4457_s1 + $0x218] sm:$0xff]  ;;  %v2438_v1 = vld [vmem:[%s4457_s1 + $0x210] sm:$0xff] }
  0x3c   : > { %1078 = vmatpush1.msra.mxu1 %v434_v24  ;;  %661 = vmatprep.subr.mxu0 %v2926_v3  ;;  %v427_v0 = vld [vmem:[%s4457_s1 + $0x18] sm:$0xff]  ;;  %v550_v4 = vld [vmem:[#allocation2 + $0xc2] sm:$0xff]  ;;  %v426_v5 = vld [vmem:[%s4457_s1 + $0x10] sm:$0xff] }
  0x3d   : > { %2707 = vmatmul.mubr.f32.gmra.mxu1 %v543_v25  ;;  %1079 = vmatprep.subr.mxu1 %v2926_v3  ;;  %v551_v8 = vld [vmem:[#allocation2 + $0xca] sm:$0xff]  ;;  %v2436_v13 = vld [vmem:[%s4457_s1 + $0x200] sm:$0xff]  ;;  %v3406_v24 = vld [vmem:[#allocation2 + $0x18] sm:$0xff] }
  0x3e   : > { %662 = vmatpush2.msra.mxu0 %v2445_v32  ;;  %1080 = vmatpush1.msra.mxu1 %v433_v33  ;;  %v2437_v9 = vld [vmem:[%s4457_s1 + $0x208] sm:$0xff]  ;;  %v552_v17 = vld [vmem:[#allocation2 + $0xda] sm:$0xff]  ;;  %v554_v33 = vld [vmem:[#allocation2 + $0xf2] sm:$0xff] }
  0x3f   : > { %663 = vmatprep.subr.mxu0 %v2926_v3  ;;  %1081 = vmatprep.subr.mxu1 %v2926_v3  ;;  %v425_v12 = vld [vmem:[%s4457_s1 + $0x8] sm:$0xff]  ;;  %v424_v20 = vld [vmem:[%s4457_s1] sm:$0xff]  ;;  %v455_v32 = vld [vmem:[%s4457_s1 + $0xf8] sm:$0xff] }
  0x40   : > { %664 = vmatpush2.msra.mxu0 %v2444_v34  ;;  %2709 = vmatprep.mubr.f32.mxu1 %v544_v36  ;;  %v553_v25 = vld [vmem:[#allocation2 + $0xe2] sm:$0xff]  ;;  %v3416_v34 = vld [vmem:[%s4457_s1 + $0x178] sm:$0xff]  ;;  %v454_v36 = vld [vmem:[%s4457_s1 + $0xf0] sm:$0xff] }
  0x41   : > { %1082 = vmatpush1.msra.mxu1 %v432_v38  ;;  %665 = vmatprep.subr.mxu0 %v2926_v3  ;;  %v3423_v38 = vld [vmem:[#allocation2 + $0x20] sm:$0xff] }
  0x42   : > { %2710 = vmatmul.mubr.f32.gmra.mxu1 %v545_v39  ;;  %1083 = vmatprep.subr.mxu1 %v2926_v3  ;;  %v555_v39 = vld [vmem:[#allocation2 + $0xfa] sm:$0xff] }
  0x43   : > { %666 = vmatpush2.msra.mxu0 %v2443_v40  ;;  %1084 = vmatpush1.msra.mxu1 %v431_v43  ;;  %v453_v40 = vld [vmem:[%s4457_s1 + $0xe8] sm:$0xff] }
  0x44   : > { %667 = vmatprep.subr.mxu0 %v2926_v3  ;;  %1085 = vmatprep.subr.mxu1 %v2926_v3  ;;  %v556_v43 = vld [vmem:[#allocation2 + $0x10a] sm:$0xff] }
  0x45   : > { %668 = vmatpush2.msra.mxu0 %v2442_v44  ;;  %2712 = vmatprep.mubr.f32.mxu1 %v546_v46  ;;  %v452_v44 = vld [vmem:[%s4457_s1 + $0xe0] sm:$0xff]  ;;  %v3435_v46 = vld [vmem:[#allocation2 + $0x30] sm:$0xff] }
  0x46   : > { %1086 = vmatpush1.msra.mxu1 %v430_v48  ;;  %669 = vmatprep.subr.mxu0 %v2926_v3  ;;  %v557_v48 = vld [vmem:[#allocation2 + $0x112] sm:$0xff] }
  0x47   : > { %2713 = vmatmul.mubr.f32.gmra.mxu1 %v547_v50  ;;  %1087 = vmatprep.subr.mxu1 %v2926_v3  ;;  %v451_v50 = vld [vmem:[%s4457_s1 + $0xd8] sm:$0xff] }
  0x48   : > { %670 = vmatpush2.msra.mxu0 %v2441_v52  ;;  %1088 = vmatpush1.msra.mxu1 %v429_v53  ;;  %v558_v52 = vld [vmem:[#allocation2 + $0x122] sm:$0xff]  ;;  %v450_v53 = vld [vmem:[%s4457_s1 + $0xd0] sm:$0xff] }
  0x49   : > { %671 = vmatprep.subr.mxu0 %v2926_v3  ;;  %1089 = vmatprep.subr.mxu1 %v2926_v3 }
  0x4a   : > { %672 = vmatpush2.msra.mxu0 %v2440_v54  ;;  %2715 = vmatprep.mubr.f32.mxu1 %v548_v57  ;;  %v3447_v54 = vld [vmem:[#allocation2 + $0x38] sm:$0xff]  ;;  %v559_v57 = vld [vmem:[#allocation2 + $0x12a] sm:$0xff] }
  0x4b   : > { %1090 = vmatpush1.msra.mxu1 %v428_v58  ;;  %673 = vmatprep.subr.mxu0 %v2926_v3  ;;  %v449_v58 = vld [vmem:[%s4457_s1 + $0xc8] sm:$0xff] }
  0x4c   : > { %2716 = vmatmul.mubr.f32.gmra.mxu1 %v549_v61  ;;  %1091 = vmatprep.subr.mxu1 %v2926_v3  ;;  %v560_v61 = vld [vmem:[#allocation2 + $0x13a] sm:$0xff] }
  0x4d   : > { %674 = vmatpush2.msra.mxu0 %v2439_v62  ;;  %1092 = vmatpush1.msra.mxu1 %v427_v0  ;;  %v448_v62 = vld [vmem:[%s4457_s1 + $0xc0] sm:$0xff]  ;;  %v3459_v0 = vld [vmem:[#allocation2 + $0x48] sm:$0xff] }
  0x4e   : > { %675 = vmatprep.subr.mxu0 %v2926_v3  ;;  %1093 = vmatprep.subr.mxu1 %v2926_v3 }
  0x4f   : > { %676 = vmatpush2.msra.mxu0 %v2438_v1  ;;  %2718 = vmatprep.mubr.f32.mxu1 %v550_v4  ;;  %v561_v1 = vld [vmem:[#allocation2 + $0x142] sm:$0xff]  ;;  %v447_v4 = vld [vmem:[%s4457_s1 + $0xb8] sm:$0xff] }
  0x50   : > { %1094 = vmatpush1.msra.mxu1 %v426_v5  ;;  %677 = vmatprep.subr.mxu0 %v2926_v3  ;;  %v562_v5 = vld [vmem:[#allocation2 + $0x152] sm:$0xff] }
  0x51   : > { %2719 = vmatmul.mubr.f32.gmra.mxu1 %v551_v8  ;;  %1095 = vmatprep.subr.mxu1 %v2926_v3  ;;  %v446_v8 = vld [vmem:[%s4457_s1 + $0xb0] sm:$0xff] }
  0x52   : > { %678 = vmatpush2.msra.mxu0 %v2437_v9  ;;  %1096 = vmatpush1.msra.mxu1 %v425_v12  ;;  %v3471_v9 = vld [vmem:[#allocation2 + $0x50] sm:$0xff]  ;;  %v563_v12 = vld [vmem:[#allocation2 + $0x15a] sm:$0xff] }
  0x53   : > { %679 = vmatprep.subr.mxu0 %v2926_v3  ;;  %1097 = vmatprep.subr.mxu1 %v2926_v3 }
  0x54   : > { %680 = vmatpush2.msra.mxu0 %v2436_v13  ;;  %2721 = vmatprep.mubr.f32.mxu1 %v552_v17  ;;  %v445_v13 = vld [vmem:[%s4457_s1 + $0xa8] sm:$0xff] }
  0x55   : > { %1098 = vmatpush1.msra.mxu1 %v424_v20  ;;  %682 = vmatmul.mubr.f32.vlgmr.msra.gmra.mxu0 %v3406_v24  ;;  %v564_v17 = vld [vmem:[#allocation2 + $0x16a] sm:$0xff]  ;;  %v444_v20 = vld [vmem:[%s4457_s1 + $0xa0] sm:$0xff] }
  0x56   : > { %2722 = vmatmul.mubr.f32.gmra.mxu1 %v553_v25  ;;  %1099 = vmatprep.subr.mxu1 %v2926_v3  ;;  %v3483_v25 = vld [vmem:[#allocation2 + $0x60] sm:$0xff] }
  0x57   : > { %686 = vmatprep.mubr.f32.mxu0 %v3090_v16  ;;  %1100 = vmatpush2.msra.mxu1 %v455_v32  ;;  %v565_v32 = vld [vmem:[#allocation2 + $0x172] sm:$0xff] }
  0x58   : > { %2724 = vmatprep.mubr.f32.mxu1 %v554_v33  ;;  %1101 = vmatprep.subr.mxu1 %v2926_v3  ;;  %v443_v33 = vld [vmem:[%s4457_s1 + $0x98] sm:$0xff] }
  0x59   : > { %2745 = vmatprep.subr.mxu0 %v3416_v34  ;;  %1102 = vmatpush2.msra.mxu1 %v454_v36  ;;  %v566_v36 = vld [vmem:[#allocation2 + $0x182] sm:$0xff] }
  0x5a   : > { %687 = vmatmul.mubr.f32.gmra.mxu0 %v3423_v38  ;;  %2725 = vmatmul.mubr.f32.gmra.mxu1 %v555_v39  ;;  %v442_v39 = vld [vmem:[%s4457_s1 + $0x90] sm:$0xff] }
  0x5b   : > { %1103 = vmatprep.subr.mxu1 %v2926_v3  ;;  %691 = vmatprep.mubr.f32.mxu0 %v3098_v18 }
  0x5c   : > { %1104 = vmatpush2.msra.mxu1 %v453_v40  ;;  %2727 = vmatprep.mubr.f32.mxu1 %v556_v43  ;;  %v3495_v40 = vld [vmem:[#allocation2 + $0x68] sm:$0xff] }
  0x5d   : > { %1105 = vmatprep.subr.mxu1 %v2926_v3  ;;  %v567_v43 = vld [vmem:[#allocation2 + $0x18a] sm:$0xff]  ;;  %2746 = vmatpush3.msra.mxu0 %v3416_v34 }
  0x5e   : > { %1106 = vmatpush2.msra.mxu1 %v452_v44  ;;  %692 = vmatmul.mubr.f32.gmra.mxu0 %v3435_v46  ;;  %v441_v44 = vld [vmem:[%s4457_s1 + $0x88] sm:$0xff]  ;;  %v470_v34 = vld [vmem:[%s4457_s1 + $0x170] sm:$0xff] }
  0x5f   : > { %2728 = vmatmul.mubr.f32.gmra.mxu1 %v557_v48  ;;  %1107 = vmatprep.subr.mxu1 %v2926_v3  ;;  %v440_v48 = vld [vmem:[%s4457_s1 + $0x80] sm:$0xff] }
  0x60   : > { %1108 = vmatpush2.msra.mxu1 %v451_v50  ;;  %696 = vmatprep.mubr.f32.mxu0 %v3101_v19  ;;  %v360_v50 = vld [vmem:[#allocation2 + $0x1] sm:$0xff] }
  0x61   : > { %1109 = vmatprep.subr.mxu1 %v2926_v3  ;;  %2730 = vmatprep.mubr.f32.mxu1 %v558_v52  ;;  %v3508_v52 = vld [vmem:[#allocation2 + $0x78] sm:$0xff] }
  0x62   : > { %1110 = vmatpush2.msra.mxu1 %v450_v53  ;;  %697 = vmatmul.mubr.f32.gmra.mxu0 %v3447_v54  ;;  %v2483_v53 = vld [vmem:[%s4457_s1 + $0x378] sm:$0xff] }
  0x63   : > { %2731 = vmatmul.mubr.f32.gmra.mxu1 %v559_v57  ;;  %1111 = vmatprep.subr.mxu1 %v2926_v3  ;;  %v361_v57 = vld [vmem:[#allocation2 + $0x9] sm:$0xff] }
  0x64   : > { %1112 = vmatpush2.msra.mxu1 %v449_v58  ;;  %701 = vmatprep.mubr.f32.mxu0 %v3113_v22  ;;  %v3522_v58 = vld [vmem:[#allocation2 + $0x80] sm:$0xff] }
  0x65   : > { %1113 = vmatprep.subr.mxu1 %v2926_v3  ;;  %2733 = vmatprep.mubr.f32.mxu1 %v560_v61  ;;  %v2482_v61 = vld [vmem:[%s4457_s1 + $0x370] sm:$0xff] }
  0x66   : > { %1114 = vmatpush2.msra.mxu1 %v448_v62  ;;  %702 = vmatmul.mubr.f32.gmra.mxu0 %v3459_v0  ;;  %v469_v62 = vld [vmem:[%s4457_s1 + $0x168] sm:$0xff] }
  0x67   : > { %2734 = vmatmul.mubr.f32.gmra.mxu1 %v561_v1  ;;  %1115 = vmatprep.subr.mxu1 %v2926_v3  ;;  %v3533_v1 = vld [vmem:[#allocation2 + $0x90] sm:$0xff] }
  0x68   : > { %1116 = vmatpush2.msra.mxu1 %v447_v4  ;;  %706 = vmatprep.mubr.f32.mxu0 %v3116_v23  ;;  %v2481_v4 = vld [vmem:[%s4457_s1 + $0x368] sm:$0xff] }
  0x69   : > { %1117 = vmatprep.subr.mxu1 %v2926_v3  ;;  %2736 = vmatprep.mubr.f32.mxu1 %v562_v5  ;;  %v2480_v5 = vld [vmem:[%s4457_s1 + $0x360] sm:$0xff] }
  0x6a   : > { %1118 = vmatpush2.msra.mxu1 %v446_v8  ;;  %707 = vmatmul.mubr.f32.gmra.mxu0 %v3471_v9  ;;  %v3547_v8 = vld [vmem:[#allocation2 + $0x98] sm:$0xff] }
  0x6b   : > { %2737 = vmatmul.mubr.f32.gmra.mxu1 %v563_v12  ;;  %1119 = vmatprep.subr.mxu1 %v2926_v3  ;;  %v467_v12 = vld [vmem:[%s4457_s1 + $0x158] sm:$0xff] }
  0x6c   : > { %1120 = vmatpush2.msra.mxu1 %v445_v13  ;;  %711 = vmatprep.mubr.f32.mxu0 %v3128_v26  ;;  %v466_v13 = vld [vmem:[%s4457_s1 + $0x150] sm:$0xff] }
  0x6d   : > { %1121 = vmatprep.subr.mxu1 %v2926_v3  ;;  %2739 = vmatprep.mubr.f32.mxu1 %v564_v17  ;;  %v2477_v17 = vld [vmem:[%s4457_s1 + $0x348] sm:$0xff] }
  0x6e   : > { %1122 = vmatpush2.msra.mxu1 %v444_v20  ;;  %712 = vmatmul.mubr.f32.gmra.mxu0 %v3483_v25  ;;  %v465_v20 = vld [vmem:[%s4457_s1 + $0x148] sm:$0xff] }
  0x6f   : > { %2740 = vmatmul.mubr.f32.gmra.mxu1 %v565_v32  ;;  %1123 = vmatprep.subr.mxu1 %v2926_v3  ;;  %v3602_v32 = vld [vmem:[#allocation2 + $0xc8] sm:$0xff] }
  0x70   : > { %1124 = vmatpush2.msra.mxu1 %v443_v33  ;;  %716 = vmatprep.mubr.f32.mxu0 %v3131_v27  ;;  %v464_v33 = vld [vmem:[%s4457_s1 + $0x140] sm:$0xff] }
  0x71   : > { %1125 = vmatprep.subr.mxu1 %v2926_v3  ;;  %2742 = vmatprep.mubr.f32.mxu1 %v566_v36  ;;  %v2475_v36 = vld [vmem:[%s4457_s1 + $0x338] sm:$0xff] }
  0x72   : > { %1126 = vmatpush2.msra.mxu1 %v442_v39  ;;  %717 = vmatmul.mubr.f32.gmra.mxu0 %v3495_v40  ;;  %v463_v39 = vld [vmem:[%s4457_s1 + $0x138] sm:$0xff] }
  0x73   : > { %2743 = vmatmul.mubr.f32.gmra.mxu1 %v567_v43  ;;  %1127 = vmatprep.subr.mxu1 %v2926_v3  ;;  %v2474_v43 = vld [vmem:[%s4457_s1 + $0x330] sm:$0xff] }
  0x74   : > { %1128 = vmatpush2.msra.mxu1 %v441_v44  ;;  %721 = vmatprep.mubr.f32.mxu0 %v3143_v30  ;;  %v462_v44 = vld [vmem:[%s4457_s1 + $0x130] sm:$0xff] }
  0x75   : > { %1129 = vmatprep.subr.mxu1 %v2926_v3  ;;  %1131 = vmatprep.mubr.f32.mxu1 %v360_v50  ;;  %v461_v50 = vld [vmem:[%s4457_s1 + $0x128] sm:$0xff] }
  0x76   : > { %1130 = vmatpush2.msra.mxu1 %v440_v48  ;;  %722 = vmatmul.mubr.f32.gmra.mxu0 %v3508_v52  ;;  %v2473_v48 = vld [vmem:[%s4457_s1 + $0x328] sm:$0xff] }
  0x77   : > { %1132 = vmatmul.mubr.f32.vlgmr.msra.gmra.mxu1 %v2926_v3  ;;  %1663 = vmatprep.subr.mxu1 %v2926_v3 }
  0x78   : > { %726 = vmatprep.mubr.f32.mxu0 %v3146_v31  ;;  %1664 = vmatpush1.msra.mxu1 %v2483_v53  ;;  %v2472_v53 = vld [vmem:[%s4457_s1 + $0x320] sm:$0xff] }
  0x79   : > { %1136 = vmatprep.mubr.f32.mxu1 %v361_v57  ;;  %2747 = vmatprep.subr.mxu0 %v470_v34  ;;  %v460_v57 = vld [vmem:[%s4457_s1 + $0x120] sm:$0xff] }
  0x7a   : > { %1665 = vmatprep.subr.mxu1 %v2926_v3  ;;  %727 = vmatmul.mubr.f32.gmra.mxu0 %v3522_v58 }
  0x7b   : > { %1137 = vmatmul.mubr.f32.gmra.mxu1 %v2926_v3  ;;  %2748 = vmatpush3.msra.mxu0 %v470_v34  ;;  %v2471_v34 = vld [vmem:[%s4457_s1 + $0x318] sm:$0xff] }
  0x7c   : > { %1666 = vmatpush1.msra.mxu1 %v2482_v61  ;;  %731 = vmatprep.mubr.f32.mxu0 %v3162_v35  ;;  %v459_v61 = vld [vmem:[%s4457_s1 + $0x118] sm:$0xff] }
  0x7d   : > { %1141 = vmatprep.mubr.f32.mxu1 %v3083_v14  ;;  %1667 = vmatprep.subr.mxu1 %v2926_v3  ;;  %v468_v14 = vld [vmem:[%s4457_s1 + $0x160] sm:$0xff] }
  0x7e   : > { %2749 = vmatprep.subr.mxu0 %v469_v62  ;;  %732 = vmatmul.mubr.f32.gmra.mxu0 %v3533_v1 }
  0x7f   : > { %1142 = vmatmul.mubr.f32.gmra.mxu1 %v3406_v24  ;;  %736 = vmatprep.mubr.f32.mxu0 %v3168_v37  ;;  %v2479_v24 = vld [vmem:[%s4457_s1 + $0x358] sm:$0xff] }
  0x80   : > { %1668 = vmatpush1.msra.mxu1 %v2481_v4  ;;  %1146 = vmatprep.mubr.f32.mxu1 %v3090_v16  ;;  %v3561_v16 = vld [vmem:[#allocation2 + $0xa8] sm:$0xff]  ;;  %v458_v4 = vld [vmem:[%s4457_s1 + $0x110] sm:$0xff] }
  0x81   : > { %1669 = vmatprep.subr.mxu1 %v2926_v3  ;;  %2750 = vmatpush3.msra.mxu0 %v469_v62  ;;  %v2470_v62 = vld [vmem:[%s4457_s1 + $0x310] sm:$0xff] }
  0x82   : > { %1670 = vmatpush1.msra.mxu1 %v2480_v5  ;;  %737 = vmatmul.mubr.f32.gmra.mxu0 %v3547_v8  ;;  %v2469_v5 = vld [vmem:[%s4457_s1 + $0x308] sm:$0xff] }
  0x83   : > { %1147 = vmatmul.mubr.f32.gmra.mxu1 %v3423_v38  ;;  %741 = vmatprep.mubr.f32.mxu0 %v3184_v41  ;;  %v2478_v38 = vld [vmem:[%s4457_s1 + $0x350] sm:$0xff] }
  0x84   : > { %1151 = vmatprep.mubr.f32.mxu1 %v3098_v18  ;;  %1671 = vmatprep.subr.mxu1 %v2926_v3  ;;  %v3574_v18 = vld [vmem:[#allocation2 + $0xb0] sm:$0xff] }
  0x85   : > { %2751 = vmatprep.subr.mxu0 %v468_v14  ;;  %1672 = vmatpush1.msra.mxu1 %v2479_v24  ;;  %v2468_v24 = vld [vmem:[%s4457_s1 + $0x300] sm:$0xff] }
  0x86   : > { %2752 = vmatpush3.msra.mxu0 %v468_v14  ;;  %1673 = vmatprep.subr.mxu1 %v2926_v3  ;;  %v3587_v3 = vld [vmem:[#allocation2 + $0xc0] sm:$0xff]  ;;  %v457_v14 = vld [vmem:[%s4457_s1 + $0x108] sm:$0xff] }
  0x87   : > { %742 = vmatmul.mubr.f32.gmra.mxu0 %v3561_v16  ;;  %1152 = vmatmul.mubr.f32.gmra.mxu1 %v3435_v46 }
  0x88   : > { %746 = vmatprep.mubr.f32.mxu0 %v3187_v42  ;;  %1156 = vmatprep.mubr.f32.mxu1 %v3101_v19  ;;  %v3589_v19 = vld [vmem:[#allocation2] sm:$0xff] }
  0x89   : > { %2753 = vmatprep.subr.mxu0 %v467_v12  ;;  %1674 = vmatpush1.msra.mxu1 %v2478_v38  ;;  %v2499_v38 = vld [vmem:[%s4457_s1 + $0x3f8] sm:$0xff] }
  0x8a   : > { %2754 = vmatpush3.msra.mxu0 %v467_v12  ;;  %1675 = vmatprep.subr.mxu1 %v3589_v19  ;;  %v456_v12 = vld [vmem:[%s4457_s1 + $0x100] sm:$0xff] }
  0x8b   : > { %747 = vmatmul.mubr.f32.gmra.mxu0 %v3574_v18  ;;  %1157 = vmatmul.mubr.f32.gmra.mxu1 %v3447_v54 }
  0x8c   : > { %751 = vmatprep.mubr.f32.mxu0 %v3199_v45  ;;  %1161 = vmatprep.mubr.f32.mxu1 %v3113_v22  ;;  %v2476_v22 = vld [vmem:[%s4457_s1 + $0x340] sm:$0xff] }
  0x8d   : > { %2755 = vmatprep.subr.mxu0 %v466_v13  ;;  %1676 = vmatpush1.msra.mxu1 %v2477_v17  ;;  %v3734_v17 = vld [vmem:[#allocation2 + $0x140] sm:$0xff] }
  0x8e   : > { %2756 = vmatpush3.msra.mxu0 %v466_v13  ;;  %1677 = vmatprep.subr.mxu1 %v3589_v19  ;;  %v3725_v13 = vld [vmem:[%s4457_s1 + $0x478] sm:$0xff]  ;;  %4473 = vst [vmem:[#allocation5_spill] sm:$0xff] %v3734_v17 }
  0x8f   : > { %752 = vmatmul.mubr.f32.gmra.mxu0 %v3587_v3  ;;  %1162 = vmatmul.mubr.f32.gmra.mxu1 %v3459_v0 }
  0x90   : > { %756 = vmatprep.mubr.f32.mxu0 %v3205_v47  ;;  %1166 = vmatprep.mubr.f32.mxu1 %v3116_v23  ;;  %v3615_v23 = vld [vmem:[#allocation2 + $0xd8] sm:$0xff] }
  0x91   : > { %2757 = vmatprep.subr.mxu0 %v465_v20  ;;  %1678 = vmatpush1.msra.mxu1 %v2476_v22  ;;  %v2496_v22 = vld [vmem:[%s4457_s1 + $0x3e0] sm:$0xff] }
  0x92   : > { %2758 = vmatpush3.msra.mxu0 %v465_v20  ;;  %1679 = vmatprep.subr.mxu1 %v3589_v19  ;;  %v2497_v20 = vld [vmem:[%s4457_s1 + $0x3e8] sm:$0xff] }
  0x93   : > { %757 = vmatmul.mubr.f32.gmra.mxu0 %v3602_v32  ;;  %1167 = vmatmul.mubr.f32.gmra.mxu1 %v3471_v9 }
  0x94   : > { %761 = vmatprep.mubr.f32.mxu0 %v3214_v49  ;;  %1171 = vmatprep.mubr.f32.mxu1 %v3128_v26  ;;  %v3628_v26 = vld [vmem:[#allocation2 + $0xe0] sm:$0xff] }
  0x95   : > { %2759 = vmatprep.subr.mxu0 %v464_v33  ;;  %1680 = vmatpush1.msra.mxu1 %v2475_v36  ;;  %v3765_v36 = vld [vmem:[#allocation2 + $0x168] sm:$0xff] }
  0x96   : > { %2760 = vmatpush3.msra.mxu0 %v464_v33  ;;  %1681 = vmatprep.subr.mxu1 %v3589_v19  ;;  %v3755_v33 = vld [vmem:[#allocation2 + $0x158] sm:$0xff]  ;;  %4476 = vst [vmem:[#allocation8_spill] sm:$0xff] %v3765_v36 }
  0x97   : > { %762 = vmatmul.mubr.f32.gmra.mxu0 %v3615_v23  ;;  %1172 = vmatmul.mubr.f32.gmra.mxu1 %v3483_v25  ;;  %4475 = vst [vmem:[#allocation7_spill] sm:$0xff] %v3755_v33 }
  0x98   : > { %766 = vmatprep.mubr.f32.mxu0 %v3217_v51  ;;  %1176 = vmatprep.mubr.f32.mxu1 %v3131_v27  ;;  %v3641_v27 = vld [vmem:[#allocation2 + $0xf0] sm:$0xff] }
  0x99   : > { %2761 = vmatprep.subr.mxu0 %v463_v39  ;;  %1682 = vmatpush1.msra.mxu1 %v2474_v43  ;;  %v2490_v43 = vld [vmem:[%s4457_s1 + $0x3b0] sm:$0xff] }
  0x9a   : > { %2762 = vmatpush3.msra.mxu0 %v463_v39  ;;  %1683 = vmatprep.subr.mxu1 %v3589_v19  ;;  %v2491_v39 = vld [vmem:[%s4457_s1 + $0x3b8] sm:$0xff] }
  0x9b   : > { %767 = vmatmul.mubr.f32.gmra.mxu0 %v3628_v26  ;;  %1177 = vmatmul.mubr.f32.gmra.mxu1 %v3495_v40 }
  0x9c   : > { %771 = vmatprep.mubr.f32.mxu0 %v3229_v55  ;;  %1181 = vmatprep.mubr.f32.mxu1 %v3143_v30  ;;  %v3654_v30 = vld [vmem:[#allocation2 + $0xf8] sm:$0xff] }
  0x9d   : > { %2763 = vmatprep.subr.mxu0 %v462_v44  ;;  %1684 = vmatpush1.msra.mxu1 %v2473_v48  ;;  %v3814_v48 = vld [vmem:[#allocation2 + $0x32] sm:$0xff] }
  0x9e   : > { %2764 = vmatpush3.msra.mxu0 %v462_v44  ;;  %1685 = vmatprep.subr.mxu1 %v3589_v19  ;;  %v2514_v44 = vld [vmem:[%s4457_s1 + $0x470] sm:$0xff] }
  0x9f   : > { %772 = vmatmul.mubr.f32.gmra.mxu0 %v3641_v27  ;;  %1182 = vmatmul.mubr.f32.gmra.mxu1 %v3508_v52 }
  0xa0   : > { %776 = vmatprep.mubr.f32.mxu0 %v3232_v56  ;;  %1186 = vmatprep.mubr.f32.mxu1 %v3146_v31  ;;  %v3667_v31 = vld [vmem:[#allocation2 + $0x108] sm:$0xff] }
  0xa1   : > { %2765 = vmatprep.subr.mxu0 %v461_v50  ;;  %1686 = vmatpush1.msra.mxu1 %v2472_v53  ;;  %v3826_v53 = vld [vmem:[#allocation2 + $0x3a] sm:$0xff] }
  0xa2   : > { %2766 = vmatpush3.msra.mxu0 %v461_v50  ;;  %1687 = vmatprep.subr.mxu1 %v3589_v19  ;;  %v2489_v50 = vld [vmem:[%s4457_s1 + $0x3a8] sm:$0xff] }
  0xa3   : > { %777 = vmatmul.mubr.f32.gmra.mxu0 %v3654_v30  ;;  %1187 = vmatmul.mubr.f32.gmra.mxu1 %v3522_v58 }
  0xa4   : > { %781 = vmatprep.mubr.f32.mxu0 %v3242_v59  ;;  %1191 = vmatprep.mubr.f32.mxu1 %v3162_v35  ;;  %v3680_v35 = vld [vmem:[#allocation2 + $0x110] sm:$0xff] }
  0xa5   : > { %2767 = vmatprep.subr.mxu0 %v460_v57  ;;  %1688 = vmatpush1.msra.mxu1 %v2471_v34  ;;  %v2488_v34 = vld [vmem:[%s4457_s1 + $0x3a0] sm:$0xff] }
  0xa6   : > { %2768 = vmatpush3.msra.mxu0 %v460_v57  ;;  %1689 = vmatprep.subr.mxu1 %v3589_v19  ;;  %v3829_v57 = vld [vmem:[#allocation2 + $0x4a] sm:$0xff] }
  0xa7   : > { %782 = vmatmul.mubr.f32.gmra.mxu0 %v3667_v31  ;;  %1192 = vmatmul.mubr.f32.gmra.mxu1 %v3533_v1 }
  0xa8   : > { %786 = vmatprep.mubr.f32.mxu0 %v3245_v60  ;;  %1196 = vmatprep.mubr.f32.mxu1 %v3168_v37  ;;  %v3693_v37 = vld [vmem:[#allocation2 + $0x120] sm:$0xff] }
  0xa9   : > { %2769 = vmatprep.subr.mxu0 %v459_v61  ;;  %1690 = vmatpush1.msra.mxu1 %v2470_v62  ;;  %v3844_v62 = vld [vmem:[#allocation2 + $0x62] sm:$0xff] }
  0xaa   : > { %2770 = vmatpush3.msra.mxu0 %v459_v61  ;;  %1691 = vmatprep.subr.mxu1 %v3589_v19  ;;  %v3841_v61 = vld [vmem:[#allocation2 + $0x52] sm:$0xff] }
  0xab   : > { %787 = vmatmul.mubr.f32.gmra.mxu0 %v3680_v35  ;;  %1197 = vmatmul.mubr.f32.gmra.mxu1 %v3547_v8 }
  0xac   : > { %791 = vmatprep.mubr.f32.mxu0 %v3255_v63  ;;  %1201 = vmatprep.mubr.f32.mxu1 %v3184_v41  ;;  %v3706_v41 = vld [vmem:[#allocation2 + $0x128] sm:$0xff] }
  0xad   : > { %2771 = vmatprep.subr.mxu0 %v458_v4  ;;  %1692 = vmatpush1.msra.mxu1 %v2469_v5  ;;  %4471 = vst [vmem:[#allocation3_spill] sm:$0xff] %v3706_v41  ;;  %v3856_v5 = vld [vmem:[#allocation2 + $0x6a] sm:$0xff] }
  0xae   : > { %2772 = vmatpush3.msra.mxu0 %v458_v4  ;;  %1693 = vmatprep.subr.mxu1 %v3589_v19  ;;  %v2487_v4 = vld [vmem:[%s4457_s1 + $0x398] sm:$0xff] }
  0xaf   : > { %792 = vmatmul.mubr.f32.gmra.mxu0 %v3693_v37  ;;  %1202 = vmatmul.mubr.f32.gmra.mxu1 %v3561_v16 }
  0xb0   : > { %796 = vmatprep.mubr.f32.mxu0 %v3264_v2  ;;  %1206 = vmatprep.mubr.f32.mxu1 %v3187_v42  ;;  %v3719_v42 = vld [vmem:[#allocation2 + $0x138] sm:$0xff] }
  0xb1   : > { %2773 = vmatprep.subr.mxu0 %v457_v14  ;;  %1694 = vmatpush1.msra.mxu1 %v2468_v24  ;;  %4472 = vst [vmem:[#allocation4_spill] sm:$0xff] %v3719_v42  ;;  %v2486_v24 = vld [vmem:[%s4457_s1 + $0x390] sm:$0xff] }
  0xb2   : > { %2774 = vmatpush3.msra.mxu0 %v457_v14  ;;  %1695 = vmatprep.subr.mxu1 %v3589_v19  ;;  %v3859_v14 = vld [vmem:[#allocation2 + $0x7a] sm:$0xff] }
  0xb3   : > { %797 = vmatmul.mubr.f32.gmra.mxu0 %v3706_v41  ;;  %1207 = vmatmul.mubr.f32.gmra.mxu1 %v3574_v18 }
  0xb4   : > { %801 = vmatprep.mubr.f32.mxu0 %v3274_v6  ;;  %1211 = vmatprep.mubr.f32.mxu1 %v3199_v45  ;;  %v2498_v45 = vld [vmem:[%s4457_s1 + $0x3f0] sm:$0xff] }
  0xb5   : > { %2775 = vmatprep.subr.mxu0 %v456_v12  ;;  %1696 = vmatpush2.msra.mxu1 %v2499_v38  ;;  %v3874_v38 = vld [vmem:[#allocation2 + $0x92] sm:$0xff] }
  0xb6   : > { %2776 = vmatpush3.msra.mxu0 %v456_v12  ;;  %1697 = vmatprep.subr.mxu1 %v3589_v19  ;;  %v3871_v12 = vld [vmem:[#allocation2 + $0x82] sm:$0xff] }
  0xb7   : > { %802 = vmatmul.mubr.f32.gmra.mxu0 %v3719_v42  ;;  %1212 = vmatmul.mubr.f32.gmra.mxu1 %v3587_v3 }
  0xb8   : > { %806 = vmatprep.mubr.f32.mxu0 %v3277_v7  ;;  %1216 = vmatprep.mubr.f32.mxu1 %v3205_v47  ;;  %v3745_v47 = vld [vmem:[#allocation2 + $0x150] sm:$0xff] }
  0xb9   : > { %2825 = vmatprep.subr.mxu0 %v3725_v13  ;;  %1698 = vmatpush2.msra.mxu1 %v2498_v45  ;;  %4474 = vst [vmem:[#allocation6_spill] sm:$0xff] %v3745_v47  ;;  %v2915_v45 = vld [vmem:[#allocation2 + $0x169] sm:$0xff] }
  0xba   : > { %1699 = vmatprep.subr.mxu1 %v3589_v19 }
  0xbb   : > { %807 = vmatmul.mubr.f32.gmra.mxu0 %v3734_v17  ;;  %1217 = vmatmul.mubr.f32.gmra.mxu1 %v3602_v32 }
  0xbc   : > { %811 = vmatprep.mubr.f32.mxu0 %v3287_v10  ;;  %1221 = vmatprep.mubr.f32.mxu1 %v3214_v49  ;;  %v2495_v49 = vld [vmem:[%s4457_s1 + $0x3d8] sm:$0xff] }
  0xbd   : > { %1700 = vmatpush2.msra.mxu1 %v2497_v20  ;;  %v3885_v20 = vld [vmem:[#allocation2 + $0x9a] sm:$0xff] }
  0xbe   : > { %1701 = vmatprep.subr.mxu1 %v3589_v19 }
  0xbf   : > { %812 = vmatmul.mubr.f32.gmra.mxu0 %v3745_v47  ;;  %1222 = vmatmul.mubr.f32.gmra.mxu1 %v3615_v23 }
  0xc0   : > { %816 = vmatprep.mubr.f32.mxu0 %v3290_v11  ;;  %1226 = vmatprep.mubr.f32.mxu1 %v3217_v51  ;;  %v2494_v51 = vld [vmem:[%s4457_s1 + $0x3d0] sm:$0xff] }
  0xc1   : > { %1702 = vmatpush2.msra.mxu1 %v2496_v22  ;;  %v3888_v22 = vld [vmem:[#allocation2 + $0xaa] sm:$0xff] }
  0xc2   : > { %1703 = vmatprep.subr.mxu1 %v3589_v19 }
  0xc3   : > { %817 = vmatmul.mubr.f32.gmra.mxu0 %v3755_v33  ;;  %1227 = vmatmul.mubr.f32.gmra.mxu1 %v3628_v26 }
  0xc4   : > { %821 = vmatprep.mubr.f32.mxu0 %v3302_v15  ;;  %1231 = vmatprep.mubr.f32.mxu1 %v3229_v55  ;;  %v3775_v15 = vld [vmem:[#allocation2 + $0x170] sm:$0xff]  ;;  %v2493_v55 = vld [vmem:[%s4457_s1 + $0x3c8] sm:$0xff] }
  0xc5   : > { %1704 = vmatpush2.msra.mxu1 %v2495_v49  ;;  %4477 = vst [vmem:[#allocation9_spill] sm:$0xff] %v3775_v15 }
  0xc6   : > { %1705 = vmatprep.subr.mxu1 %v3589_v19 }
  0xc7   : > { %822 = vmatmul.mubr.f32.gmra.mxu0 %v3765_v36  ;;  %1232 = vmatmul.mubr.f32.gmra.mxu1 %v3641_v27 }
  0xc8   : > { %826 = vmatprep.mubr.f32.mxu0 %v3309_v21  ;;  %1236 = vmatprep.mubr.f32.mxu1 %v3232_v56  ;;  %v3785_v21 = vld [vmem:[#allocation2 + $0x180] sm:$0xff] }
  0xc9   : > { %1706 = vmatpush2.msra.mxu1 %v2494_v51  ;;  %4478 = vst [vmem:[#allocation10_spill] sm:$0xff] %v3785_v21  ;;  %v2492_v56 = vld [vmem:[%s4457_s1 + $0x3c0] sm:$0xff] }
  0xca   : > { %1707 = vmatprep.subr.mxu1 %v3589_v19  ;;  %v2484_v51 = vld [vmem:[%s4457_s1 + $0x380] sm:$0xff] }
  0xcb   : > { %827 = vmatmul.mubr.f32.gmra.mxu0 %v3775_v15  ;;  %1237 = vmatmul.mubr.f32.gmra.mxu1 %v3654_v30 }
  0xcc   : > { %831 = vmatprep.mubr.f32.mxu0 %v3319_v28  ;;  %1241 = vmatprep.mubr.f32.mxu1 %v3242_v59  ;;  %v3795_v28 = vld [vmem:[#allocation2 + $0x188] sm:$0xff] }
  0xcd   : > { %1708 = vmatpush2.msra.mxu1 %v2493_v55  ;;  %4479 = vst [vmem:[#allocation11_spill] sm:$0xff] %v3795_v28  ;;  %v392_v59 = vld [vmem:[#allocation2 + $0x2] sm:$0xff] }
  0xce   : > { %1709 = vmatprep.subr.mxu1 %v3589_v19  ;;  %v2508_v55 = vld [vmem:[%s4457_s1 + $0x440] sm:$0xff] }
  0xcf   : > { %832 = vmatmul.mubr.f32.gmra.mxu0 %v3785_v21  ;;  %1242 = vmatmul.mubr.f32.gmra.mxu1 %v3667_v31 }
  0xd0   : > { %836 = vmatprep.mubr.f32.mxu0 %v3322_v29  ;;  %1246 = vmatprep.mubr.f32.mxu1 %v3245_v60  ;;  %v393_v29 = vld [vmem:[#allocation2 + $0xa] sm:$0xff]  ;;  %v394_v60 = vld [vmem:[#allocation2 + $0x1a] sm:$0xff] }
  0xd1   : > { %1710 = vmatpush2.msra.mxu1 %v2492_v56  ;;  %v2916_v56 = vld [vmem:[#allocation2 + $0x171] sm:$0xff] }
  0xd2   : > { %1711 = vmatprep.subr.mxu1 %v3589_v19 }
  0xd3   : > { %837 = vmatmul.mubr.f32.gmra.mxu0 %v3795_v28  ;;  %1247 = vmatmul.mubr.f32.gmra.mxu1 %v3680_v35  ;;  %v2502_v28 = vld [vmem:[%s4457_s1 + $0x410] sm:$0xff] }
  0xd4   : > { %1251 = vmatprep.mubr.f32.mxu1 %v3255_v63  ;;  %2777 = vmatprep.mubr.f32.mxu0 %v392_v59  ;;  %v395_v63 = vld [vmem:[#allocation2 + $0x22] sm:$0xff]  ;;  %v3901_v59 = vld [vmem:[#allocation2 + $0xb2] sm:$0xff] }
  0xd5   : > { %1712 = vmatpush2.msra.mxu1 %v2491_v39 }
  0xd6   : > { %1713 = vmatprep.subr.mxu1 %v3589_v19 }
  0xd7   : > { %1252 = vmatmul.mubr.f32.gmra.mxu1 %v3693_v37  ;;  %2778 = vmatmul.mubr.f32.vlgmr.msra.gmra.mxu0 %v393_v29  ;;  %v3906_v29 = vld [vmem:[#allocation2 + $0xc2] sm:$0xff] }
  0xd8   : > { %1256 = vmatprep.mubr.f32.mxu1 %v3264_v2  ;;  %2780 = vmatprep.mubr.f32.mxu0 %v394_v60  ;;  %v2513_v2 = vld [vmem:[%s4457_s1 + $0x468] sm:$0xff]  ;;  %v1550_v60 = vld [vmem:[#allocation2 + $0x31] sm:$0xff] }
  0xd9   : > { %2826 = vmatpush3.msra.mxu0 %v3725_v13  ;;  %1714 = vmatpush2.msra.mxu1 %v2490_v43  ;;  %v2485_v13 = vld [vmem:[%s4457_s1 + $0x388] sm:$0xff] }
  0xda   : > { %2827 = vmatprep.subr.mxu0 %v2514_v44  ;;  %1715 = vmatprep.subr.mxu1 %v3589_v19 }
  0xdb   : > { %1257 = vmatmul.mubr.f32.gmra.mxu1 %v3706_v41  ;;  %2781 = vmatmul.mubr.f32.gmra.mxu0 %v395_v63  ;;  %v3918_v63 = vld [vmem:[#allocation2 + $0xda] sm:$0xff] }
  0xdc   : > { %1261 = vmatprep.mubr.f32.mxu1 %v3274_v6  ;;  %2783 = vmatprep.mubr.f32.mxu0 %v3814_v48  ;;  %v2512_v6 = vld [vmem:[%s4457_s1 + $0x460] sm:$0xff] }
  0xdd   : > { %2828 = vmatpush3.msra.mxu0 %v2514_v44  ;;  %1716 = vmatpush2.msra.mxu1 %v2489_v50  ;;  %v2507_v44 = vld [vmem:[%s4457_s1 + $0x438] sm:$0xff] }
  0xde   : > { %2829 = vmatprep.subr.mxu0 %v2513_v2  ;;  %1717 = vmatprep.subr.mxu1 %v3589_v19  ;;  %v1551_v50 = vld [vmem:[#allocation2 + $0x39] sm:$0xff] }
  0xdf   : > { %1262 = vmatmul.mubr.f32.gmra.mxu1 %v3719_v42  ;;  %2784 = vmatmul.mubr.f32.gmra.mxu0 %v3826_v53 }
  0xe0   : > { %1266 = vmatprep.mubr.f32.mxu1 %v3277_v7  ;;  %2786 = vmatprep.mubr.f32.mxu0 %v3829_v57  ;;  %v2511_v7 = vld [vmem:[%s4457_s1 + $0x458] sm:$0xff] }
  0xe1   : > { %2830 = vmatpush3.msra.mxu0 %v2513_v2  ;;  %1718 = vmatpush2.msra.mxu1 %v2488_v34  ;;  %v2506_v34 = vld [vmem:[%s4457_s1 + $0x430] sm:$0xff] }
  0xe2   : > { %2831 = vmatprep.subr.mxu0 %v2512_v6  ;;  %1719 = vmatprep.subr.mxu1 %v3589_v19 }
  0xe3   : > { %1267 = vmatmul.mubr.f32.gmra.mxu1 %v3734_v17  ;;  %2787 = vmatmul.mubr.f32.gmra.mxu0 %v3841_v61 }
  0xe4   : > { %1271 = vmatprep.mubr.f32.mxu1 %v3287_v10  ;;  %2789 = vmatprep.mubr.f32.mxu0 %v3844_v62  ;;  %v2510_v10 = vld [vmem:[%s4457_s1 + $0x450] sm:$0xff] }
  0xe5   : > { %2832 = vmatpush3.msra.mxu0 %v2512_v6  ;;  %1720 = vmatpush2.msra.mxu1 %v2487_v4  ;;  %v3928_v6 = vld [vmem:[#allocation2 + $0xe2] sm:$0xff] }
  0xe6   : > { %2833 = vmatprep.subr.mxu0 %v2511_v7  ;;  %1721 = vmatprep.subr.mxu1 %v3589_v19 }
  0xe7   : > { %1272 = vmatmul.mubr.f32.gmra.mxu1 %v3745_v47  ;;  %2790 = vmatmul.mubr.f32.gmra.mxu0 %v3856_v5  ;;  %v1557_v47 = vld [vmem:[#allocation2 + $0x81] sm:$0xff] }
  0xe8   : > { %1276 = vmatprep.mubr.f32.mxu1 %v3290_v11  ;;  %2792 = vmatprep.mubr.f32.mxu0 %v3859_v14  ;;  %v2509_v11 = vld [vmem:[%s4457_s1 + $0x448] sm:$0xff] }
  0xe9   : > { %2834 = vmatpush3.msra.mxu0 %v2511_v7  ;;  %1722 = vmatpush2.msra.mxu1 %v2486_v24  ;;  %v3932_v7 = vld [vmem:[#allocation2 + $0xf2] sm:$0xff]  ;;  %v1552_v24 = vld [vmem:[#allocation2 + $0x49] sm:$0xff] }
  0xea   : > { %2835 = vmatprep.subr.mxu0 %v2510_v10  ;;  %1723 = vmatprep.subr.mxu1 %v3589_v19 }
  0xeb   : > { %1277 = vmatmul.mubr.f32.gmra.mxu1 %v3755_v33  ;;  %2793 = vmatmul.mubr.f32.gmra.mxu0 %v3871_v12  ;;  %v3998_v33 = vld [vmem:[#allocation2 + $0x16a] sm:$0xff] }
  0xec   : > { %1281 = vmatprep.mubr.f32.mxu1 %v2915_v45  ;;  %2795 = vmatprep.mubr.f32.mxu0 %v3874_v38  ;;  %v1553_v45 = vld [vmem:[#allocation2 + $0x51] sm:$0xff] }
  0xed   : > { %2836 = vmatpush3.msra.mxu0 %v2510_v10  ;;  %1724 = vmatpush2.msra.mxu1 %v2485_v13  ;;  %v3942_v13 = vld [vmem:[#allocation2 + $0xfa] sm:$0xff] }
  0xee   : > { %2837 = vmatprep.subr.mxu0 %v2509_v11  ;;  %1725 = vmatprep.subr.mxu1 %v3589_v19  ;;  %v3916_v19 = vld [vmem:[#allocation2 + $0xca] sm:$0xff] }
  0xef   : > { %1282 = vmatmul.mubr.f32.gmra.mxu1 %v3765_v36  ;;  %2796 = vmatmul.mubr.f32.gmra.mxu0 %v3885_v20  ;;  %v3996_v36 = vld [vmem:[#allocation2 + $0x15a] sm:$0xff] }
  0xf0   : > { %v3890_v49 = vpop.f32.mrf.mxu1  ;;  %1286 = vmatprep.mubr.f32.mxu1 %v2916_v56  ;;  %2798 = vmatprep.mubr.f32.mxu0 %v3888_v22  ;;  %v3956_v56 = vld [vmem:[#allocation2 + $0x112] sm:$0xff] }
  0xf1   : > { %2838 = vmatpush3.msra.mxu0 %v2509_v11  ;;  %1726 = vmatpush2.msra.mxu1 %v2484_v51  ;;  %v3944_v11 = vld [vmem:[#allocation2 + $0x10a] sm:$0xff] }
  0xf2   : > { %v3903_v39 = vpop.f32.mrf.mxu1  ;;  %2839 = vmatprep.subr.mxu0 %v2508_v55 }
  0xf3   : > { %1287 = vmatmul.mubr.f32.gmra.mxu1 %v3775_v15  ;;  %2799 = vmatmul.mubr.f32.gmra.mxu0 %v3901_v59  ;;  %v3986_v15 = vld [vmem:[#allocation2 + $0x152] sm:$0xff] }
  0xf4   : > { %v3910_v43 = vpop.f32.mrf.mxu1  ;;  %2801 = vmatprep.mubr.f32.mxu0 %v3906_v29  ;;  %1727 = vmatprep.mubr.f32.mxu1 %v1550_v60  ;;  %v3958_v60 = vld [vmem:[#allocation2 + $0x122] sm:$0xff] }
  0xf5   : > { %2840 = vmatpush3.msra.mxu0 %v2508_v55  ;;  %v2504_v55 = vld [vmem:[%s4457_s1 + $0x420] sm:$0xff] }
  0xf6   : > { %v3920_v2 = vpop.f32.mrf.mxu1  ;;  %2841 = vmatprep.subr.mxu0 %v2507_v44 }
  0xf7   : > { %2802 = vmatmul.mubr.f32.gmra.mxu0 %v3916_v19  ;;  %1728 = vmatmul.mubr.f32.vlgmr.msra.gmra.mxu1 %v3435_v46  ;;  %v2505_v46 = vld [vmem:[%s4457_s1 + $0x428] sm:$0xff] }
  0xf8   : > { %2804 = vmatprep.mubr.f32.mxu0 %v3918_v63  ;;  %1732 = vmatprep.mubr.f32.mxu1 %v1551_v50  ;;  %v3930_v4 = vpop.f32.mrf.mxu1 }
  0xf9   : > { %2842 = vmatpush3.msra.mxu0 %v2507_v44  ;;  %v1554_v44 = vld [vmem:[#allocation2 + $0x61] sm:$0xff] }
  0xfa   : > { %v3934_v10 = vpop.f32.mrf.mxu1  ;;  %2843 = vmatprep.subr.mxu0 %v2506_v34 }
  0xfb   : > { %2805 = vmatmul.mubr.f32.gmra.mxu0 %v3928_v6  ;;  %1733 = vmatmul.mubr.f32.gmra.mxu1 %v3447_v54 }
  0xfc   : > { %2807 = vmatprep.mubr.f32.mxu0 %v3932_v7  ;;  %1737 = vmatprep.mubr.f32.mxu1 %v1552_v24 }
  0xfd   : > { %v3946_v51 = vpop.f32.mrf.mxu1  ;;  %2844 = vmatpush3.msra.mxu0 %v2506_v34  ;;  %v3968_v34 = vld [vmem:[#allocation2 + $0x12a] sm:$0xff] }
  0xfe   : > { %2845 = vmatprep.subr.mxu0 %v2505_v46 }
  0xff   : > { %2808 = vmatmul.mubr.f32.gmra.mxu0 %v3942_v13  ;;  %1738 = vmatmul.mubr.f32.gmra.mxu1 %v3459_v0  ;;  %v3950_v54 = vpop.f32.mrf.mxu1  ;;  %v2503_v0 = vld [vmem:[%s4457_s1 + $0x418] sm:$0xff] }
 0x100   : > { %2810 = vmatprep.mubr.f32.mxu0 %v3944_v11  ;;  %1742 = vmatprep.mubr.f32.mxu1 %v1553_v45  ;;  %v3972_v45 = vld [vmem:[#allocation2 + $0x13a] sm:$0xff] }
 0x101   : > { %2846 = vmatpush3.msra.mxu0 %v2505_v46  ;;  %v1555_v46 = vld [vmem:[#allocation2 + $0x69] sm:$0xff] }
 0x102   : > { %v3960_v50 = vpop.f32.mrf.mxu1  ;;  %2847 = vmatprep.subr.mxu0 %v2504_v55 }
 0x103   : > { %2811 = vmatmul.mubr.f32.gmra.mxu0 %v3956_v56  ;;  %1743 = vmatmul.mubr.f32.gmra.mxu1 %v3471_v9 }
 0x104   : > { %2813 = vmatprep.mubr.f32.mxu0 %v3958_v60  ;;  %1747 = vmatprep.mubr.f32.mxu1 %v1554_v44  ;;  %v3970_v24 = vpop.f32.mrf.mxu1  ;;  %v3982_v44 = vld [vmem:[#allocation2 + $0x142] sm:$0xff] }
 0x105   : > { %2848 = vmatpush3.msra.mxu0 %v2504_v55  ;;  %v1556_v55 = vld [vmem:[#allocation2 + $0x79] sm:$0xff] }
 0x106   : > { %2849 = vmatprep.subr.mxu0 %v2503_v0 }
 0x107   : > { %2814 = vmatmul.mubr.f32.gmra.mxu0 %v3968_v34  ;;  %1748 = vmatmul.mubr.f32.gmra.mxu1 %v3483_v25  ;;  %v3976_v9 = vpop.f32.mrf.mxu1  ;;  %v2501_v25 = vld [vmem:[%s4457_s1 + $0x408] sm:$0xff] }
 0x108   : > { %2816 = vmatprep.mubr.f32.mxu0 %v3972_v45  ;;  %1752 = vmatprep.mubr.f32.mxu1 %v1555_v46 }
 0x109   : > { %v3984_v21 = vpop.f32.mrf.mxu1  ;;  %2850 = vmatpush3.msra.mxu0 %v2503_v0 }
 0x10a   : > { %2851 = vmatprep.subr.mxu0 %v2502_v28 }
 0x10b   : > { %2817 = vmatmul.mubr.f32.gmra.mxu0 %v3982_v44  ;;  %1753 = vmatmul.mubr.f32.gmra.mxu1 %v3495_v40  ;;  %v2500_v40 = vld [vmem:[%s4457_s1 + $0x400] sm:$0xff] }
 0x10c   : > { %2819 = vmatprep.mubr.f32.mxu0 %v3986_v15  ;;  %1757 = vmatprep.mubr.f32.mxu1 %v1556_v55  ;;  %v3994_v46 = vpop.f32.mrf.mxu1  ;;  %v4008_v55 = vld [vmem:[#allocation2 + $0x172] sm:$0xff] }
 0x10d   : > { %4480 = vst [vmem:[#allocation12_spill] sm:$0xff] %v3994_v46  ;;  %2852 = vmatpush3.msra.mxu0 %v2502_v28  ;;  %v1558_v28 = vld [vmem:[#allocation2 + $0x91] sm:$0xff] }
 0x10e   : > { %v4000_v0 = vpop.f32.mrf.mxu1  ;;  %2853 = vmatprep.subr.mxu0 %v2501_v25 }
 0x10f   : > { %2820 = vmatmul.mubr.f32.gmra.mxu0 %v3996_v36  ;;  %1758 = vmatmul.mubr.f32.gmra.mxu1 %v3508_v52  ;;  %v1559_v52 = vld [vmem:[#allocation2 + $0x99] sm:$0xff] }
 0x110   : > { %2822 = vmatprep.mubr.f32.mxu0 %v3998_v33  ;;  %1762 = vmatprep.mubr.f32.mxu1 %v1557_v47 }
 0x111   : > { %v4010_v17 = vpop.f32.mrf.mxu1  ;;  %2854 = vmatpush3.msra.mxu0 %v2501_v25 }
 0x112   : > { %4481 = vst [vmem:[#allocation13_spill] sm:$0xff] %v4010_v17  ;;  %2855 = vmatprep.subr.mxu0 %v2500_v40 }
 0x113   : > { %2823 = vmatmul.mubr.f32.gmra.mxu0 %v4008_v55  ;;  %1763 = vmatmul.mubr.f32.gmra.mxu1 %v3522_v58  ;;  %v4014_v42 = vpop.f32.mrf.mxu1  ;;  %v1560_v58 = vld [vmem:[#allocation2 + $0xa9] sm:$0xff] }
 0x114   : > { %1767 = vmatprep.mubr.f32.mxu1 %v1558_v28  ;;  %2856 = vmatpush3.msra.mxu0 %v2500_v40 }
 0x115   : > { %2857 = vmatprep.mubr.f32.mxu0 %v3814_v48  ;;  %v683_v46 = vpop.f32.mrf.mxu0 }
 0x116   : > { %v4017_v47 = vpop.f32.mrf.mxu1  ;;  %v4020_v41 = vadd.f32 %v3903_v39, %v683_v46  ;;  %v1561_v39 = vld [vmem:[#allocation2 + $0xb1] sm:$0xff] }
 0x117   : > { %1768 = vmatmul.mubr.f32.gmra.mxu1 %v3533_v1  ;;  %2858 = vmatmul.mubr.f32.vlgmr.msra.gmra.mxu0 %v3826_v53  ;;  %v685_v25 = vpop.f32.mrf.mxu0 }
 0x118   : > { %v4024_v17 = vpop.f32.mrf.mxu1  ;;  %1772 = vmatprep.mubr.f32.mxu1 %v1559_v52  ;;  %2860 = vmatprep.mubr.f32.mxu0 %v3829_v57 }
 0x11a   : > { %v688_v40 = vpop.f32.mrf.mxu0  ;;  %v4030_v28 = vpop.f32.mrf.mxu1 }
 0x11b   : > { %v4028_v48 = vadd.f32 %v3890_v49, %v688_v40  ;;  %1773 = vmatmul.mubr.f32.gmra.mxu1 %v3547_v8  ;;  %2861 = vmatmul.mubr.f32.gmra.mxu0 %v3841_v61 }
 0x11c   : > { %v690_v1 = vpop.f32.mrf.mxu0  ;;  %1777 = vmatprep.mubr.f32.mxu1 %v1560_v58  ;;  %2863 = vmatprep.mubr.f32.mxu0 %v3844_v62  ;;  %v4035_v53 = vpop.f32.mrf.mxu1  ;;  %v1562_v62 = vld [vmem:[#allocation2 + $0xc1] sm:$0xff] }
 0x11e   : > { %v693_v46 = vpop.f32.mrf.mxu0 }
 0x11f   : > { %v4038_v57 = vadd.f32 %v3920_v2, %v693_v46  ;;  %v4040_v52 = vpop.f32.mrf.mxu1  ;;  %1778 = vmatmul.mubr.f32.gmra.mxu1 %v3561_v16  ;;  %2864 = vmatmul.mubr.f32.gmra.mxu0 %v3856_v5 }
 0x120   : > { %v695_v8 = vpop.f32.mrf.mxu0  ;;  %1782 = vmatprep.mubr.f32.mxu1 %v1561_v39  ;;  %2866 = vmatprep.mubr.f32.mxu0 %v3859_v14  ;;  %v1563_v14 = vld [vmem:[#allocation2 + $0xc9] sm:$0xff] }
 0x121   : > { %v4045_v61 = vpop.f32.mrf.mxu1 }
 0x122   : > { %v698_v49 = vpop.f32.mrf.mxu0 }
 0x123   : > { %v4048_v25 = vadd.f32 %v3910_v43, %v698_v49  ;;  %v4050_v58 = vpop.f32.mrf.mxu1  ;;  %1783 = vmatmul.mubr.f32.gmra.mxu1 %v3574_v18  ;;  %2867 = vmatmul.mubr.f32.gmra.mxu0 %v3871_v12 }
 0x124   : > { %v700_v16 = vpop.f32.mrf.mxu0  ;;  %1787 = vmatprep.mubr.f32.mxu1 %v1562_v62  ;;  %2869 = vmatprep.mubr.f32.mxu0 %v3874_v38  ;;  %v1564_v38 = vld [vmem:[#allocation2 + $0xd9] sm:$0xff] }
 0x125   : > { %v4055_v5 = vpop.f32.mrf.mxu1 }
 0x126   : > { %v703_v2 = vpop.f32.mrf.mxu0 }
 0x127   : > { %v4058_v40 = vadd.f32 %v3934_v10, %v703_v2  ;;  %v4060_v1 = vpop.f32.mrf.mxu1  ;;  %1788 = vmatmul.mubr.f32.gmra.mxu1 %v3587_v3  ;;  %2870 = vmatmul.mubr.f32.gmra.mxu0 %v3885_v20  ;;  %v1568_v2 = vld [vmem:[#allocation2 + $0x109] sm:$0xff] }
 0x128   : > { %v705_v18 = vpop.f32.mrf.mxu0  ;;  %1792 = vmatprep.mubr.f32.mxu1 %v1563_v14  ;;  %2872 = vmatprep.mubr.f32.mxu0 %v3888_v22  ;;  %v1565_v22 = vld [vmem:[#allocation2 + $0xe1] sm:$0xff] }
 0x129   : > { %v4065_v12 = vpop.f32.mrf.mxu1 }
 0x12a   : > { %v708_v43 = vpop.f32.mrf.mxu0 }
 0x12b   : > { %v4068_v39 = vadd.f32 %v3930_v4, %v708_v43  ;;  %v4070_v46 = vpop.f32.mrf.mxu1  ;;  %1793 = vmatmul.mubr.f32.gmra.mxu1 %v3602_v32  ;;  %2873 = vmatmul.mubr.f32.gmra.mxu0 %v3901_v59 }
 0x12c   : > { %v710_v3 = vpop.f32.mrf.mxu0  ;;  %1797 = vmatprep.mubr.f32.mxu1 %v1564_v38  ;;  %2875 = vmatprep.mubr.f32.mxu0 %v3906_v29  ;;  %v1566_v29 = vld [vmem:[#allocation2 + $0xf1] sm:$0xff] }
 0x12d   : > { %v4075_v20 = vpop.f32.mrf.mxu1 }
 0x12e   : > { %v713_v10 = vpop.f32.mrf.mxu0 }
 0x12f   : > { %v4078_v8 = vadd.f32 %v3950_v54, %v713_v10  ;;  %v4080_v62 = vpop.f32.mrf.mxu1  ;;  %1798 = vmatmul.mubr.f32.gmra.mxu1 %v3615_v23  ;;  %2876 = vmatmul.mubr.f32.gmra.mxu0 %v3916_v19 }
 0x130   : > { %v715_v32 = vpop.f32.mrf.mxu0  ;;  %1802 = vmatprep.mubr.f32.mxu1 %v1565_v22  ;;  %2878 = vmatprep.mubr.f32.mxu0 %v3918_v63  ;;  %v1567_v63 = vld [vmem:[#allocation2 + $0xf9] sm:$0xff] }
 0x131   : > { %v4085_v59 = vpop.f32.mrf.mxu1 }
 0x132   : > { %v718_v4 = vpop.f32.mrf.mxu0 }
 0x133   : > { %v4088_v49 = vadd.f32 %v3946_v51, %v718_v4  ;;  %v4090_v16 = vpop.f32.mrf.mxu1  ;;  %1803 = vmatmul.mubr.f32.gmra.mxu1 %v3628_v26  ;;  %2879 = vmatmul.mubr.f32.gmra.mxu0 %v3928_v6  ;;  %v1610_v4 = vld [vmem:[#allocation2 + $0x182] sm:$0xff] }
 0x134   : > { %v720_v23 = vpop.f32.mrf.mxu0  ;;  %1807 = vmatprep.mubr.f32.mxu1 %v1566_v29  ;;  %2881 = vmatprep.mubr.f32.mxu0 %v3932_v7 }
 0x135   : > { %v4095_v19 = vpop.f32.mrf.mxu1 }
 0x136   : > { %v723_v54 = vpop.f32.mrf.mxu0 }
 0x137   : > { %v1133_v14 = vpop.f32.mrf.mxu1  ;;  %1808 = vmatmul.mubr.f32.gmra.mxu1 %v3641_v27  ;;  %2882 = vmatmul.mubr.f32.gmra.mxu0 %v3942_v13  ;;  %v4100_v51 = vadd.f32 %v3970_v24, %v723_v54  ;;  %v1569_v24 = vld [vmem:[#allocation2 + $0x111] sm:$0xff] }
 0x138   : > { %v4103_v26 = vadd.f32 %v1133_v14, %v4020_v41  ;;  %1812 = vmatprep.mubr.f32.mxu1 %v1567_v63  ;;  %2884 = vmatprep.mubr.f32.mxu0 %v3944_v11  ;;  %v725_v6 = vpop.f32.mrf.mxu0  ;;  %v4482_v54 = vld [vmem:[#allocation3_spill] sm:$0xff] }
 0x139   : > { %v1135_v7 = vpop.f32.mrf.mxu1  ;;  %v1573_v6 = vld [vmem:[#allocation2 + $0x141] sm:$0xff] }
 0x13a   : > { %v728_v18 = vpop.f32.mrf.mxu0  ;;  %v1612_v7 = vld [vmem:[#allocation2 + $0x19a] sm:$0xff] }
 0x13b   : > { %v1138_v38 = vpop.f32.mrf.mxu1  ;;  %1813 = vmatmul.mubr.f32.gmra.mxu1 %v3654_v30  ;;  %2885 = vmatmul.mubr.f32.gmra.mxu0 %v3956_v56  ;;  %v4109_v27 = vadd.f32 %v3960_v50, %v728_v18 }
 0x13c   : > { %v4112_v13 = vadd.f32 %v1138_v38, %v4028_v48  ;;  %1817 = vmatprep.mubr.f32.mxu1 %v1568_v2  ;;  %2887 = vmatprep.mubr.f32.mxu0 %v3958_v60  ;;  %v730_v41 = vpop.f32.mrf.mxu0  ;;  %v1570_v48 = vld [vmem:[#allocation2 + $0x121] sm:$0xff]  ;;  %v4484_v38 = vld [vmem:[#allocation4_spill] sm:$0xff] }
 0x13d   : > { %v1140_v11 = vpop.f32.mrf.mxu1 }
 0x13e   : > { %v733_v43 = vpop.f32.mrf.mxu0 }
 0x13f   : > { %v1143_v3 = vpop.f32.mrf.mxu1  ;;  %1818 = vmatmul.mubr.f32.gmra.mxu1 %v3667_v31  ;;  %2888 = vmatmul.mubr.f32.gmra.mxu0 %v3968_v34  ;;  %v4118_v30 = vadd.f32 %v3984_v21, %v733_v43  ;;  %v1574_v43 = vld [vmem:[#allocation2 + $0x151] sm:$0xff] }
 0x140   : > { %v4121_v56 = vadd.f32 %v1143_v3, %v4038_v57  ;;  %1822 = vmatprep.mubr.f32.mxu1 %v1569_v24  ;;  %2890 = vmatprep.mubr.f32.mxu0 %v3972_v45  ;;  %v735_v50 = vpop.f32.mrf.mxu0  ;;  %v1571_v57 = vld [vmem:[#allocation2 + $0x129] sm:$0xff] }
 0x141   : > { %v1145_v60 = vpop.f32.mrf.mxu1 }
 0x142   : > { %v738_v22 = vpop.f32.mrf.mxu0  ;;  %v4485_v60 = vld [vmem:[#allocation5_spill] sm:$0xff] }
 0x143   : > { %v1148_v10 = vpop.f32.mrf.mxu1  ;;  %1823 = vmatmul.mubr.f32.gmra.mxu1 %v3680_v35  ;;  %2891 = vmatmul.mubr.f32.gmra.mxu0 %v3982_v44  ;;  %v4127_v31 = vadd.f32 %v3976_v9, %v738_v22 }
 0x144   : > { %v4130_v21 = vadd.f32 %v1148_v10, %v4048_v25  ;;  %1827 = vmatprep.mubr.f32.mxu1 %v1570_v48  ;;  %2893 = vmatprep.mubr.f32.mxu0 %v3986_v15  ;;  %v740_v34 = vpop.f32.mrf.mxu0  ;;  %v1572_v25 = vld [vmem:[#allocation2 + $0x139] sm:$0xff] }
 0x145   : > { %v1150_v45 = vpop.f32.mrf.mxu1 }
 0x146   : > { %v4486_v45 = vld [vmem:[#allocation6_spill] sm:$0xff] }
 0x147   : > { %v743_v32 = vpop.f32.mrf.mxu0  ;;  %v1153_v29 = vpop.f32.mrf.mxu1  ;;  %1828 = vmatmul.mubr.f32.gmra.mxu1 %v3693_v37  ;;  %2894 = vmatmul.mubr.f32.gmra.mxu0 %v3996_v36  ;;  %v4483_v37 = vld [vmem:[#allocation12_spill] sm:$0xff] }
 0x148   : > { %v4136_v35 = vadd.f32 %v4000_v0, %v743_v32  ;;  %v4139_v9 = vadd.f32 %v1153_v29, %v4058_v40  ;;  %1832 = vmatprep.mubr.f32.mxu1 %v1571_v57  ;;  %2896 = vmatprep.mubr.f32.mxu0 %v3998_v33  ;;  %v1611_v40 = vld [vmem:[#allocation2 + $0x18a] sm:$0xff] }
 0x149   : > { %v745_v44 = vpop.f32.mrf.mxu0  ;;  %v1155_v15 = vpop.f32.mrf.mxu1 }
 0x14a   : > { %v1576_v15 = vld [vmem:[#allocation2 + $0x169] sm:$0xff] }
 0x14b   : > { %v748_v23 = vpop.f32.mrf.mxu0  ;;  %v1158_v63 = vpop.f32.mrf.mxu1  ;;  %1833 = vmatmul.mubr.f32.gmra.mxu1 %v4482_v54  ;;  %2897 = vmatmul.mubr.f32.gmra.mxu0 %v4008_v55 }
 0x14c   : > { %v4145_v36 = vadd.f32 %v4483_v37, %v748_v23  ;;  %v4148_v0 = vadd.f32 %v1158_v63, %v4068_v39  ;;  %1837 = vmatprep.mubr.f32.mxu1 %v1572_v25  ;;  %2899 = vmatprep.mubr.f32.mxu0 %v1610_v4  ;;  %v1613_v39 = vld [vmem:[#allocation2 + $0x1a2] sm:$0xff]  ;;  %v4487_v4 = vld [vmem:[#allocation7_spill] sm:$0xff] }
 0x14d   : > { %v750_v33 = vpop.f32.mrf.mxu0  ;;  %v1160_v14 = vpop.f32.mrf.mxu1  ;;  %v1577_v37 = vld [vmem:[#allocation2 + $0x171] sm:$0xff] }
 0x14e   : > { %v4488_v33 = vld [vmem:[#allocation8_spill] sm:$0xff] }
 0x14f   : > { %v753_v2 = vpop.f32.mrf.mxu0  ;;  %v1163_v18 = vpop.f32.mrf.mxu1  ;;  %1838 = vmatmul.mubr.f32.gmra.mxu1 %v4484_v38  ;;  %2900 = vmatmul.mubr.f32.gmra.mxu0 %v1611_v40  ;;  %v4489_v38 = vld [vmem:[#allocation9_spill] sm:$0xff] }
 0x150   : > { %v4152_v55 = vadd.f32 %v4014_v42, %v753_v2  ;;  %v4155_v41 = vadd.f32 %v1163_v18, %v4078_v8  ;;  %1842 = vmatprep.mubr.f32.mxu1 %v1573_v6  ;;  %2902 = vmatprep.mubr.f32.mxu0 %v1612_v7  ;;  %v1575_v8 = vld [vmem:[#allocation2 + $0x159] sm:$0xff]  ;;  %v1578_v7 = vld [vmem:[#allocation2 + $0x181] sm:$0xff] }
 0x151   : > { %v755_v11 = vpop.f32.mrf.mxu0  ;;  %v1165_v24 = vpop.f32.mrf.mxu1 }
 0x152   : > { %v1579_v24 = vld [vmem:[#allocation2 + $0x189] sm:$0xff] }
 0x153   : > { %v4157_v3 = vpop.f32.mrf.mxu0  ;;  %v1168_v50 = vpop.f32.mrf.mxu1  ;;  %1843 = vmatmul.mubr.f32.gmra.mxu1 %v4485_v60  ;;  %2903 = vmatmul.mubr.f32.gmra.mxu0 %v1613_v39  ;;  %v4490_v60 = vld [vmem:[#allocation10_spill] sm:$0xff] }
 0x154   : > { %v4161_v48 = vadd.f32 %v1168_v50, %v4088_v49  ;;  %1847 = vmatprep.mubr.f32.mxu1 %v1574_v43 }
 0x155   : > { %v760_v42 = vpop.f32.mrf.mxu0  ;;  %v1170_v22 = vpop.f32.mrf.mxu1 }
 0x157   : > { %v763_v10 = vpop.f32.mrf.mxu0  ;;  %v1173_v34 = vpop.f32.mrf.mxu1  ;;  %1848 = vmatmul.mubr.f32.gmra.mxu1 %v4486_v45  ;;  %v4491_v45 = vld [vmem:[#allocation11_spill] sm:$0xff] }
 0x158   : > { %v4165_v57 = vadd.f32 %v4024_v17, %v763_v10  ;;  %v4168_v32 = vadd.f32 %v1173_v34, %v4100_v51  ;;  %1852 = vmatprep.mubr.f32.mxu1 %v1575_v8  ;;  %v1580_v8 = vld [vmem:[#allocation2 + $0x199] sm:$0xff] }
 0x159   : > { %v765_v29 = vpop.f32.mrf.mxu0  ;;  %v1175_v44 = vpop.f32.mrf.mxu1 }
 0x15b   : > { %v768_v49 = vpop.f32.mrf.mxu0  ;;  %v1178_v25 = vpop.f32.mrf.mxu1  ;;  %1853 = vmatmul.mubr.f32.gmra.mxu1 %v4487_v4 }
 0x15c   : > { %v4172_v23 = vadd.f32 %v1178_v25, %v4109_v27  ;;  %1857 = vmatprep.mubr.f32.mxu1 %v1576_v15  ;;  %v1581_v15 = vld [vmem:[#allocation2 + $0x1a1] sm:$0xff] }
 0x15d   : > { %v770_v63 = vpop.f32.mrf.mxu0  ;;  %v1180_v54 = vpop.f32.mrf.mxu1 }
 0x15e   : > { %v2917_v63 = vld [vmem:[#allocation2] sm:$0xff] }
 0x15f   : > { %v773_v17 = vpop.f32.mrf.mxu0  ;;  %v1183_v40 = vpop.f32.mrf.mxu1  ;;  %1858 = vmatmul.mubr.f32.gmra.mxu1 %v4488_v33 }
 0x160   : > { %v4176_v51 = vadd.f32 %v1183_v40, %v4118_v30  ;;  %1862 = vmatprep.mubr.f32.mxu1 %v1577_v37  ;;  %v4492_v40 = vld [vmem:[#allocation13_spill] sm:$0xff] }
 0x161   : > { %v775_v14 = vpop.f32.mrf.mxu0  ;;  %v1185_v6 = vpop.f32.mrf.mxu1  ;;  %v984_v33 = vadd.f32 %v4492_v40, %v4157_v3 }
 0x163   : > { %v778_v2 = vpop.f32.mrf.mxu0  ;;  %v1188_v18 = vpop.f32.mrf.mxu1  ;;  %1863 = vmatmul.mubr.f32.gmra.mxu1 %v4489_v38 }
 0x164   : > { %v4180_v27 = vadd.f32 %v1188_v18, %v4127_v31  ;;  %1867 = vmatprep.mubr.f32.mxu1 %v1578_v7 }
 0x165   : > { %v780_v39 = vpop.f32.mrf.mxu0  ;;  %v1190_v11 = vpop.f32.mrf.mxu1 }
 0x167   : > { %v783_v43 = vpop.f32.mrf.mxu0  ;;  %v1193_v50 = vpop.f32.mrf.mxu1  ;;  %1868 = vmatmul.mubr.f32.gmra.mxu1 %v4490_v60 }
 0x168   : > { %v4184_v30 = vadd.f32 %v1193_v50, %v4136_v35  ;;  %1872 = vmatprep.mubr.f32.mxu1 %v1579_v24  ;;  %v994_v50 = vadd.f32 %v4017_v47, %v768_v49  ;;  %v1009_v40 = vadd.f32 %v4045_v61, %v783_v43 }
 0x169   : > { %v785_v42 = vpop.f32.mrf.mxu0  ;;  %v1195_v22 = vpop.f32.mrf.mxu1 }
 0x16b   : > { %v788_v10 = vpop.f32.mrf.mxu0  ;;  %v1198_v34 = vpop.f32.mrf.mxu1  ;;  %1873 = vmatmul.mubr.f32.gmra.mxu1 %v4491_v45 }
 0x16c   : > { %v4188_v31 = vadd.f32 %v1198_v34, %v4145_v36  ;;  %1877 = vmatprep.mubr.f32.mxu1 %v1580_v8  ;;  %v999_v34 = vadd.f32 %v4035_v53, %v773_v17 }
 0x16d   : > { %v790_v29 = vpop.f32.mrf.mxu0  ;;  %v1200_v44 = vpop.f32.mrf.mxu1 }
 0x16f   : > { %v793_v25 = vpop.f32.mrf.mxu0  ;;  %v1203_v4 = vpop.f32.mrf.mxu1  ;;  %1878 = vmatmul.mubr.f32.gmra.mxu1 %v2917_v63 }
 0x170   : > { %v4191_v35 = vadd.f32 %v1203_v4, %v4152_v55  ;;  %1882 = vmatprep.mubr.f32.mxu1 %v1581_v15 }
 0x171   : > { %v795_v54 = vpop.f32.mrf.mxu0  ;;  %v1205_v37 = vpop.f32.mrf.mxu1 }
 0x173   : > { %v798_v14 = vpop.f32.mrf.mxu0  ;;  %v1208_v36 = vpop.f32.mrf.mxu1  ;;  %1883 = vmatmul.mubr.f32.gmra.mxu1 %v2917_v63 }
 0x174   : > { %v4195_v6 = vadd.f32 %v1208_v36, %v984_v33 }
 0x175   : > { %v800_v7 = vpop.f32.mrf.mxu0  ;;  %v1210_v18 = vpop.f32.mrf.mxu1 }
 0x176   : > { %v1014_v18 = vadd.f32 %v4040_v52, %v788_v10 }
 0x177   : > { %v803_v38 = vpop.f32.mrf.mxu0  ;;  %v1213_v39 = vpop.f32.mrf.mxu1 }
 0x178   : > { %v4198_v11 = vadd.f32 %v1213_v39, %v4165_v57  ;;  %v1004_v57 = vadd.f32 %v4030_v28, %v778_v2 }
 0x179   : > { %v805_v55 = vpop.f32.mrf.mxu0  ;;  %v1215_v24 = vpop.f32.mrf.mxu1 }
 0x17b   : > { %v808_v60 = vpop.f32.mrf.mxu0  ;;  %v1218_v42 = vpop.f32.mrf.mxu1 }
 0x17c   : > { %v4201_v22 = vadd.f32 %v1218_v42, %v994_v50  ;;  %v1019_v50 = vadd.f32 %v4055_v5, %v793_v25 }
 0x17d   : > { %v810_v3 = vpop.f32.mrf.mxu0  ;;  %v1220_v8 = vpop.f32.mrf.mxu1 }
 0x17f   : > { %v813_v45 = vpop.f32.mrf.mxu0  ;;  %v1223_v29 = vpop.f32.mrf.mxu1 }
 0x180   : > { %v4204_v44 = vadd.f32 %v1223_v29, %v999_v34  ;;  %v1024_v34 = vadd.f32 %v4050_v58, %v798_v14 }
 0x181   : > { %v815_v15 = vpop.f32.mrf.mxu0  ;;  %v1225_v4 = vpop.f32.mrf.mxu1 }
 0x183   : > { %v818_v63 = vpop.f32.mrf.mxu0  ;;  %v1228_v54 = vpop.f32.mrf.mxu1 }
 0x184   : > { %v4207_v37 = vadd.f32 %v1228_v54, %v1004_v57  ;;  %v1029_v57 = vadd.f32 %v4065_v12, %v803_v38 }
 0x185   : > { %v820_v47 = vpop.f32.mrf.mxu0  ;;  %v1230_v49 = vpop.f32.mrf.mxu1 }
 0x187   : > { %v823_v33 = vpop.f32.mrf.mxu0  ;;  %v1233_v36 = vpop.f32.mrf.mxu1 }
 0x188   : > { %v4210_v7 = vadd.f32 %v1233_v36, %v1009_v40  ;;  %v1034_v36 = vadd.f32 %v4060_v1, %v808_v60 }
 0x189   : > { %v825_v53 = vpop.f32.mrf.mxu0  ;;  %v1235_v17 = vpop.f32.mrf.mxu1 }
 0x18b   : > { %v828_v39 = vpop.f32.mrf.mxu0  ;;  %v1238_v55 = vpop.f32.mrf.mxu1 }
 0x18c   : > { %v4213_v24 = vadd.f32 %v1238_v55, %v1014_v18  ;;  %v1039_v55 = vadd.f32 %v4075_v20, %v813_v45 }
 0x18d   : > { %v830_v28 = vpop.f32.mrf.mxu0  ;;  %v1240_v2 = vpop.f32.mrf.mxu1 }
 0x18f   : > { %v833_v42 = vpop.f32.mrf.mxu0  ;;  %v1243_v3 = vpop.f32.mrf.mxu1 }
 0x190   : > { %v4216_v8 = vadd.f32 %v1243_v3, %v1019_v50  ;;  %v1044_v3 = vadd.f32 %v4070_v46, %v818_v63 }
 0x191   : > { %v835_v61 = vpop.f32.mrf.mxu0  ;;  %v1245_v43 = vpop.f32.mrf.mxu1 }
 0x193   : > { %v838_v29 = vpop.f32.mrf.mxu0  ;;  %v1248_v15 = vpop.f32.mrf.mxu1 }
 0x194   : > { %v4219_v4 = vadd.f32 %v1248_v15, %v1024_v34  ;;  %v1049_v15 = vadd.f32 %v4085_v59, %v823_v33 }
 0x195   : > { %v840_v52 = vpop.f32.mrf.mxu0  ;;  %v1250_v10 = vpop.f32.mrf.mxu1 }
 0x197   : > { %v1253_v54 = vpop.f32.mrf.mxu1  ;;  %v2779_v47 = vpop.f32.mrf.mxu0 }
 0x198   : > { %v4222_v49 = vadd.f32 %v1253_v54, %v1029_v57  ;;  %v4225_v5 = vadd.f32 %v2779_v47, %v4112_v13  ;;  %v1054_v54 = vadd.f32 %v4080_v62, %v828_v39 }
 0x199   : > { %v1255_v25 = vpop.f32.mrf.mxu1  ;;  %v1358_v40 = vpop.f32.mrf.mxu0 }
 0x19a   : > { %v4229_v58 = vadd.f32 %v1358_v40, %v4103_v26 }
 0x19b   : > { %v1258_v14 = vpop.f32.mrf.mxu1  ;;  %v2782_v53 = vpop.f32.mrf.mxu0 }
 0x19c   : > { %v4231_v17 = vadd.f32 %v1258_v14, %v1034_v36  ;;  %v4234_v12 = vadd.f32 %v2782_v53, %v4130_v21  ;;  %v1059_v36 = vadd.f32 %v4095_v19, %v833_v42 }
 0x19d   : > { %v1260_v38 = vpop.f32.mrf.mxu1  ;;  %v1368_v18 = vpop.f32.mrf.mxu0 }
 0x19e   : > { %v4238_v13 = vadd.f32 %v1368_v18, %v4121_v56  ;;  %v1064_v18 = vadd.f32 %v4090_v16, %v838_v29 }
 0x19f   : > { %v1263_v28 = vpop.f32.mrf.mxu1  ;;  %v2785_v2 = vpop.f32.mrf.mxu0 }
 0x1a0   : > { %v4240_v1 = vadd.f32 %v1263_v28, %v1039_v55  ;;  %v4243_v26 = vadd.f32 %v2785_v2, %v4148_v0 }
 0x1a1   : > { %v1265_v60 = vpop.f32.mrf.mxu1  ;;  %v1378_v50 = vpop.f32.mrf.mxu0 }
 0x1a2   : > { %v4247_v21 = vadd.f32 %v1378_v50, %v4139_v9 }
 0x1a3   : > { %v1268_v61 = vpop.f32.mrf.mxu1  ;;  %v2788_v43 = vpop.f32.mrf.mxu0 }
 0x1a4   : > { %v4249_v20 = vadd.f32 %v1268_v61, %v1044_v3  ;;  %v4252_v56 = vadd.f32 %v2788_v43, %v4161_v48 }
 0x1a5   : > { %v1270_v45 = vpop.f32.mrf.mxu1  ;;  %v1388_v34 = vpop.f32.mrf.mxu0 }
 0x1a6   : > { %v4256_v0 = vadd.f32 %v1388_v34, %v4155_v41 }
 0x1a7   : > { %v1273_v52 = vpop.f32.mrf.mxu1  ;;  %v2791_v10 = vpop.f32.mrf.mxu0 }
 0x1a8   : > { %v4258_v46 = vadd.f32 %v1273_v52, %v1049_v15  ;;  %v4261_v9 = vadd.f32 %v2791_v10, %v4172_v23 }
 0x1a9   : > { %v1275_v63 = vpop.f32.mrf.mxu1  ;;  %v1398_v57 = vpop.f32.mrf.mxu0 }
 0x1aa   : > { %v4265_v48 = vadd.f32 %v1398_v57, %v4168_v32 }
 0x1ab   : > { %v1278_v47 = vpop.f32.mrf.mxu1  ;;  %v2794_v25 = vpop.f32.mrf.mxu0 }
 0x1ac   : > { %v1279_v59 = vadd.f32 %v1278_v47, %v1054_v54  ;;  %v4268_v41 = vadd.f32 %v2794_v25, %v4180_v27 }
 0x1ad   : > { %v1280_v33 = vpop.f32.mrf.mxu1  ;;  %v1408_v40 = vpop.f32.mrf.mxu0 }
 0x1ae   : > { %v4272_v23 = vadd.f32 %v1408_v40, %v4176_v51 }
 0x1af   : > { %v1283_v14 = vpop.f32.mrf.mxu1  ;;  %v2797_v53 = vpop.f32.mrf.mxu0 }
 0x1b0   : > { %v1284_v38 = vadd.f32 %v1283_v14, %v1059_v36  ;;  %v4275_v62 = vadd.f32 %v2797_v53, %v4188_v31 }
 0x1b1   : > { %v1285_v32 = vpop.f32.mrf.mxu1  ;;  %v1418_v39 = vpop.f32.mrf.mxu0 }
 0x1b2   : > { %v4279_v27 = vadd.f32 %v1418_v39, %v4184_v30 }
 0x1b3   : > { %v1288_v55 = vpop.f32.mrf.mxu1  ;;  %v2800_v28 = vpop.f32.mrf.mxu0 }
 0x1b4   : > { %v1289_v2 = vadd.f32 %v1288_v55, %v1064_v18  ;;  %v4282_v19 = vadd.f32 %v2800_v28, %v4195_v6 }
 0x1b5   : > { %v1290_v51 = vpop.f32.mrf.mxu1  ;;  %v1428_v42 = vpop.f32.mrf.mxu0 }
 0x1b6   : > { %v4285_v60 = vadd.f32 %v1428_v42, %v4191_v35 }
 0x1b7   : > { %v2803_v31 = vpop.f32.mrf.mxu0  ;;  %v1729_v50 = vpop.f32.mrf.mxu1 }
 0x1b8   : > { %v4288_v3 = vadd.f32 %v2803_v31, %v4201_v22 }
 0x1b9   : > { %v1438_v16 = vpop.f32.mrf.mxu0  ;;  %v1731_v29 = vpop.f32.mrf.mxu1 }
 0x1ba   : > { %v4291_v30 = vadd.f32 %v1438_v16, %v4198_v11 }
 0x1bb   : > { %v2806_v61 = vpop.f32.mrf.mxu0  ;;  %v1734_v43 = vpop.f32.mrf.mxu1 }
 0x1bc   : > { %v4294_v6 = vadd.f32 %v2806_v61, %v4207_v37 }
 0x1bd   : > { %v1448_v45 = vpop.f32.mrf.mxu0  ;;  %v1736_v34 = vpop.f32.mrf.mxu1 }
 0x1be   : > { %v4297_v35 = vadd.f32 %v1448_v45, %v4204_v44 }
 0x1bf   : > { %v2809_v15 = vpop.f32.mrf.mxu0  ;;  %v1739_v52 = vpop.f32.mrf.mxu1 }
 0x1c0   : > { %v4300_v22 = vadd.f32 %v2809_v15, %v4213_v24 }
 0x1c1   : > { %v1458_v10 = vpop.f32.mrf.mxu0  ;;  %v1741_v63 = vpop.f32.mrf.mxu1 }
 0x1c2   : > { %v4303_v11 = vadd.f32 %v1458_v10, %v4210_v7 }
 0x1c3   : > { %v2812_v57 = vpop.f32.mrf.mxu0  ;;  %v1744_v54 = vpop.f32.mrf.mxu1 }
 0x1c4   : > { %v4306_v37 = vadd.f32 %v2812_v57, %v4219_v4 }
 0x1c5   : > { %v1468_v47 = vpop.f32.mrf.mxu0  ;;  %v1746_v25 = vpop.f32.mrf.mxu1 }
 0x1c6   : > { %v4309_v44 = vadd.f32 %v1468_v47, %v4216_v8 }
 0x1c7   : > { %v2815_v33 = vpop.f32.mrf.mxu0  ;;  %v1749_v40 = vpop.f32.mrf.mxu1 }
 0x1c8   : > { %v4312_v24 = vadd.f32 %v2815_v33, %v4231_v17 }
 0x1c9   : > { %v1478_v36 = vpop.f32.mrf.mxu0  ;;  %v1751_v14 = vpop.f32.mrf.mxu1 }
 0x1ca   : > { %v4315_v7 = vadd.f32 %v1478_v36, %v4222_v49 }
 0x1cb   : > { %v2818_v53 = vpop.f32.mrf.mxu0  ;;  %v1754_v32 = vpop.f32.mrf.mxu1 }
 0x1cc   : > { %v4318_v4 = vadd.f32 %v2818_v53, %v4249_v20 }
 0x1cd   : > { %v1488_v39 = vpop.f32.mrf.mxu0  ;;  %v1756_v18 = vpop.f32.mrf.mxu1 }
 0x1ce   : > { %v4321_v8 = vadd.f32 %v1488_v39, %v4240_v1 }
 0x1cf   : > { %v2821_v55 = vpop.f32.mrf.mxu0  ;;  %v4323_v28 = vpop.f32.mrf.mxu1 }
 0x1d0   : > { %v4325_v17 = vadd.f32 %v2821_v55, %v1279_v59  ;;  %v4339_v59 = vld [vmem:[%s4458_s2] ss:$0 sm:$0xff] }
 0x1d1   : > { %v1498_v51 = vpop.f32.mrf.mxu0  ;;  %v1761_v42 = vpop.f32.mrf.mxu1 }
 0x1d2   : > { %v4328_v49 = vadd.f32 %v1498_v51, %v4258_v46 }
 0x1d3   : > { %v2824_v31 = vpop.f32.mrf.mxu0  ;;  %v1764_v16 = vpop.f32.mrf.mxu1 }
 0x1d4   : > { %v4330_v20 = vadd.f32 %v2824_v31, %v1289_v2 }
 0x1d5   : > { %v1508_v29 = vpop.f32.mrf.mxu0  ;;  %v1766_v61 = vpop.f32.mrf.mxu1 }
 0x1d6   : > { %v4332_v45 = vadd.f32 %v1508_v29, %v1284_v38 }
 0x1d7   : > { %v4334_v1 = vpop.f32.mrf.mxu1  ;;  %v2859_v34 = vpop.f32.mrf.mxu0 }
 0x1d8   : > { %v1960_v15 = vadd.f32 %v2859_v34, %v1734_v43 }
 0x1d9   : > { %v1771_v10 = vpop.f32.mrf.mxu1  ;;  %v1954_v46 = vpop.f32.mrf.mxu0 }
 0x1da   : > { %v2114_v63 = vadd.f32 %v1960_v15, %v4225_v5  ;;  %v1955_v57 = vadd.f32 %v1954_v46, %v1729_v50 }
 0x1db   : > { %v1774_v38 = vpop.f32.mrf.mxu1  ;;  %v2862_v2 = vpop.f32.mrf.mxu0 }
 0x1dc   : > { %v2153_v43 = vadd.f32 %v4339_v59, %v2114_v63  ;;  %v2113_v47 = vadd.f32 %v1955_v57, %v4229_v58  ;;  %v1970_v25 = vadd.f32 %v2862_v2, %v1744_v54 }
 0x1dd   : > { %v1776_v33 = vpop.f32.mrf.mxu1  ;;  %v1964_v36 = vpop.f32.mrf.mxu0 }
 0x1de   : > { %2185 = vst [vmem:[%s4347_s14 + $0x8] sm:$0xff] %v2153_v43  ;;  %v2152_v5 = vadd.f32 %v4339_v59, %v2113_v47  ;;  %v2116_v50 = vadd.f32 %v1970_v25, %v4234_v12  ;;  %v1965_v14 = vadd.f32 %v1964_v36, %v1739_v52  ;;  %v2255_v53 = vmul.f32 %v2153_v43, %v2153_v43 }
 0x1df   : > { %v4354_v39 = vpop.f32.mrf.mxu1  ;;  %v2865_v18 = vpop.f32.mrf.mxu0 }
 0x1e0   : > { %2184 = vst [vmem:[%s4347_s14] sm:$0xff] %v2152_v5  ;;  %v2216_v55 = vadd.f32 %v2153_v43, %v2152_v5  ;;  %v2254_v51 = vmul.f32 %v2152_v5, %v2152_v5  ;;  %v2155_v58 = vadd.f32 %v4339_v59, %v2116_v50  ;;  %v2115_v54 = vadd.f32 %v1965_v14, %v4238_v13 }
 0x1e1   : > { %v1980_v42 = vadd.f32 %v2865_v18, %v1754_v32  ;;  %v1781_v31 = vpop.f32.mrf.mxu1  ;;  %v1974_v29 = vpop.f32.mrf.mxu0 }
 0x1e2   : > { %v2286_v61 = vadd.f32 %v2255_v53, %v2254_v51  ;;  %2187 = vst [vmem:[%s4347_s14 + $0x18] sm:$0xff] %v2155_v58  ;;  %v2154_v12 = vadd.f32 %v4339_v59, %v2115_v54  ;;  %v1975_v52 = vadd.f32 %v1974_v29, %v1749_v40  ;;  %v2257_v32 = vmul.f32 %v2155_v58, %v2155_v58 }
 0x1e3   : > { %v2118_v34 = vadd.f32 %v1980_v42, %v4243_v26  ;;  %v1784_v15 = vpop.f32.mrf.mxu1  ;;  %v2868_v10 = vpop.f32.mrf.mxu0 }
 0x1e4   : > { %2186 = vst [vmem:[%s4347_s14 + $0x10] sm:$0xff] %v2154_v12  ;;  %v2217_v46 = vadd.f32 %v2216_v55, %v2154_v12  ;;  %v2256_v63 = vmul.f32 %v2154_v12, %v2154_v12  ;;  %v2117_v57 = vadd.f32 %v1975_v52, %v4247_v21  ;;  %v1990_v13 = vadd.f32 %v2868_v10, %v1764_v16 }
 0x1e5   : > { %v2157_v2 = vadd.f32 %v4339_v59, %v2118_v34  ;;  %v1786_v43 = vpop.f32.mrf.mxu1  ;;  %v1984_v47 = vpop.f32.mrf.mxu0 }
 0x1e6   : > { %v2287_v25 = vadd.f32 %v2286_v61, %v2256_v63  ;;  %v2156_v40 = vadd.f32 %v4339_v59, %v2117_v57  ;;  %v2218_v33 = vadd.f32 %v2217_v46, %v2155_v58  ;;  %v2120_v26 = vadd.f32 %v1990_v13, %v4252_v56 }
 0x1e7   : > { %2189 = vst [vmem:[%s4347_s14 + $0x28] sm:$0xff] %v2157_v2  ;;  %v1985_v36 = vadd.f32 %v1984_v47, %v4323_v28  ;;  %v1789_v5 = vpop.f32.mrf.mxu1  ;;  %v2871_v50 = vpop.f32.mrf.mxu0  ;;  %v2259_v54 = vmul.f32 %v2157_v2, %v2157_v2 }
 0x1e8   : > { %2188 = vst [vmem:[%s4347_s14 + $0x20] sm:$0xff] %v2156_v40  ;;  %v2219_v21 = vadd.f32 %v2218_v33, %v2156_v40  ;;  %v2258_v16 = vmul.f32 %v2156_v40, %v2156_v40  ;;  %v2288_v14 = vadd.f32 %v2287_v25, %v2257_v32  ;;  %v2159_v53 = vadd.f32 %v4339_v59, %v2120_v26 }
 0x1e9   : > { %v2119_v18 = vadd.f32 %v1985_v36, %v4256_v0  ;;  %v2000_v55 = vadd.f32 %v2871_v50, %v1774_v38  ;;  %v1791_v51 = vpop.f32.mrf.mxu1  ;;  %v1994_v58 = vpop.f32.mrf.mxu0 }
 0x1ea   : > { %v2289_v56 = vadd.f32 %v2288_v14, %v2258_v16  ;;  %2191 = vst [vmem:[%s4347_s14 + $0x38] sm:$0xff] %v2159_v53  ;;  %v2220_v42 = vadd.f32 %v2219_v21, %v2157_v2  ;;  %v1995_v28 = vadd.f32 %v1994_v58, %v4334_v1  ;;  %v2261_v32 = vmul.f32 %v2159_v53, %v2159_v53 }
 0x1eb   : > { %v2158_v31 = vadd.f32 %v4339_v59, %v2119_v18  ;;  %v2122_v29 = vadd.f32 %v2000_v55, %v4261_v9  ;;  %v1794_v61 = vpop.f32.mrf.mxu1  ;;  %v2874_v12 = vpop.f32.mrf.mxu0 }
 0x1ec   : > { %v2290_v52 = vadd.f32 %v2289_v56, %v2259_v54  ;;  %v2121_v0 = vadd.f32 %v1995_v28, %v4265_v48  ;;  %v2010_v34 = vadd.f32 %v2874_v12, %v1784_v15 }
 0x1ed   : > { %2190 = vst [vmem:[%s4347_s14 + $0x30] sm:$0xff] %v2158_v31  ;;  %v2221_v38 = vadd.f32 %v2220_v42, %v2158_v31  ;;  %v2260_v10 = vmul.f32 %v2158_v31, %v2158_v31  ;;  %v2161_v46 = vadd.f32 %v4339_v59, %v2122_v29  ;;  %v1796_v63 = vpop.f32.mrf.mxu1  ;;  %v2004_v57 = vpop.f32.mrf.mxu0 }
 0x1ee   : > { %v2160_v1 = vadd.f32 %v4339_v59, %v2121_v0  ;;  %v2124_v13 = vadd.f32 %v2010_v34, %v4268_v41  ;;  %v2005_v9 = vadd.f32 %v2004_v57, %v4354_v39 }
 0x1ef   : > { %v2291_v2 = vadd.f32 %v2290_v52, %v2260_v10  ;;  %2193 = vst [vmem:[%s4347_s14 + $0x48] sm:$0xff] %v2161_v46  ;;  %v2222_v48 = vadd.f32 %v2221_v38, %v2159_v53  ;;  %v1799_v15 = vpop.f32.mrf.mxu1  ;;  %v2877_v43 = vpop.f32.mrf.mxu0  ;;  %v2263_v14 = vmul.f32 %v2161_v46, %v2161_v46 }
 0x1f0   : > { %2192 = vst [vmem:[%s4347_s14 + $0x40] sm:$0xff] %v2160_v1  ;;  %v2262_v47 = vmul.f32 %v2160_v1, %v2160_v1  ;;  %v2163_v25 = vadd.f32 %v4339_v59, %v2124_v13  ;;  %v2123_v40 = vadd.f32 %v2005_v9, %v4272_v23  ;;  %v2020_v33 = vadd.f32 %v2877_v43, %v1794_v61 }
 0x1f1   : > { %v2223_v26 = vadd.f32 %v2222_v48, %v2160_v1  ;;  %v2292_v36 = vadd.f32 %v2291_v2, %v2261_v32  ;;  %v1801_v41 = vpop.f32.mrf.mxu1  ;;  %v2014_v50 = vpop.f32.mrf.mxu0 }
 0x1f2   : > { %2195 = vst [vmem:[%s4347_s14 + $0x58] sm:$0xff] %v2163_v25  ;;  %v2162_v39 = vadd.f32 %v4339_v59, %v2123_v40  ;;  %v2126_v21 = vadd.f32 %v2020_v33, %v4275_v62  ;;  %v2015_v16 = vadd.f32 %v2014_v50, %v1789_v5  ;;  %v2265_v12 = vmul.f32 %v2163_v25, %v2163_v25 }
 0x1f3   : > { %v2293_v53 = vadd.f32 %v2292_v36, %v2262_v47  ;;  %v2224_v18 = vadd.f32 %v2223_v26, %v2161_v46  ;;  %v1804_v55 = vpop.f32.mrf.mxu1  ;;  %v2880_v51 = vpop.f32.mrf.mxu0 }
 0x1f4   : > { %2194 = vst [vmem:[%s4347_s14 + $0x50] sm:$0xff] %v2162_v39  ;;  %v2264_v58 = vmul.f32 %v2162_v39, %v2162_v39  ;;  %v2165_v23 = vadd.f32 %v4339_v59, %v2126_v21  ;;  %v2125_v54 = vadd.f32 %v2015_v16, %v4279_v27  ;;  %v2030_v56 = vadd.f32 %v2880_v51, %v1804_v55 }
 0x1f5   : > { %v2225_v42 = vadd.f32 %v2224_v18, %v2162_v39  ;;  %v2294_v28 = vadd.f32 %v2293_v53, %v2263_v14  ;;  %v1806_v31 = vpop.f32.mrf.mxu1  ;;  %v2024_v29 = vpop.f32.mrf.mxu0 }
 0x1f6   : > { %2197 = vst [vmem:[%s4347_s14 + $0x68] sm:$0xff] %v2165_v23  ;;  %v2164_v62 = vadd.f32 %v4339_v59, %v2125_v54  ;;  %v2128_v5 = vadd.f32 %v2030_v56, %v4282_v19  ;;  %v2025_v61 = vadd.f32 %v2024_v29, %v1799_v15  ;;  %v2267_v32 = vmul.f32 %v2165_v23, %v2165_v23 }
 0x1f7   : > { %v2295_v52 = vadd.f32 %v2294_v28, %v2264_v58  ;;  %v2226_v0 = vadd.f32 %v2225_v42, %v2163_v25  ;;  %v1809_v34 = vpop.f32.mrf.mxu1  ;;  %v2883_v38 = vpop.f32.mrf.mxu0 }
 0x1f8   : > { %2196 = vst [vmem:[%s4347_s14 + $0x60] sm:$0xff] %v2164_v62  ;;  %v2266_v27 = vmul.f32 %v2164_v62, %v2164_v62  ;;  %v2167_v10 = vadd.f32 %v4339_v59, %v2128_v5  ;;  %v2127_v46 = vadd.f32 %v2025_v61, %v4285_v60 }
 0x1f9   : > { %v2227_v63 = vadd.f32 %v2226_v0, %v2164_v62  ;;  %v2296_v57 = vadd.f32 %v2295_v52, %v2265_v12  ;;  %v1811_v1 = vpop.f32.mrf.mxu1  ;;  %v2034_v13 = vpop.f32.mrf.mxu0 }
 0x1fa   : > { %2199 = vst [vmem:[%s4347_s14 + $0x78] sm:$0xff] %v2167_v10  ;;  %v2166_v19 = vadd.f32 %v4339_v59, %v2127_v46  ;;  %v2035_v9 = vadd.f32 %v2034_v13, %v1809_v34  ;;  %v2269_v39 = vmul.f32 %v2167_v10, %v2167_v10 }
 0x1fb   : > { %v2297_v2 = vadd.f32 %v2296_v57, %v2266_v27  ;;  %v2228_v48 = vadd.f32 %v2227_v63, %v2165_v23  ;;  %v1814_v15 = vpop.f32.mrf.mxu1  ;;  %v2886_v43 = vpop.f32.mrf.mxu0 }
 0x1fc   : > { %2198 = vst [vmem:[%s4347_s14 + $0x70] sm:$0xff] %v2166_v19  ;;  %v2268_v47 = vmul.f32 %v2166_v19, %v2166_v19  ;;  %v2129_v25 = vadd.f32 %v2035_v9, %v4291_v30  ;;  %v2040_v40 = vadd.f32 %v2883_v38, %v1814_v15 }
 0x1fd   : > { %v2229_v60 = vadd.f32 %v2228_v48, %v2166_v19  ;;  %v2298_v33 = vadd.f32 %v2297_v2, %v2267_v32  ;;  %v1816_v26 = vpop.f32.mrf.mxu1  ;;  %v2044_v36 = vpop.f32.mrf.mxu0 }
 0x1fe   : > { %v2168_v41 = vadd.f32 %v4339_v59, %v2129_v25  ;;  %v2130_v50 = vadd.f32 %v2040_v40, %v4288_v3 }
 0x1ff   : > { %v2299_v21 = vadd.f32 %v2298_v33, %v2268_v47  ;;  %v2230_v16 = vadd.f32 %v2229_v60, %v2167_v10  ;;  %v1819_v14 = vpop.f32.mrf.mxu1  ;;  %v2889_v23 = vpop.f32.mrf.mxu0 }
 0x200   : > { %2200 = vst [vmem:[%s4347_s14 + $0x80] sm:$0xff] %v2168_v41  ;;  %v2270_v53 = vmul.f32 %v2168_v41, %v2168_v41  ;;  %v2169_v18 = vadd.f32 %v4339_v59, %v2130_v50  ;;  %v2045_v55 = vadd.f32 %v2044_v36, %v1819_v14 }
 0x201   : > { %v2231_v30 = vadd.f32 %v2230_v16, %v2168_v41  ;;  %v2300_v51 = vadd.f32 %v2299_v21, %v2269_v39  ;;  %v1821_v58 = vpop.f32.mrf.mxu1  ;;  %v2054_v61 = vpop.f32.mrf.mxu0 }
 0x202   : > { %2201 = vst [vmem:[%s4347_s14 + $0x88] sm:$0xff] %v2169_v18  ;;  %v2271_v54 = vmul.f32 %v2169_v18, %v2169_v18  ;;  %v2131_v56 = vadd.f32 %v2045_v55, %v4297_v35 }
 0x203   : > { %v2301_v42 = vadd.f32 %v2300_v51, %v2270_v53  ;;  %v2232_v3 = vadd.f32 %v2231_v30, %v2169_v18  ;;  %v1824_v28 = vpop.f32.mrf.mxu1  ;;  %v2892_v46 = vpop.f32.mrf.mxu0 }
 0x204   : > { %v2170_v31 = vadd.f32 %v4339_v59, %v2131_v56  ;;  %v2050_v29 = vadd.f32 %v2886_v43, %v1824_v28 }
 0x205   : > { %v2302_v62 = vadd.f32 %v2301_v42, %v2271_v54  ;;  %v1826_v5 = vpop.f32.mrf.mxu1  ;;  %v2064_v2 = vpop.f32.mrf.mxu0 }
 0x206   : > { %2202 = vst [vmem:[%s4347_s14 + $0x90] sm:$0xff] %v2170_v31  ;;  %v2233_v12 = vadd.f32 %v2232_v3, %v2170_v31  ;;  %v2272_v52 = vmul.f32 %v2170_v31, %v2170_v31  ;;  %v2132_v0 = vadd.f32 %v2050_v29, %v4294_v6 }
 0x207   : > { %v1829_v34 = vpop.f32.mrf.mxu1  ;;  %v2895_v33 = vpop.f32.mrf.mxu0 }
 0x208   : > { %v2303_v38 = vadd.f32 %v2302_v62, %v2272_v52  ;;  %v2171_v35 = vadd.f32 %v4339_v59, %v2132_v0  ;;  %v2055_v27 = vadd.f32 %v2054_v61, %v1829_v34 }
 0x209   : > { %v1831_v10 = vpop.f32.mrf.mxu1  ;;  %v2074_v14 = vpop.f32.mrf.mxu0 }
 0x20a   : > { %2203 = vst [vmem:[%s4347_s14 + $0x98] sm:$0xff] %v2171_v35  ;;  %v2234_v63 = vadd.f32 %v2233_v12, %v2171_v35  ;;  %v2273_v57 = vmul.f32 %v2171_v35, %v2171_v35  ;;  %v2133_v1 = vadd.f32 %v2055_v27, %v4303_v11 }
 0x20b   : > { %v1834_v13 = vpop.f32.mrf.mxu1  ;;  %v2898_v54 = vpop.f32.mrf.mxu0 }
 0x20c   : > { %v2304_v19 = vadd.f32 %v2303_v38, %v2273_v57  ;;  %v2172_v9 = vadd.f32 %v4339_v59, %v2133_v1  ;;  %v2060_v32 = vadd.f32 %v2889_v23, %v1834_v13 }
 0x20d   : > { %v1836_v6 = vpop.f32.mrf.mxu1  ;;  %v2084_v5 = vpop.f32.mrf.mxu0 }
 0x20e   : > { %2204 = vst [vmem:[%s4347_s14 + $0xa0] sm:$0xff] %v2172_v9  ;;  %v2235_v48 = vadd.f32 %v2234_v63, %v2172_v9  ;;  %v2274_v15 = vmul.f32 %v2172_v9, %v2172_v9  ;;  %v2134_v43 = vadd.f32 %v2060_v32, %v4300_v22 }
 0x20f   : > { %v1839_v47 = vpop.f32.mrf.mxu1  ;;  %v2901_v27 = vpop.f32.mrf.mxu0 }
 0x210   : > { %v2305_v25 = vadd.f32 %v2304_v19, %v2274_v15  ;;  %v2173_v40 = vadd.f32 %v4339_v59, %v2134_v43  ;;  %v2065_v60 = vadd.f32 %v2064_v2, %v1839_v47 }
 0x211   : > { %v1841_v11 = vpop.f32.mrf.mxu1  ;;  %v2094_v9 = vpop.f32.mrf.mxu0 }
 0x212   : > { %2205 = vst [vmem:[%s4347_s14 + $0xa8] sm:$0xff] %v2173_v40  ;;  %v2236_v26 = vadd.f32 %v2235_v48, %v2173_v40  ;;  %v2275_v36 = vmul.f32 %v2173_v40, %v2173_v40  ;;  %v2135_v41 = vadd.f32 %v2065_v60, %v4309_v44 }
 0x213   : > { %v1844_v50 = vpop.f32.mrf.mxu1 }
 0x214   : > { %v2306_v39 = vadd.f32 %v2305_v25, %v2275_v36  ;;  %v2174_v21 = vadd.f32 %v4339_v59, %v2135_v41  ;;  %v2070_v16 = vadd.f32 %v2892_v46, %v1844_v50  ;;  %v2904_v25 = vpop.f32.mrf.mxu0 }
 0x215   : > { %v1846_v22 = vpop.f32.mrf.mxu1 }
 0x216   : > { %2206 = vst [vmem:[%s4347_s14 + $0xb0] sm:$0xff] %v2174_v21  ;;  %v2237_v53 = vadd.f32 %v2236_v26, %v2174_v21  ;;  %v2276_v18 = vmul.f32 %v2174_v21, %v2174_v21  ;;  %v2136_v55 = vadd.f32 %v2070_v16, %v4306_v37  ;;  %v2104_v50 = vpop.f32.mrf.mxu0 }
 0x217   : > { %v1849_v30 = vpop.f32.mrf.mxu1 }
 0x218   : > { %v2307_v51 = vadd.f32 %v2306_v39, %v2276_v18  ;;  %v2175_v58 = vadd.f32 %v4339_v59, %v2136_v55  ;;  %v2075_v23 = vadd.f32 %v2074_v14, %v1849_v30 }
 0x219   : > { %v1851_v44 = vpop.f32.mrf.mxu1 }
 0x21a   : > { %2207 = vst [vmem:[%s4347_s14 + $0xb8] sm:$0xff] %v2175_v58  ;;  %v2238_v56 = vadd.f32 %v2237_v53, %v2175_v58  ;;  %v2277_v42 = vmul.f32 %v2175_v58, %v2175_v58  ;;  %v2137_v3 = vadd.f32 %v2075_v23, %v4315_v7 }
 0x21b   : > { %v1854_v28 = vpop.f32.mrf.mxu1 }
 0x21c   : > { %v2308_v31 = vadd.f32 %v2307_v51, %v2277_v42  ;;  %v2176_v29 = vadd.f32 %v4339_v59, %v2137_v3  ;;  %v2080_v62 = vadd.f32 %v2895_v33, %v1854_v28 }
 0x21d   : > { %v1856_v37 = vpop.f32.mrf.mxu1 }
 0x21e   : > { %2208 = vst [vmem:[%s4347_s14 + $0xc0] sm:$0xff] %v2176_v29  ;;  %v2239_v61 = vadd.f32 %v2238_v56, %v2176_v29  ;;  %v2278_v12 = vmul.f32 %v2176_v29, %v2176_v29  ;;  %v2138_v52 = vadd.f32 %v2080_v62, %v4312_v24 }
 0x21f   : > { %v1859_v0 = vpop.f32.mrf.mxu1 }
 0x220   : > { %v2309_v34 = vadd.f32 %v2308_v31, %v2278_v12  ;;  %v2177_v38 = vadd.f32 %v4339_v59, %v2138_v52  ;;  %v2085_v35 = vadd.f32 %v2084_v5, %v1859_v0 }
 0x221   : > { %v1861_v7 = vpop.f32.mrf.mxu1 }
 0x222   : > { %2209 = vst [vmem:[%s4347_s14 + $0xc8] sm:$0xff] %v2177_v38  ;;  %v2240_v10 = vadd.f32 %v2239_v61, %v2177_v38  ;;  %v2279_v46 = vmul.f32 %v2177_v38, %v2177_v38  ;;  %v2139_v63 = vadd.f32 %v2085_v35, %v4321_v8 }
 0x223   : > { %v1864_v57 = vpop.f32.mrf.mxu1 }
 0x224   : > { %v2310_v1 = vadd.f32 %v2309_v34, %v2279_v46  ;;  %v2178_v13 = vadd.f32 %v4339_v59, %v2139_v63  ;;  %v2090_v19 = vadd.f32 %v2898_v54, %v1864_v57 }
 0x225   : > { %v1866_v24 = vpop.f32.mrf.mxu1 }
 0x226   : > { %2210 = vst [vmem:[%s4347_s14 + $0xd0] sm:$0xff] %v2178_v13  ;;  %v2241_v32 = vadd.f32 %v2240_v10, %v2178_v13  ;;  %v2280_v6 = vmul.f32 %v2178_v13, %v2178_v13  ;;  %v2140_v2 = vadd.f32 %v2090_v19, %v4318_v4 }
 0x227   : > { %v1869_v48 = vpop.f32.mrf.mxu1 }
 0x228   : > { %v2311_v15 = vadd.f32 %v2310_v1, %v2280_v6  ;;  %v2179_v43 = vadd.f32 %v4339_v59, %v2140_v2  ;;  %v2095_v47 = vadd.f32 %v2094_v9, %v1869_v48 }
 0x229   : > { %v1871_v8 = vpop.f32.mrf.mxu1 }
 0x22a   : > { %2211 = vst [vmem:[%s4347_s14 + $0xd8] sm:$0xff] %v2179_v43  ;;  %v2242_v40 = vadd.f32 %v2241_v32, %v2179_v43  ;;  %v2281_v60 = vmul.f32 %v2179_v43, %v2179_v43  ;;  %v2141_v11 = vadd.f32 %v2095_v47, %v4328_v49 }
 0x22b   : > { %v1874_v33 = vpop.f32.mrf.mxu1 }
 0x22c   : > { %v2312_v26 = vadd.f32 %v2311_v15, %v2281_v60  ;;  %v2180_v36 = vadd.f32 %v4339_v59, %v2141_v11  ;;  %v2100_v41 = vadd.f32 %v2901_v27, %v1874_v33 }
 0x22d   : > { %v1876_v4 = vpop.f32.mrf.mxu1 }
 0x22e   : > { %2212 = vst [vmem:[%s4347_s14 + $0xe0] sm:$0xff] %v2180_v36  ;;  %v2243_v39 = vadd.f32 %v2242_v40, %v2180_v36  ;;  %v2282_v21 = vmul.f32 %v2180_v36, %v2180_v36  ;;  %v2142_v16 = vadd.f32 %v2100_v41, %v4325_v17 }
 0x22f   : > { %v1879_v22 = vpop.f32.mrf.mxu1 }
 0x230   : > { %v2313_v14 = vadd.f32 %v2312_v26, %v2282_v21  ;;  %v2181_v53 = vadd.f32 %v4339_v59, %v2142_v16  ;;  %v2105_v18 = vadd.f32 %v2104_v50, %v1879_v22 }
 0x231   : > { %v1881_v49 = vpop.f32.mrf.mxu1 }
 0x232   : > { %2213 = vst [vmem:[%s4347_s14 + $0xe8] sm:$0xff] %v2181_v53  ;;  %v2244_v55 = vadd.f32 %v2243_v39, %v2181_v53  ;;  %v2283_v30 = vmul.f32 %v2181_v53, %v2181_v53  ;;  %v2143_v51 = vadd.f32 %v2105_v18, %v4332_v45 }
 0x233   : > { %v1884_v58 = vpop.f32.mrf.mxu1 }
 0x234   : > { %v2314_v23 = vadd.f32 %v2313_v14, %v2283_v30  ;;  %v2182_v44 = vadd.f32 %v4339_v59, %v2143_v51  ;;  %v2110_v54 = vadd.f32 %v2904_v25, %v1884_v58 }
 0x235   : > { %v1886_v56 = vpop.f32.mrf.mxu1 }
 0x236   : > { %2214 = vst [vmem:[%s4347_s14 + $0xf0] sm:$0xff] %v2182_v44  ;;  %v2245_v17 = vadd.f32 %v2244_v55, %v2182_v44  ;;  %v2284_v42 = vmul.f32 %v2182_v44, %v2182_v44  ;;  %v2144_v3 = vadd.f32 %v2110_v54, %v4330_v20 }
 0x238   : > { %v2315_v28 = vadd.f32 %v2314_v23, %v2284_v42  ;;  %v2183_v31 = vadd.f32 %v4339_v59, %v2144_v3 }
 0x23a   : > { %2215 = vst [vmem:[%s4347_s14 + $0xf8] sm:$0xff] %v2183_v31  ;;  %v2246_v29 = vadd.f32 %v2245_v17, %v2183_v31  ;;  %v2285_v62 = vmul.f32 %v2183_v31, %v2183_v31 }
 0x23c   : > { %v2247_v37 = vrot.slane %v2246_v29, 4  ;;  %v2316_v45 = vadd.f32 %v2315_v28, %v2285_v62 }
 0x23e   : > { %v2248_v5 = vadd.f32 %v2247_v37, %v2246_v29  ;;  %v2317_v61 = vrot.slane %v2316_v45, 4 }
 0x240   : > { %v2249_v12 = vrot.slane %v2248_v5, 2  ;;  %v2318_v52 = vadd.f32 %v2317_v61, %v2316_v45 }
 0x242   : > { %v2250_v0 = vadd.f32 %v2249_v12, %v2248_v5  ;;  %v2319_v34 = vrot.slane %v2318_v52, 2 }
 0x244   : > { %v2251_v38 = vrot.slane %v2250_v0, 1  ;;  %v2320_v35 = vadd.f32 %v2319_v34, %v2318_v52 }
 0x246   : > { %v2252_v20 = vadd.f32 %v2251_v38, %v2250_v0  ;;  %v2321_v59 = vrot.slane %v2320_v35, 1 }
 0x248   : > { %2253 = vst [vmem:[%s208_s20] sm:$0x1] %v2252_v20  ;;  %v2322_v7 = vadd.f32 %v2321_v59, %v2320_v35 }
 0x24a   : > { %2323 = vst [vmem:[%s208_s20 + $0x1] sm:$0x1] %v2322_v7 }
 0x24b PF: > { %s15_s15 = sadd.s32 1, %s2924_s15  }
 0x24c   : > { %p12_p4 = scmp.ge.s32.totalorder %s15_s15, 4  }
 0x24e   :  { %14 = sbr.rel (!%p12_p4) target bundleno = 1 (0x1), region = 78 }

// kernel: residual_forward.4
= control target key start
LH: loop header
LB: loop body
LE: loop exit
PB: predicated region body
PF: predicated region fallthrough
CT: control target
= control target key end

     0   :  { %s3179_s24 = smov 0   ;;  %s4746_s0 = inlined_call_operand.vmem [shape: f32[2,16,16,128], index: 0, kind: input, shape index: {}]   ;;  %s4747_s1 = inlined_call_operand.vmem [shape: f32[2,2,128], index: 1, kind: input, shape index: {}]   ;;  %s4748_s2 = inlined_call_operand.vmem [shape: f32[1,128], index: 2, kind: input, shape index: {}]   ;;  %s4749_s3 = inlined_call_operand.vmem [shape: f32[1,128], index: 3, kind: input, shape index: {}]   ;;  %s4750_s4 = inlined_call_operand.vmem [shape: f32[3,384,128], index: 4, kind: input, shape index: {}]   ;;  %s4751_s5 = inlined_call_operand.vmem [shape: f32[1,128], index: 5, kind: input, shape index: {}]   ;;  %s4752_s6 = inlined_call_operand.vmem [shape: f32[2,16,16,128], index: 6, kind: output, shape index: {0}]   ;;  %s4753_s7 = inlined_call_operand.vmem [shape: f32[2,2,128], index: 7, kind: output, shape index: {1}]  }
   0x1 LB: > { %s2621_s25 = sadd.s32 4294967295, %s3136_s24   ;;  %p2625_p0 = scmp.ge.s32.totalorder %s3136_s24, 1  ;;  %s3136_s24 = sphi %s3179_s24, %s18_s24  }
   0x2   : > { %p240_p1 = scmp.lt.s32.totalorder %s3136_s24, 3 }
   0x4   : > { %p241_p2 = pnand %p2625_p0, %p240_p1 }
   0x5   : > { %p3357_p3 = scmp.lt.s32.totalorder (!%p241_p2), %s2621_s25, 1 }
   0x6   : > { %244 = sbr.rel (%p241_p2) target bundleno = 601 (0x259), region = 44 }
   0xb   : > { %v2646_v0 = vld [vmem:[%s4750_s4 + $0x1f8] sm:$0xff]  ;;  %v3138_v1 = vmov 0.0   ;;  %v2645_v2 = vld [vmem:[%s4750_s4 + $0x1f0] sm:$0xff]  ;;  %v2644_v4 = vld [vmem:[%s4750_s4 + $0x1e8] sm:$0xff]  ;;  %vm292_vm0 = vcmask 1040384   ;;  %s4756_s25 = smov (!%p3357_p3, %s2621_s25), 1  ;;  %v345_v47 = vlaneseq }
   0xc   : > { %828 = vmatprep.subr.mxu0 %v3138_v1  ;;  %452 = vst [vmem:[#allocation2] sm:$0xff] %v3138_v1  ;;  %453 = vst [vmem:[#allocation2 + $0x8] sm:$0xff] %v3138_v1  ;;  %v2678_v3 = vld [vmem:[%s4750_s4 + $0x2f8] sm:$0xff]  ;;  %v2677_v5 = vld [vmem:[%s4750_s4 + $0x2f0] sm:$0xff]  ;;  %s2730_s17 = sshll.u32 %s4756_s25, 8 }
   0xd   : > { %454 = vst [vmem:[#allocation2 + $0x10] sm:$0x3] %v3138_v1  ;;  %455 = vst [vmem:[#allocation2 + $0x18] sm:$0xff] %v3138_v1  ;;  %829 = vmatpush1.msra.mxu0 %v2646_v0  ;;  %2876 = vmatprep.subr.mxu1 %v2678_v3  ;;  %v2676_v6 = vld [vmem:[%s4750_s4 + $0x2e8] sm:$0xff]  ;;  %v2643_v7 = vld [vmem:[%s4750_s4 + $0x1e0] sm:$0xff]  ;;  %v346_v51 = vshrl.u32 %v345_v47, 7  ;;  %s3403_s22 = scalar_lea.vmem %s4746_s0, %s2730_s17  ;;  %s4642_s9 = scalar_lea.vmem %s4752_s6, %s2730_s17 }
   0xe   : > { %456 = vst [vmem:[#allocation2 + $0x20] sm:$0xff] %v3138_v1  ;;  %457 = vst [vmem:[#allocation2 + $0x28] sm:$0x3] %v3138_v1  ;;  %830 = vmatprep.subr.mxu0 %v3138_v1  ;;  %2877 = vmatpush3.msra.mxu1 %v2678_v3  ;;  %v2675_v8 = vld [vmem:[%s4750_s4 + $0x2e0] sm:$0xff]  ;;  %v2642_v9 = vld [vmem:[%s4750_s4 + $0x1d8] sm:$0xff]  ;;  %s2630_s17 = sshll.u32 %s4756_s25, 1 }
   0xf   : > { %458 = vst [vmem:[#allocation2 + $0x30] sm:$0xff] %v3138_v1  ;;  %459 = vst [vmem:[#allocation2 + $0x38] sm:$0xff] %v3138_v1  ;;  %831 = vmatpush1.msra.mxu0 %v2645_v2  ;;  %2878 = vmatprep.subr.mxu1 %v2677_v5  ;;  %v2674_v10 = vld [vmem:[%s4750_s4 + $0x2d8] sm:$0xff]  ;;  %v2641_v11 = vld [vmem:[%s4750_s4 + $0x1d0] sm:$0xff]  ;;  %v347_v55 = vsub.s32 0, %v346_v51  ;;  %s289_s12 = scalar_lea.vmem %s4753_s7, %s2630_s17 }
  0x10   : > { %460 = vst [vmem:[#allocation2 + $0x40] sm:$0x3] %v3138_v1  ;;  %461 = vst [vmem:[#allocation2 + $0x48] sm:$0xff] %v3138_v1  ;;  %832 = vmatprep.subr.mxu0 %v3138_v1  ;;  %2879 = vmatpush3.msra.mxu1 %v2677_v5  ;;  %v2673_v12 = vld [vmem:[%s4750_s4 + $0x2d0] sm:$0xff]  ;;  %v2640_v13 = vld [vmem:[%s4750_s4 + $0x1c8] sm:$0xff] }
  0x11   : > { %462 = vst [vmem:[#allocation2 + $0x50] sm:$0xff] %v3138_v1  ;;  %463 = vst [vmem:[#allocation2 + $0x58] sm:$0x3] %v3138_v1  ;;  %833 = vmatpush1.msra.mxu0 %v2644_v4  ;;  %2880 = vmatprep.subr.mxu1 %v2676_v6  ;;  %v2639_v14 = vld [vmem:[%s4750_s4 + $0x1c0] sm:$0xff]  ;;  %v2672_v15 = vld [vmem:[%s4750_s4 + $0x2c8] sm:$0xff] }
  0x12   : > { %464 = vst [vmem:[#allocation2 + $0x60] sm:$0xff] %v3138_v1  ;;  %465 = vst [vmem:[#allocation2 + $0x68] sm:$0xff] %v3138_v1  ;;  %834 = vmatprep.subr.mxu0 %v3138_v1  ;;  %2881 = vmatpush3.msra.mxu1 %v2676_v6  ;;  %v290_v16 = vld [vmem:[%s4747_s1] sm:$0x1]  ;;  %v291_v17 = vld [vmem:[%s4747_s1 + $0x2] sm:$0x1] }
  0x13   : > { %466 = vst [vmem:[#allocation2 + $0x70] sm:$0x3] %v3138_v1  ;;  %467 = vst [vmem:[#allocation2 + $0x78] sm:$0xff] %v3138_v1  ;;  %835 = vmatpush1.msra.mxu0 %v2643_v7  ;;  %2882 = vmatprep.subr.mxu1 %v2675_v8  ;;  %v296_v18 = vld [vmem:[%s4747_s1 + $0x1] sm:$0x1]  ;;  %v293_v20 = vsel %vm292_vm0, %v290_v16, 0.0 }
  0x14   : > { %468 = vst [vmem:[#allocation2 + $0x80] sm:$0xff] %v3138_v1  ;;  %469 = vst [vmem:[#allocation2 + $0x88] sm:$0x3] %v3138_v1  ;;  %836 = vmatprep.subr.mxu0 %v3138_v1  ;;  %2883 = vmatpush3.msra.mxu1 %v2675_v8  ;;  %v2671_v19 = vld [vmem:[%s4750_s4 + $0x2c0] sm:$0xff]  ;;  %v294_v21 = vsel %vm292_vm0, %v291_v17, 0.0  ;;  %v298_v23 = vsel %vm292_vm0, %v296_v18, 0.0 }
  0x15   : > { %470 = vst [vmem:[#allocation2 + $0x90] sm:$0xff] %v3138_v1  ;;  %471 = vst [vmem:[#allocation2 + $0x98] sm:$0xff] %v3138_v1  ;;  %837 = vmatpush1.msra.mxu0 %v2642_v9  ;;  %2884 = vmatprep.subr.mxu1 %v2674_v10  ;;  %v297_v22 = vld [vmem:[%s4747_s1 + $0x3] sm:$0x1]  ;;  %v2638_v24 = vld [vmem:[%s4750_s4 + $0x1b8] sm:$0xff]  ;;  %v295_v25 = vadd.f32 %v294_v21, %v293_v20 }
  0x16   : > { %472 = vst [vmem:[#allocation2 + $0xa0] sm:$0x3] %v3138_v1  ;;  %473 = vst [vmem:[#allocation2 + $0xa8] sm:$0xff] %v3138_v1  ;;  %838 = vmatprep.subr.mxu0 %v3138_v1  ;;  %2885 = vmatpush3.msra.mxu1 %v2674_v10  ;;  %v299_v26 = vsel %vm292_vm0, %v297_v22, 0.0  ;;  %v2670_v27 = vld [vmem:[%s4750_s4 + $0x2b8] sm:$0xff]  ;;  %v2637_v29 = vld [vmem:[%s4750_s4 + $0x1b0] sm:$0xff] }
  0x17   : > { %474 = vst [vmem:[#allocation2 + $0xb0] sm:$0xff] %v3138_v1  ;;  %475 = vst [vmem:[#allocation2 + $0xb8] sm:$0x3] %v3138_v1  ;;  %839 = vmatpush1.msra.mxu0 %v2641_v11  ;;  %2886 = vmatprep.subr.mxu1 %v2673_v12  ;;  %v300_v28 = vadd.f32 %v299_v26, %v298_v23  ;;  %v3323_v30 = vmul.f32 0.001953125, %v295_v25  ;;  %v2669_v31 = vld [vmem:[%s4750_s4 + $0x2b0] sm:$0xff]  ;;  %v2636_v33 = vld [vmem:[%s4750_s4 + $0x1a8] sm:$0xff] }
  0x18   : > { %476 = vst [vmem:[#allocation2 + $0xc0] sm:$0xff] %v3138_v1  ;;  %477 = vst [vmem:[#allocation2 + $0xc8] sm:$0xff] %v3138_v1  ;;  %840 = vmatprep.subr.mxu0 %v3138_v1  ;;  %2887 = vmatpush3.msra.mxu1 %v2673_v12  ;;  %v2668_v35 = vld [vmem:[%s4750_s4 + $0x2a8] sm:$0xff]  ;;  %v2635_v36 = vld [vmem:[%s4750_s4 + $0x1a0] sm:$0xff] }
  0x19   : > { %478 = vst [vmem:[#allocation2 + $0xd0] sm:$0x3] %v3138_v1  ;;  %479 = vst [vmem:[#allocation2 + $0xd8] sm:$0xff] %v3138_v1  ;;  %841 = vmatpush1.msra.mxu0 %v2640_v13  ;;  %2888 = vmatprep.subr.mxu1 %v2672_v15  ;;  %v302_v32 = vmul.f32 0.001953125, %v300_v28  ;;  %v303_v34 = vmul.f32 %v3323_v30, %v3323_v30  ;;  %v2667_v38 = vld [vmem:[%s4750_s4 + $0x2a0] sm:$0xff]  ;;  %v2634_v39 = vld [vmem:[%s4750_s4 + $0x198] sm:$0xff] }
  0x1a   : > { %480 = vst [vmem:[#allocation2 + $0xe0] sm:$0xff] %v3138_v1  ;;  %481 = vst [vmem:[#allocation2 + $0xe8] sm:$0x3] %v3138_v1  ;;  %842 = vmatprep.subr.mxu0 %v3138_v1  ;;  %2889 = vmatpush3.msra.mxu1 %v2672_v15  ;;  %v2666_v41 = vld [vmem:[%s4750_s4 + $0x298] sm:$0xff]  ;;  %v2633_v42 = vld [vmem:[%s4750_s4 + $0x190] sm:$0xff] }
  0x1b   : > { %482 = vst [vmem:[#allocation2 + $0xf0] sm:$0xff] %v3138_v1  ;;  %483 = vst [vmem:[#allocation2 + $0xf8] sm:$0xff] %v3138_v1  ;;  %843 = vmatpush1.msra.mxu0 %v2639_v14  ;;  %2890 = vmatprep.subr.mxu1 %v2671_v19  ;;  %v304_v37 = vsub.f32 %v302_v32, %v303_v34  ;;  %v2665_v43 = vld [vmem:[%s4750_s4 + $0x290] sm:$0xff]  ;;  %v2632_v44 = vld [vmem:[%s4750_s4 + $0x188] sm:$0xff] }
  0x1c   : > { %484 = vst [vmem:[#allocation2 + $0x100] sm:$0x3] %v3138_v1  ;;  %485 = vst [vmem:[#allocation2 + $0x108] sm:$0xff] %v3138_v1  ;;  %844 = vmatprep.subr.mxu0 %v3138_v1  ;;  %2891 = vmatpush3.msra.mxu1 %v2671_v19  ;;  %v2664_v45 = vld [vmem:[%s4750_s4 + $0x288] sm:$0xff]  ;;  %v2631_v46 = vld [vmem:[%s4750_s4 + $0x180] sm:$0xff] }
  0x1d   : > { %486 = vst [vmem:[#allocation2 + $0x110] sm:$0xff] %v3138_v1  ;;  %487 = vst [vmem:[#allocation2 + $0x118] sm:$0x3] %v3138_v1  ;;  %845 = vmatpush1.msra.mxu0 %v2638_v24  ;;  %2892 = vmatprep.subr.mxu1 %v2670_v27  ;;  %v306_v40 = vadd.f32 1e-05, %v304_v37  ;;  %v2663_v48 = vld [vmem:[%s4750_s4 + $0x280] sm:$0xff] }
  0x1e   : > { %488 = vst [vmem:[#allocation2 + $0x120] sm:$0xff] %v3138_v1  ;;  %489 = vst [vmem:[#allocation2 + $0x128] sm:$0xff] %v3138_v1  ;;  %846 = vmatprep.subr.mxu0 %v3138_v1  ;;  %2893 = vmatpush3.msra.mxu1 %v2670_v27  ;;  %v2662_v49 = vld [vmem:[%s4750_s4 + $0x278] sm:$0xff]  ;;  %v2661_v50 = vld [vmem:[%s4750_s4 + $0x270] sm:$0xff] }
  0x1f   : > { %490 = vst [vmem:[#allocation2 + $0x130] sm:$0x3] %v3138_v1  ;;  %491 = vst [vmem:[#allocation2 + $0x138] sm:$0xff] %v3138_v1  ;;  %847 = vmatpush1.msra.mxu0 %v2637_v29  ;;  %2894 = vmatprep.subr.mxu1 %v2669_v31  ;;  %3125 = vrsqrt.f32 %v306_v40  ;;  %v2660_v52 = vld [vmem:[%s4750_s4 + $0x268] sm:$0xff]  ;;  %v305_v53 = vld [vmem:[%s4748_s2] sm:$0x1] }
  0x20   : > { %492 = vst [vmem:[#allocation2 + $0x140] sm:$0xff] %v3138_v1  ;;  %493 = vst [vmem:[#allocation2 + $0x148] sm:$0x3] %v3138_v1  ;;  %848 = vmatprep.subr.mxu0 %v3138_v1  ;;  %2895 = vmatpush3.msra.mxu1 %v2669_v31  ;;  %v2659_v54 = vld [vmem:[%s4750_s4 + $0x260] sm:$0xff]  ;;  %v2658_v57 = vld [vmem:[%s4750_s4 + $0x258] sm:$0xff] }
  0x21   : > { %494 = vst [vmem:[#allocation2 + $0x150] sm:$0xff] %v3138_v1  ;;  %495 = vst [vmem:[#allocation2 + $0x158] sm:$0xff] %v3138_v1  ;;  %849 = vmatpush1.msra.mxu0 %v2636_v33  ;;  %2896 = vmatprep.subr.mxu1 %v2668_v35  ;;  %v2657_v58 = vld [vmem:[%s4750_s4 + $0x250] sm:$0xff]  ;;  %v309_v60 = vld [vmem:[%s4749_s3] sm:$0x1] }
  0x22   : > { %496 = vst [vmem:[#allocation2 + $0x160] sm:$0x3] %v3138_v1  ;;  %497 = vst [vmem:[#allocation2 + $0x168] sm:$0xff] %v3138_v1  ;;  %850 = vmatprep.subr.mxu0 %v3138_v1  ;;  %2897 = vmatpush3.msra.mxu1 %v2668_v35  ;;  %v312_v61 = vld [vmem:[%s3403_s22] sm:$0xff]  ;;  %v313_v62 = vld [vmem:[%s3403_s22 + $0x8] sm:$0xff] }
  0x23   : > { %498 = vst [vmem:[#allocation2 + $0x170] sm:$0xff] %v3138_v1  ;;  %499 = vst [vmem:[#allocation2 + $0x178] sm:$0x3] %v3138_v1  ;;  %851 = vmatpush1.msra.mxu0 %v2635_v36  ;;  %2898 = vmatprep.subr.mxu1 %v2667_v38  ;;  %v314_v63 = vld [vmem:[%s3403_s22 + $0x10] sm:$0xff]  ;;  %v315_v0 = vld [vmem:[%s3403_s22 + $0x18] sm:$0xff] }
  0x24   : > { %500 = vst [vmem:[#allocation2 + $0x180] sm:$0xff] %v3138_v1  ;;  %501 = vst [vmem:[#allocation2 + $0x188] sm:$0xff] %v3138_v1  ;;  %852 = vmatprep.subr.mxu0 %v3138_v1  ;;  %2899 = vmatpush3.msra.mxu1 %v2667_v38  ;;  %v316_v2 = vld [vmem:[%s3403_s22 + $0x20] sm:$0xff]  ;;  %v2656_v3 = vld [vmem:[%s4750_s4 + $0x248] sm:$0xff] }
  0x25   : > { %502 = vst [vmem:[#allocation2 + $0x190] sm:$0x3] %v3138_v1  ;;  %503 = vst [vmem:[#allocation2 + $0x198] sm:$0xff] %v3138_v1  ;;  %853 = vmatpush1.msra.mxu0 %v2634_v39  ;;  %2900 = vmatprep.subr.mxu1 %v2666_v41  ;;  %v317_v6 = vld [vmem:[%s3403_s22 + $0x28] sm:$0xff]  ;;  %v318_v7 = vld [vmem:[%s3403_s22 + $0x30] sm:$0xff] }
  0x26   : > { %504 = vst [vmem:[#allocation2 + $0x1a0] sm:$0xff] %v3138_v1  ;;  %505 = vst [vmem:[#allocation2 + $0x1a8] sm:$0x3] %v3138_v1  ;;  %854 = vmatprep.subr.mxu0 %v3138_v1  ;;  %2901 = vmatpush3.msra.mxu1 %v2666_v41  ;;  %v319_v8 = vld [vmem:[%s3403_s22 + $0x38] sm:$0xff]  ;;  %v320_v9 = vld [vmem:[%s3403_s22 + $0x40] sm:$0xff] }
  0x27   : > { %855 = vmatpush1.msra.mxu0 %v2633_v42  ;;  %2902 = vmatprep.subr.mxu1 %v2665_v43  ;;  %v321_v10 = vld [vmem:[%s3403_s22 + $0x48] sm:$0xff]  ;;  %v322_v11 = vld [vmem:[%s3403_s22 + $0x50] sm:$0xff]  ;;  %v323_v16 = vld [vmem:[%s3403_s22 + $0x58] sm:$0xff] }
  0x28   : > { %856 = vmatprep.subr.mxu0 %v3138_v1  ;;  %2903 = vmatpush3.msra.mxu1 %v2665_v43  ;;  %v324_v17 = vld [vmem:[%s3403_s22 + $0x60] sm:$0xff]  ;;  %v325_v18 = vld [vmem:[%s3403_s22 + $0x68] sm:$0xff]  ;;  %v2654_v34 = vld [vmem:[%s4750_s4 + $0x238] sm:$0xff] }
  0x29   : > { %857 = vmatpush1.msra.mxu0 %v2632_v44  ;;  %2904 = vmatprep.subr.mxu1 %v2664_v45  ;;  %v2655_v24 = vld [vmem:[%s4750_s4 + $0x240] sm:$0xff]  ;;  %v327_v51 = vld [vmem:[%s3403_s22 + $0x78] sm:$0xff] }
  0x2a   : > { %858 = vmatprep.subr.mxu0 %v3138_v1  ;;  %2905 = vmatpush3.msra.mxu1 %v2664_v45  ;;  %v2653_v45 = vld [vmem:[%s4750_s4 + $0x230] sm:$0xff] }
  0x2b   : > { %859 = vmatpush1.msra.mxu0 %v2631_v46  ;;  %2906 = vmatprep.subr.mxu1 %v2663_v48  ;;  %v326_v46 = vld [vmem:[%s3403_s22 + $0x70] sm:$0xff] }
  0x2c   : > { %860 = vmatprep.subr.mxu0 %v3138_v1  ;;  %2907 = vmatpush3.msra.mxu1 %v2663_v48  ;;  %v3126_v56 = vpop.eup %3125 }
  0x2d   : > { %861 = vmatpush2.msra.mxu0 %v2662_v49  ;;  %1278 = vmatprep.subr.mxu1 %v3138_v1  ;;  %v308_v59 = vmul.f32 %v3126_v56, %v305_v53  ;;  %v2651_v53 = vld [vmem:[%s4750_s4 + $0x220] sm:$0xff] }
  0x2e   : > { %862 = vmatprep.subr.mxu0 %v3138_v1 }
  0x2f   : > { %863 = vmatpush2.msra.mxu0 %v2661_v50  ;;  %v310_v4 = vmul.f32 %v308_v59, %v3323_v30  ;;  %v3432_v5 = vrot.slane %v308_v59, %v347_v55 }
  0x30   : > { %864 = vmatprep.subr.mxu0 %v3138_v1 }
  0x31   : > { %865 = vmatpush2.msra.mxu0 %v2660_v52  ;;  %v311_v12 = vsub.f32 %v309_v60, %v310_v4  ;;  %v350_v13 = vmul.f32 %v3432_v5, %v312_v61  ;;  %v351_v14 = vmul.f32 %v3432_v5, %v313_v62  ;;  %v352_v15 = vmul.f32 %v3432_v5, %v314_v63  ;;  %v2652_v52 = vld [vmem:[%s4750_s4 + $0x228] sm:$0xff]  ;;  %v328_v61 = vld [vmem:[%s3403_s22 + $0x80] sm:$0xff]  ;;  %v330_v63 = vld [vmem:[%s3403_s22 + $0x90] sm:$0xff] }
  0x32   : > { %866 = vmatprep.subr.mxu0 %v3138_v1  ;;  %v353_v19 = vmul.f32 %v3432_v5, %v315_v0  ;;  %v354_v20 = vmul.f32 %v3432_v5, %v316_v2  ;;  %v355_v21 = vmul.f32 %v3432_v5, %v317_v6  ;;  %v356_v22 = vmul.f32 %v3432_v5, %v318_v7  ;;  %v329_v62 = vld [vmem:[%s3403_s22 + $0x88] sm:$0xff]  ;;  %v331_v6 = vld [vmem:[%s3403_s22 + $0x98] sm:$0xff]  ;;  %v332_v7 = vld [vmem:[%s3403_s22 + $0xa0] sm:$0xff] }
  0x33   : > { %867 = vmatpush2.msra.mxu0 %v2659_v54  ;;  %v3452_v23 = vrot.slane %v311_v12, %v347_v55  ;;  %v357_v25 = vmul.f32 %v3432_v5, %v319_v8  ;;  %v358_v26 = vmul.f32 %v3432_v5, %v320_v9  ;;  %v359_v27 = vmul.f32 %v3432_v5, %v321_v10  ;;  %v333_v8 = vld [vmem:[%s3403_s22 + $0xa8] sm:$0xff] }
  0x34   : > { %868 = vmatprep.subr.mxu0 %v3138_v1  ;;  %v360_v28 = vmul.f32 %v3432_v5, %v322_v11  ;;  %v361_v29 = vmul.f32 %v3432_v5, %v323_v16  ;;  %v362_v30 = vmul.f32 %v3432_v5, %v324_v17  ;;  %v363_v31 = vmul.f32 %v3432_v5, %v325_v18  ;;  %v334_v18 = vld [vmem:[%s3403_s22 + $0xb0] sm:$0xff] }
  0x35   : > { %869 = vmatpush2.msra.mxu0 %v2658_v57  ;;  %v388_v32 = vadd.f32 %v3452_v23, %v350_v13  ;;  %v389_v33 = vadd.f32 %v3452_v23, %v351_v14  ;;  %v390_v35 = vadd.f32 %v3452_v23, %v352_v15  ;;  %v391_v36 = vadd.f32 %v3452_v23, %v353_v19  ;;  %v2650_v13 = vld [vmem:[%s4750_s4 + $0x218] sm:$0xff] }
  0x36   : > { %870 = vmatprep.subr.mxu0 %v3138_v1  ;;  %v392_v37 = vadd.f32 %v3452_v23, %v354_v20  ;;  %v393_v38 = vadd.f32 %v3452_v23, %v355_v21  ;;  %v394_v39 = vadd.f32 %v3452_v23, %v356_v22  ;;  %v395_v40 = vadd.f32 %v3452_v23, %v357_v25  ;;  %v650_v19 = vld [vmem:[%s4750_s4 + $0x78] sm:$0xff] }
  0x37   : > { %871 = vmatpush2.msra.mxu0 %v2657_v58  ;;  %v3476_v41 = vmax.f32 %v388_v32, 0.0  ;;  %v3478_v42 = vmax.f32 %v389_v33, 0.0  ;;  %v3481_v43 = vmax.f32 %v390_v35, 0.0  ;;  %v3483_v44 = vmax.f32 %v391_v36, 0.0  ;;  %v335_v25 = vld [vmem:[%s3403_s22 + $0xb8] sm:$0xff]  ;;  %v337_v32 = vld [vmem:[%s3403_s22 + $0xc8] sm:$0xff] }
  0x38   : > { %872 = vmatprep.subr.mxu0 %v3138_v1  ;;  %v3489_v47 = vmax.f32 %v392_v37, 0.0  ;;  %v3491_v48 = vmax.f32 %v393_v38, 0.0  ;;  %v3493_v49 = vmax.f32 %v394_v39, 0.0  ;;  %v3495_v50 = vmax.f32 %v395_v40, 0.0 }
  0x39   : > { %873 = vmatpush2.msra.mxu0 %v2656_v3  ;;  %507 = vst [vmem:[#allocation2 + $0x19] sm:$0xff] %v3476_v41  ;;  %508 = vst [vmem:[#allocation2 + $0x21] sm:$0xff] %v3478_v42  ;;  %v396_v54 = vadd.f32 %v3452_v23, %v358_v26  ;;  %v397_v55 = vadd.f32 %v3452_v23, %v359_v27  ;;  %892 = vmatprep.mubr.f32.mxu0 %v3476_v41  ;;  %v2649_v26 = vld [vmem:[%s4750_s4 + $0x210] sm:$0xff] }
  0x3a   : > { %874 = vmatprep.subr.mxu0 %v3138_v1  ;;  %509 = vst [vmem:[#allocation2 + $0x31] sm:$0xff] %v3481_v43  ;;  %510 = vst [vmem:[#allocation2 + $0x39] sm:$0xff] %v3483_v44  ;;  %v398_v56 = vadd.f32 %v3452_v23, %v360_v28  ;;  %v399_v57 = vadd.f32 %v3452_v23, %v361_v29  ;;  %v400_v58 = vadd.f32 %v3452_v23, %v362_v30 }
  0x3b   : > { %875 = vmatpush2.msra.mxu0 %v2655_v24  ;;  %511 = vst [vmem:[#allocation2 + $0x49] sm:$0xff] %v3489_v47  ;;  %512 = vst [vmem:[#allocation2 + $0x51] sm:$0xff] %v3491_v48  ;;  %v401_v59 = vadd.f32 %v3452_v23, %v363_v31  ;;  %v364_v60 = vmul.f32 %v3432_v5, %v326_v46  ;;  %v3525_v0 = vmax.f32 %v396_v54, 0.0  ;;  %v3527_v2 = vmax.f32 %v397_v55, 0.0  ;;  %v336_v31 = vld [vmem:[%s3403_s22 + $0xc0] sm:$0xff]  ;;  %v649_v55 = vld [vmem:[%s4750_s4 + $0x70] sm:$0xff] }
  0x3c   : > { %876 = vmatprep.subr.mxu0 %v3138_v1  ;;  %513 = vst [vmem:[#allocation2 + $0x61] sm:$0xff] %v3493_v49  ;;  %514 = vst [vmem:[#allocation2 + $0x69] sm:$0xff] %v3495_v50  ;;  %v3529_v3 = vmax.f32 %v398_v56, 0.0  ;;  %v365_v4 = vmul.f32 %v3432_v5, %v327_v51  ;;  %v3535_v9 = vmax.f32 %v399_v57, 0.0  ;;  %v3537_v10 = vmax.f32 %v400_v58, 0.0  ;;  %v340_v54 = vld [vmem:[%s3403_s22 + $0xe0] sm:$0xff] }
  0x3d   : > { %877 = vmatpush2.msra.mxu0 %v2654_v34  ;;  %v3539_v11 = vmax.f32 %v401_v59, 0.0  ;;  %v402_v12 = vadd.f32 %v3452_v23, %v364_v60  ;;  %515 = vst [vmem:[#allocation2 + $0x79] sm:$0xff] %v3525_v0  ;;  %516 = vst [vmem:[#allocation2 + $0x81] sm:$0xff] %v3527_v2  ;;  %v366_v15 = vmul.f32 %v3432_v5, %v328_v61  ;;  %v2648_v56 = vld [vmem:[%s4750_s4 + $0x208] sm:$0xff] }
  0x3e   : > { %878 = vmatprep.subr.mxu0 %v3138_v1  ;;  %517 = vst [vmem:[#allocation2 + $0x91] sm:$0xff] %v3529_v3  ;;  %v403_v14 = vadd.f32 %v3452_v23, %v365_v4  ;;  %v367_v16 = vmul.f32 %v3432_v5, %v329_v62  ;;  %v368_v17 = vmul.f32 %v3432_v5, %v330_v63  ;;  %518 = vst [vmem:[#allocation2 + $0x99] sm:$0xff] %v3535_v9  ;;  %v341_v61 = vld [vmem:[%s3403_s22 + $0xe8] sm:$0xff] }
  0x3f   : > { %879 = vmatpush2.msra.mxu0 %v2653_v45  ;;  %519 = vst [vmem:[#allocation2 + $0xa9] sm:$0xff] %v3537_v10  ;;  %520 = vst [vmem:[#allocation2 + $0xb1] sm:$0xff] %v3539_v11  ;;  %v3560_v20 = vmax.f32 %v402_v12, 0.0  ;;  %v369_v21 = vmul.f32 %v3432_v5, %v331_v6  ;;  %v370_v22 = vmul.f32 %v3432_v5, %v332_v7  ;;  %v648_v7 = vld [vmem:[%s4750_s4 + $0x68] sm:$0xff] }
  0x40   : > { %880 = vmatprep.subr.mxu0 %v3138_v1  ;;  %v371_v24 = vmul.f32 %v3432_v5, %v333_v8  ;;  %v3570_v27 = vmax.f32 %v403_v14, 0.0  ;;  %v404_v28 = vadd.f32 %v3452_v23, %v366_v15  ;;  %v405_v29 = vadd.f32 %v3452_v23, %v367_v16  ;;  %v747_v33 = vld [vmem:[#allocation2 + $0x1a] sm:$0xff]  ;;  %v748_v34 = vld [vmem:[#allocation2 + $0x22] sm:$0xff]  ;;  %v342_v16 = vld [vmem:[%s3403_s22 + $0xf0] sm:$0xff] }
  0x41   : > { %881 = vmatpush2.msra.mxu0 %v2652_v52  ;;  %v406_v30 = vadd.f32 %v3452_v23, %v368_v17  ;;  %v749_v35 = vld [vmem:[#allocation2 + $0x32] sm:$0xff]  ;;  %521 = vst [vmem:[#allocation2 + $0xc1] sm:$0xff] %v3560_v20  ;;  %v407_v36 = vadd.f32 %v3452_v23, %v369_v21  ;;  %v408_v37 = vadd.f32 %v3452_v23, %v370_v22  ;;  %v750_v62 = vld [vmem:[#allocation2 + $0x3a] sm:$0xff] }
  0x42   : > { %882 = vmatprep.subr.mxu0 %v3138_v1  ;;  %v409_v38 = vadd.f32 %v3452_v23, %v371_v24  ;;  %v372_v39 = vmul.f32 %v3432_v5, %v334_v18  ;;  %2908 = vmatprep.mubr.f32.mxu1 %v747_v33  ;;  %522 = vst [vmem:[#allocation2 + $0xc9] sm:$0xff] %v3570_v27  ;;  %v3584_v40 = vmax.f32 %v404_v28, 0.0  ;;  %v3586_v45 = vmax.f32 %v405_v29, 0.0  ;;  %v338_v52 = vld [vmem:[%s3403_s22 + $0xd0] sm:$0xff]  ;;  %v343_v22 = vld [vmem:[%s3403_s22 + $0xf8] sm:$0xff]  ;;  %v647_v24 = vld [vmem:[%s4750_s4 + $0x60] sm:$0xff] }
  0x43   : > { %883 = vmatpush2.msra.mxu0 %v2651_v53  ;;  %v3588_v46 = vmax.f32 %v406_v30, 0.0  ;;  %v373_v51 = vmul.f32 %v3432_v5, %v335_v25  ;;  %v339_v53 = vld [vmem:[%s3403_s22 + $0xd8] sm:$0xff]  ;;  %2909 = vmatmul.mubr.f32.vlgmr.msra.gmra.mxu1 %v748_v34  ;;  %v3600_v57 = vmax.f32 %v407_v36, 0.0  ;;  %v3602_v58 = vmax.f32 %v408_v37, 0.0  ;;  %v751_v8 = vld [vmem:[#allocation2 + $0x4a] sm:$0xff]  ;;  %v2647_v25 = vld [vmem:[%s4750_s4 + $0x200] sm:$0xff] }
  0x44   : > { %884 = vmatprep.subr.mxu0 %v3138_v1  ;;  %v3604_v59 = vmax.f32 %v409_v38, 0.0  ;;  %v410_v60 = vadd.f32 %v3452_v23, %v372_v39  ;;  %1279 = vmatpush1.msra.mxu1 %v650_v19  ;;  %523 = vst [vmem:[#allocation2 + $0xd9] sm:$0xff] %v3584_v40  ;;  %524 = vst [vmem:[#allocation2 + $0xe1] sm:$0xff] %v3586_v45  ;;  %v374_v4 = vmul.f32 %v3432_v5, %v336_v31  ;;  %v752_v30 = vld [vmem:[#allocation2 + $0x52] sm:$0xff]  ;;  %v753_v36 = vld [vmem:[#allocation2 + $0x62] sm:$0xff] }
  0x45   : > { %885 = vmatpush2.msra.mxu0 %v2650_v13  ;;  %2911 = vmatprep.mubr.f32.mxu1 %v749_v35  ;;  %525 = vst [vmem:[#allocation2 + $0xf1] sm:$0xff] %v3588_v46  ;;  %v411_v63 = vadd.f32 %v3452_v23, %v373_v51  ;;  %v375_v6 = vmul.f32 %v3432_v5, %v337_v32  ;;  %526 = vst [vmem:[#allocation2 + $0xf9] sm:$0xff] %v3600_v57  ;;  %v646_v35 = vld [vmem:[%s4750_s4 + $0x58] sm:$0xff] }
  0x46   : > { %886 = vmatprep.subr.mxu0 %v3138_v1  ;;  %1280 = vmatprep.subr.mxu1 %v3138_v1  ;;  %527 = vst [vmem:[#allocation2 + $0x109] sm:$0xff] %v3602_v58  ;;  %528 = vst [vmem:[#allocation2 + $0x111] sm:$0xff] %v3604_v59  ;;  %v3622_v12 = vmax.f32 %v410_v60, 0.0  ;;  %v376_v13 = vmul.f32 %v3432_v5, %v338_v52  ;;  %v377_v14 = vmul.f32 %v3432_v5, %v339_v53  ;;  %v3666_v52 = vld [vmem:[#allocation2 + $0x18] sm:$0xff] }
  0x47   : > { %887 = vmatpush2.msra.mxu0 %v2649_v26  ;;  %v378_v15 = vmul.f32 %v3432_v5, %v340_v54  ;;  %1281 = vmatpush1.msra.mxu1 %v649_v55  ;;  %v3628_v17 = vmax.f32 %v411_v63, 0.0  ;;  %v412_v18 = vadd.f32 %v3452_v23, %v374_v4  ;;  %v413_v19 = vadd.f32 %v3452_v23, %v375_v6  ;;  %v3694_v63 = vld [vmem:[#allocation2 + $0x20] sm:$0xff] }
  0x48   : > { %888 = vmatprep.subr.mxu0 %v3138_v1  ;;  %v379_v21 = vmul.f32 %v3432_v5, %v341_v61  ;;  %1282 = vmatprep.subr.mxu1 %v3138_v1  ;;  %529 = vst [vmem:[#allocation2 + $0x121] sm:$0xff] %v3622_v12  ;;  %v414_v26 = vadd.f32 %v3452_v23, %v376_v13  ;;  %v644_v61 = vld [vmem:[%s4750_s4 + $0x48] sm:$0xff]  ;;  %v643_v4 = vld [vmem:[%s4750_s4 + $0x40] sm:$0xff]  ;;  %v3710_v13 = vld [vmem:[#allocation2 + $0x30] sm:$0xff] }
  0x49   : > { %889 = vmatpush2.msra.mxu0 %v2648_v56  ;;  %2912 = vmatmul.mubr.f32.gmra.mxu1 %v750_v62  ;;  %v415_v28 = vadd.f32 %v3452_v23, %v377_v14  ;;  %v416_v29 = vadd.f32 %v3452_v23, %v378_v15  ;;  %530 = vst [vmem:[#allocation2 + $0x129] sm:$0xff] %v3628_v17  ;;  %v3646_v31 = vmax.f32 %v412_v18, 0.0  ;;  %v3648_v32 = vmax.f32 %v413_v19, 0.0  ;;  %v754_v56 = vld [vmem:[#allocation2 + $0x6a] sm:$0xff]  ;;  %v755_v62 = vld [vmem:[#allocation2 + $0x7a] sm:$0xff]  ;;  %v756_v6 = vld [vmem:[#allocation2 + $0x82] sm:$0xff] }
  0x4a   : > { %1283 = vmatpush1.msra.mxu1 %v648_v7  ;;  %2914 = vmatprep.mubr.f32.mxu1 %v751_v8  ;;  %v3651_v33 = vadd.f32 %v3452_v23, %v379_v21  ;;  %v380_v34 = vmul.f32 %v3432_v5, %v342_v16  ;;  %v3659_v37 = vmax.f32 %v414_v26, 0.0  ;;  %v381_v51 = vmul.f32 %v3432_v5, %v343_v22  ;;  %v645_v5 = vld [vmem:[%s4750_s4 + $0x50] sm:$0xff]  ;;  %v642_v7 = vld [vmem:[%s4750_s4 + $0x38] sm:$0xff]  ;;  %v640_v16 = vld [vmem:[%s4750_s4 + $0x28] sm:$0xff] }
  0x4b   : > { %1284 = vmatprep.subr.mxu1 %v3138_v1  ;;  %890 = vmatprep.subr.mxu0 %v3138_v1  ;;  %v3661_v38 = vmax.f32 %v415_v28, 0.0  ;;  %v3663_v39 = vmax.f32 %v416_v29, 0.0  ;;  %531 = vst [vmem:[#allocation2 + $0x139] sm:$0xff] %v3646_v31  ;;  %532 = vst [vmem:[#allocation2 + $0x141] sm:$0xff] %v3648_v32  ;;  %v757_v8 = vld [vmem:[#allocation2 + $0x92] sm:$0xff]  ;;  %v758_v15 = vld [vmem:[#allocation2 + $0x9a] sm:$0xff] }
  0x4c   : > { %1285 = vmatpush1.msra.mxu1 %v647_v24  ;;  %891 = vmatpush2.msra.mxu0 %v2647_v25  ;;  %v449_v53 = vmax.f32 %v3651_v33, 0.0  ;;  %v3672_v54 = vadd.f32 %v3452_v23, %v380_v34  ;;  %533 = vst [vmem:[#allocation2 + $0x151] sm:$0xff] %v3659_v37  ;;  %v3682_v55 = vadd.f32 %v3452_v23, %v381_v51  ;;  %v641_v14 = vld [vmem:[%s4750_s4 + $0x30] sm:$0xff]  ;;  %v3722_v19 = vld [vmem:[#allocation2 + $0x38] sm:$0xff]  ;;  %v639_v21 = vld [vmem:[%s4750_s4 + $0x20] sm:$0xff] }
  0x4d   : > { %1286 = vmatprep.subr.mxu1 %v3138_v1  ;;  %2915 = vmatmul.mubr.f32.gmra.mxu1 %v752_v30  ;;  %534 = vst [vmem:[#allocation2 + $0x159] sm:$0xff] %v3661_v38  ;;  %535 = vst [vmem:[#allocation2 + $0x169] sm:$0xff] %v3663_v39  ;;  %v759_v18 = vld [vmem:[#allocation2 + $0xaa] sm:$0xff]  ;;  %v760_v22 = vld [vmem:[#allocation2 + $0xb2] sm:$0xff] }
  0x4e   : > { %1287 = vmatpush1.msra.mxu1 %v646_v35  ;;  %2917 = vmatprep.mubr.f32.mxu1 %v753_v36  ;;  %536 = vst [vmem:[#allocation2 + $0x171] sm:$0xff] %v449_v53  ;;  %v450_v60 = vmax.f32 %v3672_v54, 0.0  ;;  %v451_v23 = vmax.f32 %v3682_v55, 0.0  ;;  %v638_v24 = vld [vmem:[%s4750_s4 + $0x18] sm:$0xff]  ;;  %v761_v25 = vld [vmem:[#allocation2 + $0xc2] sm:$0xff]  ;;  %v637_v28 = vld [vmem:[%s4750_s4 + $0x10] sm:$0xff] }
  0x4f   : > { %1288 = vmatprep.subr.mxu1 %v3138_v1  ;;  %893 = vmatmul.mubr.f32.vlgmr.msra.gmra.mxu0 %v3666_v52  ;;  %v3734_v26 = vld [vmem:[#allocation2 + $0x48] sm:$0xff]  ;;  %v763_v34 = vld [vmem:[#allocation2 + $0xda] sm:$0xff]  ;;  %v3746_v35 = vld [vmem:[#allocation2 + $0x50] sm:$0xff] }
  0x50   : > { %1289 = vmatpush1.msra.mxu1 %v645_v5  ;;  %897 = vmatprep.mubr.f32.mxu0 %v3478_v42  ;;  %537 = vst [vmem:[#allocation2 + $0x181] sm:$0xff] %v450_v60  ;;  %538 = vst [vmem:[#allocation2 + $0x189] sm:$0xff] %v451_v23  ;;  %v762_v29 = vld [vmem:[#allocation2 + $0xca] sm:$0xff]  ;;  %v635_v36 = vld [vmem:[%s4750_s4] sm:$0xff] }
  0x51   : > { %1290 = vmatprep.subr.mxu1 %v3138_v1  ;;  %2918 = vmatmul.mubr.f32.gmra.mxu1 %v754_v56  ;;  %v636_v30 = vld [vmem:[%s4750_s4 + $0x8] sm:$0xff]  ;;  %v666_v5 = vld [vmem:[%s4750_s4 + $0xf8] sm:$0xff]  ;;  %v2705_v54 = vld [vmem:[%s4750_s4 + $0x3d0] sm:$0xff] }
  0x52   : > { %1291 = vmatpush1.msra.mxu1 %v644_v61  ;;  %2920 = vmatprep.mubr.f32.mxu1 %v755_v62  ;;  %v764_v51 = vld [vmem:[#allocation2 + $0xe2] sm:$0xff]  ;;  %v765_v56 = vld [vmem:[#allocation2 + $0xf2] sm:$0xff] }
  0x53   : > { %1292 = vmatprep.subr.mxu1 %v3138_v1  ;;  %898 = vmatmul.mubr.f32.gmra.mxu0 %v3694_v63  ;;  %v3758_v61 = vld [vmem:[#allocation2 + $0x60] sm:$0xff]  ;;  %v665_v62 = vld [vmem:[%s4750_s4 + $0xf0] sm:$0xff]  ;;  %v2706_v33 = vld [vmem:[%s4750_s4 + $0x3d8] sm:$0xff] }
  0x54   : > { %1293 = vmatpush1.msra.mxu1 %v643_v4  ;;  %902 = vmatprep.mubr.f32.mxu0 %v3481_v43  ;;  %v766_v4 = vld [vmem:[#allocation2 + $0xfa] sm:$0xff]  ;;  %v2704_v55 = vld [vmem:[%s4750_s4 + $0x3c8] sm:$0xff] }
  0x55   : > { %1294 = vmatprep.subr.mxu1 %v3138_v1  ;;  %2921 = vmatmul.mubr.f32.gmra.mxu1 %v756_v6  ;;  %v664_v6 = vld [vmem:[%s4750_s4 + $0xe8] sm:$0xff] }
  0x56   : > { %1295 = vmatpush1.msra.mxu1 %v642_v7  ;;  %2923 = vmatprep.mubr.f32.mxu1 %v757_v8  ;;  %v767_v7 = vld [vmem:[#allocation2 + $0x10a] sm:$0xff] }
  0x57   : > { %1296 = vmatprep.subr.mxu1 %v3138_v1  ;;  %903 = vmatmul.mubr.f32.gmra.mxu0 %v3710_v13  ;;  %v3770_v8 = vld [vmem:[#allocation2 + $0x68] sm:$0xff] }
  0x58   : > { %1297 = vmatpush1.msra.mxu1 %v641_v14  ;;  %907 = vmatprep.mubr.f32.mxu0 %v3483_v44  ;;  %v663_v14 = vld [vmem:[%s4750_s4 + $0xe0] sm:$0xff] }
  0x59   : > { %1298 = vmatprep.subr.mxu1 %v3138_v1  ;;  %2924 = vmatmul.mubr.f32.gmra.mxu1 %v758_v15  ;;  %v768_v15 = vld [vmem:[#allocation2 + $0x112] sm:$0xff] }
  0x5a   : > { %1299 = vmatpush1.msra.mxu1 %v640_v16  ;;  %2926 = vmatprep.mubr.f32.mxu1 %v759_v18  ;;  %v3776_v16 = vld [vmem:[#allocation2] sm:$0xff]  ;;  %v662_v18 = vld [vmem:[%s4750_s4 + $0xd8] sm:$0xff] }
  0x5b   : > { %1300 = vmatprep.subr.mxu1 %v3138_v1  ;;  %908 = vmatmul.mubr.f32.gmra.mxu0 %v3722_v19 }
  0x5c   : > { %1301 = vmatpush1.msra.mxu1 %v639_v21  ;;  %912 = vmatprep.mubr.f32.mxu0 %v3489_v47  ;;  %v769_v21 = vld [vmem:[#allocation2 + $0x122] sm:$0xff] }
  0x5d   : > { %1302 = vmatprep.subr.mxu1 %v3138_v1  ;;  %2927 = vmatmul.mubr.f32.gmra.mxu1 %v760_v22  ;;  %v661_v22 = vld [vmem:[%s4750_s4 + $0xd0] sm:$0xff] }
  0x5e   : > { %1303 = vmatpush1.msra.mxu1 %v638_v24  ;;  %2929 = vmatprep.mubr.f32.mxu1 %v761_v25  ;;  %v770_v24 = vld [vmem:[#allocation2 + $0x12a] sm:$0xff] }
  0x5f   : > { %1304 = vmatprep.subr.mxu1 %v3138_v1  ;;  %913 = vmatmul.mubr.f32.gmra.mxu0 %v3734_v26  ;;  %v660_v25 = vld [vmem:[%s4750_s4 + $0xc8] sm:$0xff] }
  0x60   : > { %1305 = vmatpush1.msra.mxu1 %v637_v28  ;;  %917 = vmatprep.mubr.f32.mxu0 %v3491_v48  ;;  %v771_v28 = vld [vmem:[#allocation2 + $0x13a] sm:$0xff] }
  0x61   : > { %1306 = vmatprep.subr.mxu1 %v3138_v1  ;;  %2930 = vmatmul.mubr.f32.gmra.mxu1 %v762_v29  ;;  %v3796_v29 = vld [vmem:[#allocation2 + $0x80] sm:$0xff] }
  0x62   : > { %1307 = vmatpush1.msra.mxu1 %v636_v30  ;;  %2932 = vmatprep.mubr.f32.mxu1 %v763_v34  ;;  %v659_v30 = vld [vmem:[%s4750_s4 + $0xc0] sm:$0xff] }
  0x63   : > { %1308 = vmatprep.subr.mxu1 %v3138_v1  ;;  %918 = vmatmul.mubr.f32.gmra.mxu0 %v3746_v35  ;;  %v772_v34 = vld [vmem:[#allocation2 + $0x142] sm:$0xff] }
  0x64   : > { %1309 = vmatpush1.msra.mxu1 %v635_v36  ;;  %922 = vmatprep.mubr.f32.mxu0 %v3493_v49  ;;  %v658_v36 = vld [vmem:[%s4750_s4 + $0xb8] sm:$0xff] }
  0x65   : > { %1310 = vmatprep.subr.mxu1 %v3138_v1  ;;  %2933 = vmatmul.mubr.f32.gmra.mxu1 %v764_v51  ;;  %v773_v51 = vld [vmem:[#allocation2 + $0x152] sm:$0xff] }
  0x66   : > { %1311 = vmatpush2.msra.mxu1 %v666_v5  ;;  %2935 = vmatprep.mubr.f32.mxu1 %v765_v56  ;;  %v3808_v5 = vld [vmem:[#allocation2 + $0x90] sm:$0xff] }
  0x67   : > { %1312 = vmatprep.subr.mxu1 %v3138_v1  ;;  %923 = vmatmul.mubr.f32.gmra.mxu0 %v3758_v61  ;;  %v657_v56 = vld [vmem:[%s4750_s4 + $0xb0] sm:$0xff] }
  0x68   : > { %1313 = vmatpush2.msra.mxu1 %v665_v62  ;;  %927 = vmatprep.mubr.f32.mxu0 %v3495_v50  ;;  %v682_v62 = vld [vmem:[%s4750_s4 + $0x178] sm:$0xff] }
  0x69   : > { %1314 = vmatprep.subr.mxu1 %v3138_v1  ;;  %2936 = vmatmul.mubr.f32.gmra.mxu1 %v766_v4  ;;  %v3784_v1 = vld [vmem:[#allocation2 + $0x78] sm:$0xff] }
  0x6a   : > { %1315 = vmatpush2.msra.mxu1 %v664_v6  ;;  %2938 = vmatprep.mubr.f32.mxu1 %v767_v7  ;;  %v774_v4 = vld [vmem:[#allocation2 + $0x15a] sm:$0xff]  ;;  %v656_v6 = vld [vmem:[%s4750_s4 + $0xa8] sm:$0xff] }
  0x6b   : > { %1316 = vmatprep.subr.mxu1 %v3776_v16  ;;  %928 = vmatmul.mubr.f32.gmra.mxu0 %v3770_v8  ;;  %v775_v7 = vld [vmem:[#allocation2 + $0x16a] sm:$0xff] }
  0x6c   : > { %1317 = vmatpush2.msra.mxu1 %v663_v14  ;;  %932 = vmatprep.mubr.f32.mxu0 %v3525_v0  ;;  %v655_v14 = vld [vmem:[%s4750_s4 + $0xa0] sm:$0xff] }
  0x6d   : > { %1318 = vmatprep.subr.mxu1 %v3776_v16  ;;  %2939 = vmatmul.mubr.f32.gmra.mxu1 %v768_v15  ;;  %v776_v15 = vld [vmem:[#allocation2 + $0x172] sm:$0xff] }
  0x6e   : > { %1319 = vmatpush2.msra.mxu1 %v662_v18  ;;  %2941 = vmatprep.mubr.f32.mxu1 %v769_v21  ;;  %v654_v18 = vld [vmem:[%s4750_s4 + $0x98] sm:$0xff]  ;;  %v777_v21 = vld [vmem:[#allocation2 + $0x182] sm:$0xff] }
  0x6f   : > { %1320 = vmatprep.subr.mxu1 %v3776_v16  ;;  %933 = vmatmul.mubr.f32.gmra.mxu0 %v3784_v1 }
  0x70   : > { %1321 = vmatpush2.msra.mxu1 %v661_v22  ;;  %937 = vmatprep.mubr.f32.mxu0 %v3527_v2  ;;  %v3831_v22 = vld [vmem:[#allocation2 + $0x98] sm:$0xff] }
  0x71   : > { %1322 = vmatprep.subr.mxu1 %v3776_v16  ;;  %2942 = vmatmul.mubr.f32.gmra.mxu1 %v770_v24  ;;  %v653_v24 = vld [vmem:[%s4750_s4 + $0x90] sm:$0xff] }
  0x72   : > { %1323 = vmatpush2.msra.mxu1 %v660_v25  ;;  %2944 = vmatprep.mubr.f32.mxu1 %v771_v28  ;;  %v778_v25 = vld [vmem:[#allocation2 + $0x18a] sm:$0xff] }
  0x73   : > { %1324 = vmatprep.subr.mxu1 %v3776_v16  ;;  %938 = vmatmul.mubr.f32.gmra.mxu0 %v3796_v29  ;;  %v652_v28 = vld [vmem:[%s4750_s4 + $0x88] sm:$0xff] }
  0x74   : > { %1325 = vmatpush2.msra.mxu1 %v659_v30  ;;  %942 = vmatprep.mubr.f32.mxu0 %v3529_v3  ;;  %v571_v30 = vld [vmem:[#allocation2 + $0x1] sm:$0xff] }
  0x75   : > { %1326 = vmatprep.subr.mxu1 %v3776_v16  ;;  %2945 = vmatmul.mubr.f32.gmra.mxu1 %v772_v34  ;;  %v3843_v34 = vld [vmem:[#allocation2 + $0xa8] sm:$0xff] }
  0x76   : > { %1327 = vmatpush2.msra.mxu1 %v658_v36  ;;  %2947 = vmatprep.mubr.f32.mxu1 %v773_v51  ;;  %v651_v36 = vld [vmem:[%s4750_s4 + $0x80] sm:$0xff]  ;;  %v681_v51 = vld [vmem:[%s4750_s4 + $0x170] sm:$0xff] }
  0x77   : > { %1328 = vmatprep.subr.mxu1 %v3776_v16  ;;  %943 = vmatmul.mubr.f32.gmra.mxu0 %v3808_v5 }
  0x78   : > { %1329 = vmatpush2.msra.mxu1 %v657_v56  ;;  %2956 = vmatprep.subr.mxu0 %v682_v62  ;;  %v2694_v56 = vld [vmem:[%s4750_s4 + $0x378] sm:$0xff] }
  0x79   : > { %1330 = vmatprep.subr.mxu1 %v3776_v16  ;;  %2948 = vmatmul.mubr.f32.gmra.mxu1 %v774_v4  ;;  %v2693_v4 = vld [vmem:[%s4750_s4 + $0x370] sm:$0xff] }
  0x7a   : > { %1331 = vmatpush2.msra.mxu1 %v656_v6  ;;  %2950 = vmatprep.mubr.f32.mxu1 %v775_v7  ;;  %v3862_v6 = vld [vmem:[#allocation2 + $0xb0] sm:$0xff]  ;;  %v2692_v7 = vld [vmem:[%s4750_s4 + $0x368] sm:$0xff] }
  0x7b   : > { %1332 = vmatprep.subr.mxu1 %v3776_v16  ;;  %2957 = vmatpush3.msra.mxu0 %v682_v62  ;;  %v572_v62 = vld [vmem:[#allocation2 + $0x9] sm:$0xff] }
  0x7c   : > { %1333 = vmatpush2.msra.mxu1 %v655_v14  ;;  %947 = vmatprep.mubr.f32.mxu0 %v3535_v9  ;;  %v680_v14 = vld [vmem:[%s4750_s4 + $0x168] sm:$0xff] }
  0x7d   : > { %1334 = vmatprep.subr.mxu1 %v3776_v16  ;;  %2951 = vmatmul.mubr.f32.gmra.mxu1 %v776_v15  ;;  %v3876_v15 = vld [vmem:[#allocation2 + $0xc0] sm:$0xff] }
  0x7e   : > { %1335 = vmatpush2.msra.mxu1 %v654_v18  ;;  %2953 = vmatprep.mubr.f32.mxu1 %v777_v21  ;;  %v2691_v18 = vld [vmem:[%s4750_s4 + $0x360] sm:$0xff]  ;;  %v3889_v21 = vld [vmem:[#allocation2 + $0xc8] sm:$0xff] }
  0x7f   : > { %1336 = vmatprep.subr.mxu1 %v3776_v16  ;;  %948 = vmatmul.mubr.f32.gmra.mxu0 %v3831_v22 }
  0x80   : > { %1337 = vmatpush2.msra.mxu1 %v653_v24  ;;  %952 = vmatprep.mubr.f32.mxu0 %v3537_v10  ;;  %v2690_v24 = vld [vmem:[%s4750_s4 + $0x358] sm:$0xff] }
  0x81   : > { %1338 = vmatprep.subr.mxu1 %v3776_v16  ;;  %2954 = vmatmul.mubr.f32.gmra.mxu1 %v778_v25  ;;  %v3916_v25 = vld [vmem:[#allocation2 + $0xe0] sm:$0xff] }
  0x82   : > { %1339 = vmatpush2.msra.mxu1 %v652_v28  ;;  %1342 = vmatprep.mubr.f32.mxu1 %v571_v30  ;;  %v3929_v28 = vld [vmem:[#allocation2 + $0xf0] sm:$0xff]  ;;  %v3942_v30 = vld [vmem:[#allocation2 + $0xf8] sm:$0xff] }
  0x83   : > { %1340 = vmatprep.subr.mxu1 %v3776_v16  ;;  %953 = vmatmul.mubr.f32.gmra.mxu0 %v3843_v34 }
  0x84   : > { %1341 = vmatpush2.msra.mxu1 %v651_v36  ;;  %2958 = vmatprep.subr.mxu0 %v681_v51  ;;  %v3955_v36 = vld [vmem:[#allocation2 + $0x108] sm:$0xff] }
  0x85   : > { %1874 = vmatprep.subr.mxu1 %v3776_v16  ;;  %1343 = vmatmul.mubr.f32.vlgmr.msra.gmra.mxu1 %v3776_v16 }
  0x86   : > { %1875 = vmatpush1.msra.mxu1 %v2694_v56  ;;  %1347 = vmatprep.mubr.f32.mxu1 %v572_v62  ;;  %v3981_v56 = vld [vmem:[#allocation2 + $0x120] sm:$0xff]  ;;  %v3994_v62 = vld [vmem:[#allocation2 + $0x128] sm:$0xff] }
  0x87   : > { %1876 = vmatprep.subr.mxu1 %v3776_v16  ;;  %2959 = vmatpush3.msra.mxu0 %v681_v51  ;;  %v3968_v51 = vld [vmem:[#allocation2 + $0x110] sm:$0xff] }
  0x88   : > { %1877 = vmatpush1.msra.mxu1 %v2693_v4  ;;  %957 = vmatprep.mubr.f32.mxu0 %v3539_v11  ;;  %v4007_v4 = vld [vmem:[#allocation2 + $0x138] sm:$0xff] }
  0x89   : > { %1348 = vmatmul.mubr.f32.gmra.mxu1 %v3776_v16  ;;  %958 = vmatmul.mubr.f32.gmra.mxu0 %v3862_v6 }
  0x8a   : > { %1352 = vmatprep.mubr.f32.mxu1 %v3476_v41  ;;  %1878 = vmatprep.subr.mxu1 %v3776_v16  ;;  %v679_v41 = vld [vmem:[%s4750_s4 + $0x160] sm:$0xff] }
  0x8b   : > { %1879 = vmatpush1.msra.mxu1 %v2692_v7  ;;  %962 = vmatprep.mubr.f32.mxu0 %v3560_v20  ;;  %v4020_v7 = vld [vmem:[#allocation2 + $0x140] sm:$0xff] }
  0x8c   : > { %2960 = vmatprep.subr.mxu0 %v680_v14  ;;  %1880 = vmatprep.subr.mxu1 %v3776_v16 }
  0x8d   : > { %1353 = vmatmul.mubr.f32.gmra.mxu1 %v3666_v52  ;;  %963 = vmatmul.mubr.f32.gmra.mxu0 %v3876_v15  ;;  %v3902_v52 = vld [vmem:[#allocation2 + $0xd8] sm:$0xff] }
  0x8e   : > { %1357 = vmatprep.mubr.f32.mxu1 %v3478_v42  ;;  %2961 = vmatpush3.msra.mxu0 %v680_v14  ;;  %v2689_v42 = vld [vmem:[%s4750_s4 + $0x350] sm:$0xff] }
  0x8f   : > { %1881 = vmatpush1.msra.mxu1 %v2691_v18  ;;  %967 = vmatprep.mubr.f32.mxu0 %v3570_v27  ;;  %v4033_v14 = vld [vmem:[#allocation2 + $0x150] sm:$0xff]  ;;  %v4046_v18 = vld [vmem:[#allocation2 + $0x158] sm:$0xff] }
  0x90   : > { %1882 = vmatprep.subr.mxu1 %v3776_v16  ;;  %2962 = vmatprep.subr.mxu0 %v679_v41 }
  0x91   : > { %1358 = vmatmul.mubr.f32.gmra.mxu1 %v3694_v63  ;;  %968 = vmatmul.mubr.f32.gmra.mxu0 %v3889_v21  ;;  %v678_v63 = vld [vmem:[%s4750_s4 + $0x158] sm:$0xff] }
  0x92   : > { %1362 = vmatprep.mubr.f32.mxu1 %v3481_v43  ;;  %1883 = vmatpush1.msra.mxu1 %v2690_v24  ;;  %v2688_v43 = vld [vmem:[%s4750_s4 + $0x348] sm:$0xff]  ;;  %v4073_v24 = vld [vmem:[#allocation2 + $0x170] sm:$0xff] }
  0x93   : > { %972 = vmatprep.mubr.f32.mxu0 %v3584_v40  ;;  %1884 = vmatprep.subr.mxu1 %v3776_v16 }
  0x94   : > { %2963 = vmatpush3.msra.mxu0 %v679_v41  ;;  %1885 = vmatpush1.msra.mxu1 %v2689_v42  ;;  %v4059_v41 = vld [vmem:[#allocation2 + $0x168] sm:$0xff]  ;;  %v2703_v42 = vld [vmem:[%s4750_s4 + $0x3c0] sm:$0xff] }
  0x95   : > { %1363 = vmatmul.mubr.f32.gmra.mxu1 %v3710_v13  ;;  %973 = vmatmul.mubr.f32.gmra.mxu0 %v3902_v52  ;;  %v677_v13 = vld [vmem:[%s4750_s4 + $0x150] sm:$0xff] }
  0x96   : > { %1367 = vmatprep.mubr.f32.mxu1 %v3483_v44  ;;  %977 = vmatprep.mubr.f32.mxu0 %v3586_v45  ;;  %v2687_v44 = vld [vmem:[%s4750_s4 + $0x340] sm:$0xff] }
  0x97   : > { %1886 = vmatprep.subr.mxu1 %v3776_v16  ;;  %2964 = vmatprep.subr.mxu0 %v678_v63 }
  0x98   : > { %1887 = vmatpush1.msra.mxu1 %v2688_v43  ;;  %2965 = vmatpush3.msra.mxu0 %v678_v63  ;;  %v4122_v63 = vld [vmem:[#allocation2 + $0x4a] sm:$0xff]  ;;  %v2702_v43 = vld [vmem:[%s4750_s4 + $0x3b8] sm:$0xff] }
  0x99   : > { %1368 = vmatmul.mubr.f32.gmra.mxu1 %v3722_v19  ;;  %978 = vmatmul.mubr.f32.gmra.mxu0 %v3916_v25  ;;  %v676_v19 = vld [vmem:[%s4750_s4 + $0x148] sm:$0xff] }
  0x9a   : > { %1372 = vmatprep.mubr.f32.mxu1 %v3489_v47  ;;  %982 = vmatprep.mubr.f32.mxu0 %v3588_v46  ;;  %v2686_v47 = vld [vmem:[%s4750_s4 + $0x338] sm:$0xff] }
  0x9b   : > { %1888 = vmatprep.subr.mxu1 %v3776_v16  ;;  %2966 = vmatprep.subr.mxu0 %v677_v13 }
  0x9c   : > { %1889 = vmatpush1.msra.mxu1 %v2687_v44  ;;  %2967 = vmatpush3.msra.mxu0 %v677_v13  ;;  %v4137_v13 = vld [vmem:[#allocation2 + $0x62] sm:$0xff]  ;;  %v2701_v44 = vld [vmem:[%s4750_s4 + $0x3b0] sm:$0xff] }
  0x9d   : > { %1373 = vmatmul.mubr.f32.gmra.mxu1 %v3734_v26  ;;  %983 = vmatmul.mubr.f32.gmra.mxu0 %v3929_v28  ;;  %v675_v26 = vld [vmem:[%s4750_s4 + $0x140] sm:$0xff] }
  0x9e   : > { %1377 = vmatprep.mubr.f32.mxu1 %v3491_v48  ;;  %987 = vmatprep.mubr.f32.mxu0 %v3600_v57  ;;  %v2685_v48 = vld [vmem:[%s4750_s4 + $0x330] sm:$0xff] }
  0x9f   : > { %1890 = vmatprep.subr.mxu1 %v3776_v16  ;;  %2968 = vmatprep.subr.mxu0 %v676_v19 }
  0xa0   : > { %1891 = vmatpush1.msra.mxu1 %v2686_v47  ;;  %2969 = vmatpush3.msra.mxu0 %v676_v19  ;;  %v4152_v19 = vld [vmem:[#allocation2 + $0x7a] sm:$0xff]  ;;  %v2700_v47 = vld [vmem:[%s4750_s4 + $0x3a8] sm:$0xff] }
  0xa1   : > { %1378 = vmatmul.mubr.f32.gmra.mxu1 %v3746_v35  ;;  %988 = vmatmul.mubr.f32.gmra.mxu0 %v3942_v30  ;;  %v674_v35 = vld [vmem:[%s4750_s4 + $0x138] sm:$0xff] }
  0xa2   : > { %1382 = vmatprep.mubr.f32.mxu1 %v3493_v49  ;;  %992 = vmatprep.mubr.f32.mxu0 %v3602_v58  ;;  %v2684_v49 = vld [vmem:[%s4750_s4 + $0x328] sm:$0xff] }
  0xa3   : > { %1892 = vmatprep.subr.mxu1 %v3776_v16  ;;  %2970 = vmatprep.subr.mxu0 %v675_v26 }
  0xa4   : > { %1893 = vmatpush1.msra.mxu1 %v2685_v48  ;;  %2971 = vmatpush3.msra.mxu0 %v675_v26  ;;  %v4167_v26 = vld [vmem:[#allocation2 + $0x92] sm:$0xff]  ;;  %v2699_v48 = vld [vmem:[%s4750_s4 + $0x3a0] sm:$0xff] }
  0xa5   : > { %1383 = vmatmul.mubr.f32.gmra.mxu1 %v3758_v61  ;;  %993 = vmatmul.mubr.f32.gmra.mxu0 %v3955_v36  ;;  %v673_v61 = vld [vmem:[%s4750_s4 + $0x130] sm:$0xff] }
  0xa6   : > { %1387 = vmatprep.mubr.f32.mxu1 %v3495_v50  ;;  %997 = vmatprep.mubr.f32.mxu0 %v3604_v59  ;;  %v2683_v50 = vld [vmem:[%s4750_s4 + $0x320] sm:$0xff] }
  0xa7   : > { %1894 = vmatprep.subr.mxu1 %v3776_v16  ;;  %2972 = vmatprep.subr.mxu0 %v674_v35 }
  0xa8   : > { %1895 = vmatpush1.msra.mxu1 %v2684_v49  ;;  %2973 = vmatpush3.msra.mxu0 %v674_v35  ;;  %v4182_v35 = vld [vmem:[#allocation2 + $0xaa] sm:$0xff]  ;;  %v2698_v49 = vld [vmem:[%s4750_s4 + $0x398] sm:$0xff] }
  0xa9   : > { %1388 = vmatmul.mubr.f32.gmra.mxu1 %v3770_v8  ;;  %998 = vmatmul.mubr.f32.gmra.mxu0 %v3968_v51  ;;  %v672_v8 = vld [vmem:[%s4750_s4 + $0x128] sm:$0xff] }
  0xaa   : > { %1392 = vmatprep.mubr.f32.mxu1 %v3525_v0  ;;  %1002 = vmatprep.mubr.f32.mxu0 %v3622_v12  ;;  %v2682_v0 = vld [vmem:[%s4750_s4 + $0x318] sm:$0xff] }
  0xab   : > { %1896 = vmatprep.subr.mxu1 %v3776_v16  ;;  %2974 = vmatprep.subr.mxu0 %v673_v61 }
  0xac   : > { %1897 = vmatpush1.msra.mxu1 %v2683_v50  ;;  %2975 = vmatpush3.msra.mxu0 %v673_v61  ;;  %v4197_v61 = vld [vmem:[#allocation2 + $0xc2] sm:$0xff]  ;;  %v2697_v50 = vld [vmem:[%s4750_s4 + $0x390] sm:$0xff] }
  0xad   : > { %1393 = vmatmul.mubr.f32.gmra.mxu1 %v3784_v1  ;;  %1003 = vmatmul.mubr.f32.gmra.mxu0 %v3981_v56  ;;  %v671_v1 = vld [vmem:[%s4750_s4 + $0x120] sm:$0xff] }
  0xae   : > { %1397 = vmatprep.mubr.f32.mxu1 %v3527_v2  ;;  %1007 = vmatprep.mubr.f32.mxu0 %v3628_v17  ;;  %v2681_v2 = vld [vmem:[%s4750_s4 + $0x310] sm:$0xff] }
  0xaf   : > { %1898 = vmatprep.subr.mxu1 %v3776_v16  ;;  %2976 = vmatprep.subr.mxu0 %v672_v8 }
  0xb0   : > { %1899 = vmatpush1.msra.mxu1 %v2682_v0  ;;  %2977 = vmatpush3.msra.mxu0 %v672_v8  ;;  %v4212_v8 = vld [vmem:[#allocation2 + $0xda] sm:$0xff]  ;;  %v2696_v0 = vld [vmem:[%s4750_s4 + $0x388] sm:$0xff] }
  0xb1   : > { %1398 = vmatmul.mubr.f32.gmra.mxu1 %v3796_v29  ;;  %1008 = vmatmul.mubr.f32.gmra.mxu0 %v3994_v62  ;;  %v670_v29 = vld [vmem:[%s4750_s4 + $0x118] sm:$0xff] }
  0xb2   : > { %1402 = vmatprep.mubr.f32.mxu1 %v3529_v3  ;;  %1012 = vmatprep.mubr.f32.mxu0 %v3646_v31  ;;  %v2680_v3 = vld [vmem:[%s4750_s4 + $0x308] sm:$0xff] }
  0xb3   : > { %1900 = vmatprep.subr.mxu1 %v3776_v16  ;;  %2978 = vmatprep.subr.mxu0 %v671_v1 }
  0xb4   : > { %1901 = vmatpush1.msra.mxu1 %v2681_v2  ;;  %2979 = vmatpush3.msra.mxu0 %v671_v1  ;;  %v4227_v1 = vld [vmem:[#allocation2 + $0xf2] sm:$0xff]  ;;  %v2695_v2 = vld [vmem:[%s4750_s4 + $0x380] sm:$0xff] }
  0xb5   : > { %1403 = vmatmul.mubr.f32.gmra.mxu1 %v3808_v5  ;;  %1013 = vmatmul.mubr.f32.gmra.mxu0 %v4007_v4  ;;  %v669_v5 = vld [vmem:[%s4750_s4 + $0x110] sm:$0xff] }
  0xb6   : > { %1407 = vmatprep.mubr.f32.mxu1 %v3535_v9  ;;  %1017 = vmatprep.mubr.f32.mxu0 %v3648_v32  ;;  %v2679_v9 = vld [vmem:[%s4750_s4 + $0x300] sm:$0xff] }
  0xb7   : > { %1902 = vmatprep.subr.mxu1 %v3776_v16  ;;  %2980 = vmatprep.subr.mxu0 %v670_v29 }
  0xb8   : > { %1903 = vmatpush1.msra.mxu1 %v2680_v3  ;;  %2981 = vmatpush3.msra.mxu0 %v670_v29  ;;  %v4242_v29 = vld [vmem:[#allocation2 + $0x10a] sm:$0xff]  ;;  %v2715_v3 = vld [vmem:[%s4750_s4 + $0x420] sm:$0xff] }
  0xb9   : > { %1408 = vmatmul.mubr.f32.gmra.mxu1 %v3831_v22  ;;  %1018 = vmatmul.mubr.f32.gmra.mxu0 %v4020_v7  ;;  %v668_v22 = vld [vmem:[%s4750_s4 + $0x108] sm:$0xff] }
  0xba   : > { %1412 = vmatprep.mubr.f32.mxu1 %v3537_v10  ;;  %1022 = vmatprep.mubr.f32.mxu0 %v3659_v37  ;;  %v2710_v10 = vld [vmem:[%s4750_s4 + $0x3f8] sm:$0xff] }
  0xbb   : > { %1904 = vmatprep.subr.mxu1 %v3776_v16  ;;  %2982 = vmatprep.subr.mxu0 %v669_v5 }
  0xbc   : > { %1905 = vmatpush1.msra.mxu1 %v2679_v9  ;;  %2983 = vmatpush3.msra.mxu0 %v669_v5  ;;  %v4252_v5 = vld [vmem:[#allocation2 + $0x122] sm:$0xff]  ;;  %v2714_v9 = vld [vmem:[%s4750_s4 + $0x418] sm:$0xff] }
  0xbd   : > { %1413 = vmatmul.mubr.f32.gmra.mxu1 %v3843_v34  ;;  %1023 = vmatmul.mubr.f32.gmra.mxu0 %v4033_v14  ;;  %v667_v34 = vld [vmem:[%s4750_s4 + $0x100] sm:$0xff] }
  0xbe   : > { %1417 = vmatprep.mubr.f32.mxu1 %v3539_v11  ;;  %1027 = vmatprep.mubr.f32.mxu0 %v3661_v38  ;;  %v2709_v11 = vld [vmem:[%s4750_s4 + $0x3f0] sm:$0xff] }
  0xbf   : > { %1906 = vmatprep.subr.mxu1 %v3776_v16  ;;  %2984 = vmatprep.subr.mxu0 %v668_v22 }
  0xc0   : > { %1907 = vmatpush2.msra.mxu1 %v2710_v10  ;;  %2985 = vmatpush3.msra.mxu0 %v668_v22  ;;  %v4260_v22 = vld [vmem:[#allocation2 + $0x12a] sm:$0xff]  ;;  %v1762_v10 = vld [vmem:[#allocation2 + $0x39] sm:$0xff] }
  0xc1   : > { %1418 = vmatmul.mubr.f32.gmra.mxu1 %v3862_v6  ;;  %1028 = vmatmul.mubr.f32.gmra.mxu0 %v4046_v18  ;;  %v2726_v6 = vld [vmem:[%s4750_s4 + $0x478] sm:$0xff] }
  0xc2   : > { %1422 = vmatprep.mubr.f32.mxu1 %v3560_v20  ;;  %1032 = vmatprep.mubr.f32.mxu0 %v3663_v39  ;;  %v2708_v20 = vld [vmem:[%s4750_s4 + $0x3e8] sm:$0xff] }
  0xc3   : > { %1908 = vmatprep.subr.mxu1 %v3776_v16  ;;  %2986 = vmatprep.subr.mxu0 %v667_v34 }
  0xc4   : > { %1909 = vmatpush2.msra.mxu1 %v2709_v11  ;;  %2987 = vmatpush3.msra.mxu0 %v667_v34  ;;  %v2713_v11 = vld [vmem:[%s4750_s4 + $0x410] sm:$0xff] }
  0xc5   : > { %1423 = vmatmul.mubr.f32.gmra.mxu1 %v3876_v15  ;;  %1033 = vmatmul.mubr.f32.gmra.mxu0 %v4059_v41  ;;  %v2707_v15 = vld [vmem:[%s4750_s4 + $0x3e0] sm:$0xff] }
  0xc6   : > { %1427 = vmatprep.mubr.f32.mxu1 %v3570_v27  ;;  %1037 = vmatprep.mubr.f32.mxu0 %v449_v53  ;;  %v713_v27 = vld [vmem:[#allocation2 + $0x180] sm:$0xff] }
  0xc7   : > { %1910 = vmatprep.subr.mxu1 %v3776_v16  ;;  %3036 = vmatprep.subr.mxu0 %v2726_v6  ;;  %v603_v53 = vld [vmem:[#allocation2 + $0x2] sm:$0xff] }
  0xc8   : > { %1911 = vmatpush2.msra.mxu1 %v2708_v20 }
  0xc9   : > { %1428 = vmatmul.mubr.f32.gmra.mxu1 %v3889_v21  ;;  %1038 = vmatmul.mubr.f32.gmra.mxu0 %v4073_v24  ;;  %v4108_v21 = vld [vmem:[#allocation2 + $0x32] sm:$0xff] }
  0xca   : > { %1432 = vmatprep.mubr.f32.mxu1 %v3584_v40  ;;  %1042 = vmatprep.mubr.f32.mxu0 %v450_v60  ;;  %v714_v40 = vld [vmem:[#allocation2 + $0x188] sm:$0xff] }
  0xcb   : > { %1912 = vmatprep.subr.mxu1 %v3776_v16  ;;  %v604_v60 = vld [vmem:[#allocation2 + $0xa] sm:$0xff] }
  0xcc   : > { %1913 = vmatpush2.msra.mxu1 %v2707_v15  ;;  %v4271_v15 = vld [vmem:[#allocation2 + $0x152] sm:$0xff] }
  0xcd   : > { %1433 = vmatmul.mubr.f32.gmra.mxu1 %v3902_v52  ;;  %1043 = vmatmul.mubr.f32.gmra.mxu0 %v713_v27  ;;  %v4119_v52 = vld [vmem:[#allocation2 + $0x3a] sm:$0xff] }
  0xce   : > { %1437 = vmatprep.mubr.f32.mxu1 %v3586_v45  ;;  %1047 = vmatprep.mubr.f32.mxu0 %v451_v23  ;;  %v605_v45 = vld [vmem:[#allocation2 + $0x1a] sm:$0xff]  ;;  %v2725_v23 = vld [vmem:[%s4750_s4 + $0x470] sm:$0xff] }
  0xcf   : > { %1914 = vmatprep.subr.mxu1 %v3776_v16 }
  0xd0   : > { %1915 = vmatpush2.msra.mxu1 %v2706_v33  ;;  %v2712_v33 = vld [vmem:[%s4750_s4 + $0x408] sm:$0xff] }
  0xd1   : > { %1438 = vmatmul.mubr.f32.gmra.mxu1 %v3916_v25  ;;  %1048 = vmatmul.mubr.f32.gmra.mxu0 %v714_v40  ;;  %v4134_v25 = vld [vmem:[#allocation2 + $0x52] sm:$0xff]  ;;  %v1731_v40 = vld [vmem:[#allocation2 + $0x48] sm:$0xff] }
  0xd2   : > { %1442 = vmatprep.mubr.f32.mxu1 %v3588_v46  ;;  %2988 = vmatprep.mubr.f32.mxu0 %v603_v53  ;;  %v606_v46 = vld [vmem:[#allocation2 + $0x22] sm:$0xff]  ;;  %v4278_v53 = vld [vmem:[#allocation2 + $0x15a] sm:$0xff] }
  0xd3   : > { %1916 = vmatprep.subr.mxu1 %v3776_v16 }
  0xd4   : > { %1917 = vmatpush2.msra.mxu1 %v2705_v54 }
  0xd5   : > { %1443 = vmatmul.mubr.f32.gmra.mxu1 %v3929_v28  ;;  %2989 = vmatmul.mubr.f32.vlgmr.msra.gmra.mxu0 %v604_v60  ;;  %v4149_v28 = vld [vmem:[#allocation2 + $0x6a] sm:$0xff] }
  0xd6   : > { %1447 = vmatprep.mubr.f32.mxu1 %v3600_v57  ;;  %2991 = vmatprep.mubr.f32.mxu0 %v605_v45  ;;  %v2724_v57 = vld [vmem:[%s4750_s4 + $0x468] sm:$0xff]  ;;  %v1764_v60 = vld [vmem:[#allocation2 + $0x51] sm:$0xff] }
  0xd7   : > { %1918 = vmatprep.subr.mxu1 %v3776_v16  ;;  %3037 = vmatpush3.msra.mxu0 %v2726_v6  ;;  %v4269_v6 = vld [vmem:[#allocation2 + $0x142] sm:$0xff]  ;;  %v4280_v45 = vld [vmem:[#allocation2 + $0x16a] sm:$0xff] }
  0xd8   : > { %1919 = vmatpush2.msra.mxu1 %v2704_v55  ;;  %3038 = vmatprep.subr.mxu0 %v2725_v23 }
  0xd9   : > { %1448 = vmatmul.mubr.f32.gmra.mxu1 %v3942_v30  ;;  %2992 = vmatmul.mubr.f32.gmra.mxu0 %v606_v46  ;;  %v4164_v30 = vld [vmem:[#allocation2 + $0x82] sm:$0xff]  ;;  %v1732_v46 = vld [vmem:[#allocation2 + $0x50] sm:$0xff] }
  0xda   : > { %1452 = vmatprep.mubr.f32.mxu1 %v3602_v58  ;;  %2994 = vmatprep.mubr.f32.mxu0 %v4108_v21  ;;  %v2723_v58 = vld [vmem:[%s4750_s4 + $0x460] sm:$0xff] }
  0xdb   : > { %1920 = vmatprep.subr.mxu1 %v3776_v16  ;;  %3039 = vmatpush3.msra.mxu0 %v2725_v23  ;;  %v2711_v23 = vld [vmem:[%s4750_s4 + $0x400] sm:$0xff] }
  0xdc   : > { %1921 = vmatpush2.msra.mxu1 %v2703_v42  ;;  %3040 = vmatprep.subr.mxu0 %v2724_v57  ;;  %v4289_v42 = vld [vmem:[#allocation2 + $0x172] sm:$0xff] }
  0xdd   : > { %1453 = vmatmul.mubr.f32.gmra.mxu1 %v3955_v36  ;;  %2995 = vmatmul.mubr.f32.gmra.mxu0 %v4119_v52  ;;  %v4179_v36 = vld [vmem:[#allocation2 + $0x9a] sm:$0xff] }
  0xde   : > { %1457 = vmatprep.mubr.f32.mxu1 %v3604_v59  ;;  %2997 = vmatprep.mubr.f32.mxu0 %v4122_v63  ;;  %v2722_v59 = vld [vmem:[%s4750_s4 + $0x458] sm:$0xff] }
  0xdf   : > { %1922 = vmatprep.subr.mxu1 %v3776_v16  ;;  %3041 = vmatpush3.msra.mxu0 %v2724_v57 }
  0xe0   : > { %1923 = vmatpush2.msra.mxu1 %v2702_v43  ;;  %3042 = vmatprep.subr.mxu0 %v2723_v58  ;;  %v1765_v43 = vld [vmem:[#allocation2 + $0x61] sm:$0xff] }
  0xe1   : > { %1458 = vmatmul.mubr.f32.gmra.mxu1 %v3968_v51  ;;  %2998 = vmatmul.mubr.f32.gmra.mxu0 %v4134_v25  ;;  %v4194_v51 = vld [vmem:[#allocation2 + $0xb2] sm:$0xff] }
  0xe2   : > { %1462 = vmatprep.mubr.f32.mxu1 %v3622_v12  ;;  %3000 = vmatprep.mubr.f32.mxu0 %v4137_v13  ;;  %v2721_v12 = vld [vmem:[%s4750_s4 + $0x450] sm:$0xff] }
  0xe3   : > { %1924 = vmatprep.subr.mxu1 %v3776_v16  ;;  %3043 = vmatpush3.msra.mxu0 %v2723_v58 }
  0xe4   : > { %1925 = vmatpush2.msra.mxu1 %v2701_v44  ;;  %3044 = vmatprep.subr.mxu0 %v2722_v59 }
  0xe5   : > { %1463 = vmatmul.mubr.f32.gmra.mxu1 %v3981_v56  ;;  %3001 = vmatmul.mubr.f32.gmra.mxu0 %v4149_v28  ;;  %v4209_v56 = vld [vmem:[#allocation2 + $0xca] sm:$0xff] }
  0xe6   : > { %1467 = vmatprep.mubr.f32.mxu1 %v3628_v17  ;;  %3003 = vmatprep.mubr.f32.mxu0 %v4152_v19  ;;  %v2720_v17 = vld [vmem:[%s4750_s4 + $0x448] sm:$0xff] }
  0xe7   : > { %1926 = vmatprep.subr.mxu1 %v3776_v16  ;;  %3045 = vmatpush3.msra.mxu0 %v2722_v59 }
  0xe8   : > { %1927 = vmatpush2.msra.mxu1 %v2700_v47  ;;  %3046 = vmatprep.subr.mxu0 %v2721_v12 }
  0xe9   : > { %1468 = vmatmul.mubr.f32.gmra.mxu1 %v3994_v62  ;;  %3004 = vmatmul.mubr.f32.gmra.mxu0 %v4164_v30  ;;  %v4224_v62 = vld [vmem:[#allocation2 + $0xe2] sm:$0xff] }
  0xea   : > { %1472 = vmatprep.mubr.f32.mxu1 %v3646_v31  ;;  %3006 = vmatprep.mubr.f32.mxu0 %v4167_v26  ;;  %v2719_v31 = vld [vmem:[%s4750_s4 + $0x440] sm:$0xff] }
  0xeb   : > { %1928 = vmatprep.subr.mxu1 %v3776_v16  ;;  %3047 = vmatpush3.msra.mxu0 %v2721_v12  ;;  %v1733_v12 = vld [vmem:[#allocation2 + $0x60] sm:$0xff] }
  0xec   : > { %1929 = vmatpush2.msra.mxu1 %v2699_v48  ;;  %3048 = vmatprep.subr.mxu0 %v2720_v17 }
  0xed   : > { %1473 = vmatmul.mubr.f32.gmra.mxu1 %v4007_v4  ;;  %3007 = vmatmul.mubr.f32.gmra.mxu0 %v4179_v36  ;;  %v4239_v4 = vld [vmem:[#allocation2 + $0xfa] sm:$0xff] }
  0xee   : > { %1477 = vmatprep.mubr.f32.mxu1 %v3648_v32  ;;  %3009 = vmatprep.mubr.f32.mxu0 %v4182_v35  ;;  %v2718_v32 = vld [vmem:[%s4750_s4 + $0x438] sm:$0xff] }
  0xef   : > { %1930 = vmatprep.subr.mxu1 %v3776_v16  ;;  %3049 = vmatpush3.msra.mxu0 %v2720_v17  ;;  %v1766_v17 = vld [vmem:[#allocation2 + $0x69] sm:$0xff] }
  0xf0   : > { %1931 = vmatpush2.msra.mxu1 %v2698_v49  ;;  %3050 = vmatprep.subr.mxu0 %v2719_v31 }
  0xf1   : > { %1478 = vmatmul.mubr.f32.gmra.mxu1 %v4020_v7  ;;  %3010 = vmatmul.mubr.f32.gmra.mxu0 %v4194_v51  ;;  %v4250_v7 = vld [vmem:[#allocation2 + $0x112] sm:$0xff] }
  0xf2   : > { %1482 = vmatprep.mubr.f32.mxu1 %v3659_v37  ;;  %3012 = vmatprep.mubr.f32.mxu0 %v4197_v61  ;;  %v2717_v37 = vld [vmem:[%s4750_s4 + $0x430] sm:$0xff] }
  0xf3   : > { %1932 = vmatprep.subr.mxu1 %v3776_v16  ;;  %3051 = vmatpush3.msra.mxu0 %v2719_v31 }
  0xf4   : > { %1933 = vmatpush2.msra.mxu1 %v2697_v50  ;;  %3052 = vmatprep.subr.mxu0 %v2718_v32 }
  0xf5   : > { %1483 = vmatmul.mubr.f32.gmra.mxu1 %v4033_v14  ;;  %3013 = vmatmul.mubr.f32.gmra.mxu0 %v4209_v56  ;;  %v1729_v14 = vld [vmem:[#allocation2 + $0x30] sm:$0xff] }
  0xf6   : > { %1487 = vmatprep.mubr.f32.mxu1 %v3661_v38  ;;  %3015 = vmatprep.mubr.f32.mxu0 %v4212_v8  ;;  %v2716_v38 = vld [vmem:[%s4750_s4 + $0x428] sm:$0xff] }
  0xf7   : > { %1934 = vmatprep.subr.mxu1 %v3776_v16  ;;  %3053 = vmatpush3.msra.mxu0 %v2718_v32 }
  0xf8   : > { %1935 = vmatpush2.msra.mxu1 %v2696_v0  ;;  %3054 = vmatprep.subr.mxu0 %v2717_v37  ;;  %v1734_v0 = vld [vmem:[#allocation2 + $0x68] sm:$0xff] }
  0xf9   : > { %1488 = vmatmul.mubr.f32.gmra.mxu1 %v4046_v18  ;;  %3016 = vmatmul.mubr.f32.gmra.mxu0 %v4224_v62  ;;  %v4262_v18 = vld [vmem:[#allocation2 + $0x13a] sm:$0xff] }
  0xfa   : > { %1492 = vmatprep.mubr.f32.mxu1 %v3663_v39  ;;  %3018 = vmatprep.mubr.f32.mxu0 %v4227_v1  ;;  %v3128_v39 = vld [vmem:[#allocation2 + $0x171] sm:$0xff] }
  0xfb   : > { %1936 = vmatprep.subr.mxu1 %v3776_v16  ;;  %3055 = vmatpush3.msra.mxu0 %v2717_v37  ;;  %v1761_v16 = vld [vmem:[#allocation2 + $0x31] sm:$0xff] }
  0xfc   : > { %1937 = vmatpush2.msra.mxu1 %v2695_v2  ;;  %3056 = vmatprep.subr.mxu0 %v2716_v38  ;;  %v1767_v2 = vld [vmem:[#allocation2 + $0x79] sm:$0xff] }
  0xfd   : > { %1493 = vmatmul.mubr.f32.gmra.mxu1 %v4059_v41  ;;  %3019 = vmatmul.mubr.f32.gmra.mxu0 %v4239_v4  ;;  %v1730_v41 = vld [vmem:[#allocation2 + $0x38] sm:$0xff] }
  0xfe   : > { %1497 = vmatprep.mubr.f32.mxu1 %v3128_v39  ;;  %3021 = vmatprep.mubr.f32.mxu0 %v4242_v29 }
  0xff   : > { %3057 = vmatpush3.msra.mxu0 %v2716_v38 }
 0x100   : > { %3058 = vmatprep.subr.mxu0 %v2715_v3 }
 0x101   : > { %1498 = vmatmul.mubr.f32.gmra.mxu1 %v4073_v24  ;;  %3022 = vmatmul.mubr.f32.gmra.mxu0 %v4250_v7  ;;  %v1763_v24 = vld [vmem:[#allocation2 + $0x49] sm:$0xff] }
 0x102   : > { %1938 = vmatprep.mubr.f32.mxu1 %v1761_v16  ;;  %3024 = vmatprep.mubr.f32.mxu0 %v4252_v5  ;;  %v1735_v16 = vld [vmem:[#allocation2 + $0x78] sm:$0xff] }
 0x103   : > { %3059 = vmatpush3.msra.mxu0 %v2715_v3  ;;  %v2910_v34 = vpop.f32.mrf.mxu1 }
 0x104   : > { %3060 = vmatprep.subr.mxu0 %v2714_v9 }
 0x105   : > { %1939 = vmatmul.mubr.f32.vlgmr.msra.gmra.mxu1 %v1729_v14  ;;  %3025 = vmatmul.mubr.f32.gmra.mxu0 %v4260_v22  ;;  %v1119_v20 = vpop.f32.mrf.mxu1 }
 0x106   : > { %1943 = vmatprep.mubr.f32.mxu1 %v1762_v10  ;;  %3027 = vmatprep.mubr.f32.mxu0 %v4262_v18 }
 0x107   : > { %3061 = vmatpush3.msra.mxu0 %v2714_v9  ;;  %v1768_v9 = vld [vmem:[#allocation2 + $0x81] sm:$0xff] }
 0x108   : > { %3062 = vmatprep.subr.mxu0 %v2713_v11 }
 0x109   : > { %v2913_v27 = vpop.f32.mrf.mxu1  ;;  %1944 = vmatmul.mubr.f32.gmra.mxu1 %v1730_v41  ;;  %3028 = vmatmul.mubr.f32.gmra.mxu0 %v4269_v6  ;;  %v1769_v41 = vld [vmem:[#allocation2 + $0x91] sm:$0xff] }
 0x10a   : > { %1948 = vmatprep.mubr.f32.mxu1 %v1763_v24  ;;  %3030 = vmatprep.mubr.f32.mxu0 %v4271_v15 }
 0x10b   : > { %v1129_v54 = vpop.f32.mrf.mxu1  ;;  %3063 = vmatpush3.msra.mxu0 %v2713_v11  ;;  %v1736_v11 = vld [vmem:[#allocation2 + $0x80] sm:$0xff] }
 0x10c   : > { %3064 = vmatprep.subr.mxu0 %v2712_v33 }
 0x10d   : > { %v4282_v55 = vpop.f32.mrf.mxu1  ;;  %1949 = vmatmul.mubr.f32.gmra.mxu1 %v1731_v40  ;;  %3031 = vmatmul.mubr.f32.gmra.mxu0 %v4278_v53  ;;  %v1770_v40 = vld [vmem:[#allocation2 + $0x99] sm:$0xff] }
 0x10e   : > { %1953 = vmatprep.mubr.f32.mxu1 %v1764_v60  ;;  %3033 = vmatprep.mubr.f32.mxu0 %v4280_v45 }
 0x10f   : > { %v1139_v57 = vpop.f32.mrf.mxu1  ;;  %3065 = vmatpush3.msra.mxu0 %v2712_v33  ;;  %v894_v58 = vpop.f32.mrf.mxu0  ;;  %v1737_v33 = vld [vmem:[#allocation2 + $0x90] sm:$0xff] }
 0x110   : > { %3066 = vmatprep.subr.mxu0 %v2711_v23  ;;  %v4291_v44 = vadd.f32 %v1119_v20, %v894_v58 }
 0x111   : > { %v4293_v59 = vpop.f32.mrf.mxu1  ;;  %1954 = vmatmul.mubr.f32.gmra.mxu1 %v1732_v46  ;;  %3034 = vmatmul.mubr.f32.gmra.mxu0 %v4289_v42  ;;  %v896_v47 = vpop.f32.mrf.mxu0 }
 0x112   : > { %1958 = vmatprep.mubr.f32.mxu1 %v1765_v43  ;;  %3067 = vmatpush3.msra.mxu0 %v2711_v23  ;;  %v1739_v47 = vld [vmem:[#allocation2 + $0xa8] sm:$0xff] }
 0x113   : > { %v1149_v48 = vpop.f32.mrf.mxu1  ;;  %3068 = vmatprep.mubr.f32.mxu0 %v4108_v21  ;;  %v899_v49 = vpop.f32.mrf.mxu0 }
 0x114   : > { %v4297_v31 = vadd.f32 %v2910_v34, %v899_v49 }
 0x115   : > { %v4299_v50 = vpop.f32.mrf.mxu1  ;;  %1959 = vmatmul.mubr.f32.gmra.mxu1 %v1733_v12  ;;  %3069 = vmatmul.mubr.f32.vlgmr.msra.gmra.mxu0 %v4119_v52  ;;  %v901_v32 = vpop.f32.mrf.mxu0  ;;  %v1772_v12 = vld [vmem:[#allocation2 + $0xb1] sm:$0xff] }
 0x116   : > { %1963 = vmatprep.mubr.f32.mxu1 %v1766_v17  ;;  %3071 = vmatprep.mubr.f32.mxu0 %v4122_v63 }
 0x117   : > { %v4303_v37 = vpop.f32.mrf.mxu1  ;;  %v904_v38 = vpop.f32.mrf.mxu0 }
 0x118   : > { %v4305_v3 = vadd.f32 %v1129_v54, %v904_v38 }
 0x119   : > { %v4307_v21 = vpop.f32.mrf.mxu1  ;;  %1964 = vmatmul.mubr.f32.gmra.mxu1 %v1734_v0  ;;  %3072 = vmatmul.mubr.f32.gmra.mxu0 %v4134_v25  ;;  %v906_v39 = vpop.f32.mrf.mxu0 }
 0x11a   : > { %1968 = vmatprep.mubr.f32.mxu1 %v1767_v2  ;;  %3074 = vmatprep.mubr.f32.mxu0 %v4137_v13 }
 0x11b   : > { %v4311_v52 = vpop.f32.mrf.mxu1  ;;  %v909_v63 = vpop.f32.mrf.mxu0 }
 0x11c   : > { %v4313_v14 = vadd.f32 %v2913_v27, %v909_v63 }
 0x11d   : > { %v4315_v10 = vpop.f32.mrf.mxu1  ;;  %1969 = vmatmul.mubr.f32.gmra.mxu1 %v1735_v16  ;;  %3075 = vmatmul.mubr.f32.gmra.mxu0 %v4149_v28  ;;  %v911_v34 = vpop.f32.mrf.mxu0 }
 0x11e   : > { %1973 = vmatprep.mubr.f32.mxu1 %v1768_v9  ;;  %3077 = vmatprep.mubr.f32.mxu0 %v4152_v19  ;;  %v1742_v34 = vld [vmem:[#allocation2 + $0xc8] sm:$0xff] }
 0x11f   : > { %v4319_v25 = vpop.f32.mrf.mxu1  ;;  %v914_v13 = vpop.f32.mrf.mxu0 }
 0x120   : > { %v4321_v20 = vadd.f32 %v1139_v57, %v914_v13 }
 0x121   : > { %v4323_v24 = vpop.f32.mrf.mxu1  ;;  %1974 = vmatmul.mubr.f32.gmra.mxu1 %v1736_v11  ;;  %3078 = vmatmul.mubr.f32.gmra.mxu0 %v4164_v30  ;;  %v916_v27 = vpop.f32.mrf.mxu0  ;;  %v1738_v30 = vld [vmem:[#allocation2 + $0x98] sm:$0xff] }
 0x122   : > { %1978 = vmatprep.mubr.f32.mxu1 %v1769_v41  ;;  %3080 = vmatprep.mubr.f32.mxu0 %v4167_v26  ;;  %v1771_v26 = vld [vmem:[#allocation2 + $0xa9] sm:$0xff]  ;;  %v1743_v27 = vld [vmem:[#allocation2 + $0xd8] sm:$0xff] }
 0x123   : > { %v4327_v28 = vpop.f32.mrf.mxu1  ;;  %v919_v19 = vpop.f32.mrf.mxu0 }
 0x124   : > { %v4330_v54 = vadd.f32 %v4282_v55, %v919_v19 }
 0x125   : > { %v4332_v60 = vpop.f32.mrf.mxu1  ;;  %1979 = vmatmul.mubr.f32.gmra.mxu1 %v1737_v33  ;;  %3081 = vmatmul.mubr.f32.gmra.mxu0 %v4179_v36  ;;  %v921_v23 = vpop.f32.mrf.mxu0 }
 0x126   : > { %1983 = vmatprep.mubr.f32.mxu1 %v1770_v40  ;;  %3083 = vmatprep.mubr.f32.mxu0 %v4182_v35 }
 0x127   : > { %v4336_v46 = vpop.f32.mrf.mxu1  ;;  %v924_v57 = vpop.f32.mrf.mxu0 }
 0x128   : > { %v4338_v43 = vadd.f32 %v1149_v48, %v924_v57  ;;  %v1778_v57 = vld [vmem:[#allocation2 + $0xf9] sm:$0xff] }
 0x129   : > { %v4340_v58 = vpop.f32.mrf.mxu1  ;;  %1984 = vmatmul.mubr.f32.gmra.mxu1 %v1738_v30  ;;  %3084 = vmatmul.mubr.f32.gmra.mxu0 %v4194_v51  ;;  %v926_v55 = vpop.f32.mrf.mxu0  ;;  %v1740_v51 = vld [vmem:[#allocation2 + $0xb0] sm:$0xff] }
 0x12a   : > { %1988 = vmatprep.mubr.f32.mxu1 %v1771_v26  ;;  %3086 = vmatprep.mubr.f32.mxu0 %v4197_v61  ;;  %v1773_v61 = vld [vmem:[#allocation2 + $0xc1] sm:$0xff]  ;;  %v1745_v26 = vld [vmem:[#allocation2 + $0xf0] sm:$0xff] }
 0x12b   : > { %v4344_v36 = vpop.f32.mrf.mxu1  ;;  %v929_v35 = vpop.f32.mrf.mxu0 }
 0x12c   : > { %v4347_v17 = vadd.f32 %v4293_v59, %v929_v35  ;;  %v1779_v35 = vld [vmem:[#allocation2 + $0x109] sm:$0xff] }
 0x12d   : > { %v4349_v49 = vpop.f32.mrf.mxu1  ;;  %1989 = vmatmul.mubr.f32.gmra.mxu1 %v1739_v47  ;;  %3087 = vmatmul.mubr.f32.gmra.mxu0 %v4209_v56  ;;  %v931_v48 = vpop.f32.mrf.mxu0  ;;  %v1741_v56 = vld [vmem:[#allocation2 + $0xc0] sm:$0xff] }
 0x12e   : > { %1993 = vmatprep.mubr.f32.mxu1 %v1772_v12  ;;  %3089 = vmatprep.mubr.f32.mxu0 %v4212_v8  ;;  %v1774_v8 = vld [vmem:[#allocation2 + $0xc9] sm:$0xff] }
 0x12f   : > { %v4353_v32 = vpop.f32.mrf.mxu1  ;;  %v934_v0 = vpop.f32.mrf.mxu0  ;;  %v1821_v48 = vld [vmem:[#allocation2 + $0x182] sm:$0xff] }
 0x130   : > { %v4356_v2 = vadd.f32 %v4303_v37, %v934_v0  ;;  %v1822_v0 = vld [vmem:[#allocation2 + $0x18a] sm:$0xff] }
 0x131   : > { %v4358_v38 = vpop.f32.mrf.mxu1  ;;  %1994 = vmatmul.mubr.f32.gmra.mxu1 %v1740_v51  ;;  %v936_v59 = vpop.f32.mrf.mxu0  ;;  %3090 = vmatmul.mubr.f32.gmra.mxu0 %v4224_v62 }
 0x132   : > { %1998 = vmatprep.mubr.f32.mxu1 %v1773_v61  ;;  %3092 = vmatprep.mubr.f32.mxu0 %v4227_v1  ;;  %v1775_v1 = vld [vmem:[#allocation2 + $0xd9] sm:$0xff] }
 0x133   : > { %v4362_v39 = vpop.f32.mrf.mxu1  ;;  %v939_v16 = vpop.f32.mrf.mxu0 }
 0x134   : > { %v4365_v9 = vadd.f32 %v4299_v50, %v939_v16 }
 0x135   : > { %v4367_v63 = vpop.f32.mrf.mxu1  ;;  %1999 = vmatmul.mubr.f32.gmra.mxu1 %v1741_v56  ;;  %v941_v37 = vpop.f32.mrf.mxu0  ;;  %3093 = vmatmul.mubr.f32.gmra.mxu0 %v4239_v4  ;;  %v1780_v56 = vld [vmem:[#allocation2 + $0x111] sm:$0xff] }
 0x136   : > { %2003 = vmatprep.mubr.f32.mxu1 %v1774_v8  ;;  %3095 = vmatprep.mubr.f32.mxu0 %v4242_v29  ;;  %v1776_v29 = vld [vmem:[#allocation2 + $0xe1] sm:$0xff] }
 0x137   : > { %v4371_v62 = vpop.f32.mrf.mxu1  ;;  %v944_v11 = vpop.f32.mrf.mxu0  ;;  %v1823_v8 = vld [vmem:[#allocation2 + $0x19a] sm:$0xff] }
 0x138   : > { %v4374_v41 = vadd.f32 %v4311_v52, %v944_v11  ;;  %v1744_v52 = vld [vmem:[#allocation2 + $0xe0] sm:$0xff] }
 0x139   : > { %v4376_v13 = vpop.f32.mrf.mxu1  ;;  %2004 = vmatmul.mubr.f32.gmra.mxu1 %v1742_v34  ;;  %v946_v50 = vpop.f32.mrf.mxu0  ;;  %3096 = vmatmul.mubr.f32.gmra.mxu0 %v4250_v7  ;;  %v1777_v7 = vld [vmem:[#allocation2 + $0xf1] sm:$0xff]  ;;  %v1824_v34 = vld [vmem:[#allocation2 + $0x1a2] sm:$0xff] }
 0x13a   : > { %2008 = vmatprep.mubr.f32.mxu1 %v1775_v1  ;;  %3098 = vmatprep.mubr.f32.mxu0 %v4252_v5  ;;  %v1781_v50 = vld [vmem:[#allocation2 + $0x121] sm:$0xff] }
 0x13b   : > { %v4380_v4 = vpop.f32.mrf.mxu1 }
 0x13d   : > { %v4382_v33 = vpop.f32.mrf.mxu1  ;;  %2009 = vmatmul.mubr.f32.gmra.mxu1 %v1743_v27  ;;  %3099 = vmatmul.mubr.f32.gmra.mxu0 %v4260_v22 }
 0x13e   : > { %2013 = vmatprep.mubr.f32.mxu1 %v1776_v29  ;;  %3101 = vmatprep.mubr.f32.mxu0 %v4262_v18 }
 0x13f   : > { %v4386_v40 = vpop.f32.mrf.mxu1  ;;  %v949_v19 = vpop.f32.mrf.mxu0 }
 0x140   : > { %v4389_v23 = vadd.f32 %v4307_v21, %v949_v19 }
 0x141   : > { %v4391_v5 = vpop.f32.mrf.mxu1  ;;  %2014 = vmatmul.mubr.f32.gmra.mxu1 %v1744_v52  ;;  %v951_v30 = vpop.f32.mrf.mxu0  ;;  %3102 = vmatmul.mubr.f32.gmra.mxu0 %v4269_v6  ;;  %v1746_v6 = vld [vmem:[#allocation2 + $0xf8] sm:$0xff] }
 0x142   : > { %2018 = vmatprep.mubr.f32.mxu1 %v1777_v7  ;;  %3104 = vmatprep.mubr.f32.mxu0 %v4271_v15  ;;  %v1782_v30 = vld [vmem:[#allocation2 + $0x129] sm:$0xff] }
 0x143   : > { %v4395_v22 = vpop.f32.mrf.mxu1  ;;  %v954_v18 = vpop.f32.mrf.mxu0 }
 0x144   : > { %v4398_v55 = vadd.f32 %v4319_v25, %v954_v18 }
 0x145   : > { %v1344_v47 = vpop.f32.mrf.mxu1  ;;  %2019 = vmatmul.mubr.f32.gmra.mxu1 %v1745_v26  ;;  %v956_v21 = vpop.f32.mrf.mxu0  ;;  %3105 = vmatmul.mubr.f32.gmra.mxu0 %v4278_v53 }
 0x146   : > { %v4402_v12 = vadd.f32 %v1344_v47, %v4291_v44  ;;  %2023 = vmatprep.mubr.f32.mxu1 %v1778_v57  ;;  %3107 = vmatprep.mubr.f32.mxu0 %v4280_v45  ;;  %v1747_v44 = vld [vmem:[#allocation2 + $0x108] sm:$0xff] }
 0x147   : > { %v1346_v15 = vpop.f32.mrf.mxu1 }
 0x149   : > { %v1349_v51 = vpop.f32.mrf.mxu1  ;;  %2024 = vmatmul.mubr.f32.gmra.mxu1 %v1746_v6  ;;  %v959_v61 = vpop.f32.mrf.mxu0  ;;  %3108 = vmatmul.mubr.f32.gmra.mxu0 %v4289_v42 }
 0x14a   : > { %v4407_v25 = vadd.f32 %v1349_v51, %v4297_v31  ;;  %v4410_v53 = vadd.f32 %v4315_v10, %v959_v61  ;;  %2028 = vmatprep.mubr.f32.mxu1 %v1779_v35  ;;  %3110 = vmatprep.mubr.f32.mxu0 %v1821_v48  ;;  %v1748_v10 = vld [vmem:[#allocation2 + $0x110] sm:$0xff] }
 0x14b   : > { %v1351_v59 = vpop.f32.mrf.mxu1  ;;  %v961_v45 = vpop.f32.mrf.mxu0 }
 0x14d   : > { %v1354_v16 = vpop.f32.mrf.mxu1  ;;  %2029 = vmatmul.mubr.f32.gmra.mxu1 %v1747_v44  ;;  %v964_v37 = vpop.f32.mrf.mxu0  ;;  %3111 = vmatmul.mubr.f32.gmra.mxu0 %v1822_v0 }
 0x14e   : > { %v4413_v42 = vadd.f32 %v1354_v16, %v4305_v3  ;;  %v4416_v31 = vadd.f32 %v4327_v28, %v964_v37  ;;  %2033 = vmatprep.mubr.f32.mxu1 %v1780_v56  ;;  %3113 = vmatprep.mubr.f32.mxu0 %v1823_v8  ;;  %v1749_v28 = vld [vmem:[#allocation2 + $0x120] sm:$0xff] }
 0x14f   : > { %v1356_v1 = vpop.f32.mrf.mxu1  ;;  %v966_v11 = vpop.f32.mrf.mxu0 }
 0x151   : > { %v1359_v27 = vpop.f32.mrf.mxu1  ;;  %2034 = vmatmul.mubr.f32.gmra.mxu1 %v1748_v10  ;;  %v969_v29 = vpop.f32.mrf.mxu0  ;;  %3114 = vmatmul.mubr.f32.gmra.mxu0 %v1824_v34 }
 0x152   : > { %v4419_v52 = vadd.f32 %v1359_v27, %v4313_v14  ;;  %v4422_v3 = vadd.f32 %v4323_v24, %v969_v29  ;;  %2038 = vmatprep.mubr.f32.mxu1 %v1781_v50  ;;  %v1750_v14 = vld [vmem:[#allocation2 + $0x128] sm:$0xff]  ;;  %v1783_v24 = vld [vmem:[#allocation2 + $0x139] sm:$0xff] }
 0x153   : > { %v1361_v19 = vpop.f32.mrf.mxu1  ;;  %v971_v7 = vpop.f32.mrf.mxu0 }
 0x155   : > { %v1364_v26 = vpop.f32.mrf.mxu1  ;;  %2039 = vmatmul.mubr.f32.gmra.mxu1 %v1749_v28  ;;  %v974_v18 = vpop.f32.mrf.mxu0 }
 0x156   : > { %v4425_v57 = vadd.f32 %v1364_v26, %v4321_v20  ;;  %v4428_v47 = vadd.f32 %v4336_v46, %v974_v18  ;;  %2043 = vmatprep.mubr.f32.mxu1 %v1782_v30  ;;  %v1751_v20 = vld [vmem:[#allocation2 + $0x138] sm:$0xff]  ;;  %v1784_v46 = vld [vmem:[#allocation2 + $0x141] sm:$0xff] }
 0x157   : > { %v1366_v21 = vpop.f32.mrf.mxu1  ;;  %v976_v6 = vpop.f32.mrf.mxu0 }
 0x159   : > { %v1369_v15 = vpop.f32.mrf.mxu1  ;;  %2044 = vmatmul.mubr.f32.gmra.mxu1 %v1750_v14  ;;  %v979_v35 = vpop.f32.mrf.mxu0 }
 0x15a   : > { %v4431_v48 = vadd.f32 %v1369_v15, %v4330_v54  ;;  %v4434_v51 = vadd.f32 %v4332_v60, %v979_v35  ;;  %2048 = vmatprep.mubr.f32.mxu1 %v1783_v24  ;;  %v1752_v54 = vld [vmem:[#allocation2 + $0x140] sm:$0xff]  ;;  %v1785_v60 = vld [vmem:[#allocation2 + $0x151] sm:$0xff] }
 0x15b   : > { %v1371_v61 = vpop.f32.mrf.mxu1  ;;  %v981_v44 = vpop.f32.mrf.mxu0 }
 0x15d   : > { %v1374_v0 = vpop.f32.mrf.mxu1  ;;  %2049 = vmatmul.mubr.f32.gmra.mxu1 %v1751_v20  ;;  %v984_v59 = vpop.f32.mrf.mxu0 }
 0x15e   : > { %v4437_v45 = vadd.f32 %v1374_v0, %v4338_v43  ;;  %v4440_v56 = vadd.f32 %v4344_v36, %v984_v59  ;;  %2053 = vmatprep.mubr.f32.mxu1 %v1784_v46  ;;  %v1753_v43 = vld [vmem:[#allocation2 + $0x150] sm:$0xff]  ;;  %v1786_v36 = vld [vmem:[#allocation2 + $0x159] sm:$0xff] }
 0x15f   : > { %v1376_v8 = vpop.f32.mrf.mxu1  ;;  %v986_v16 = vpop.f32.mrf.mxu0 }
 0x161   : > { %v1379_v37 = vpop.f32.mrf.mxu1  ;;  %2054 = vmatmul.mubr.f32.gmra.mxu1 %v1752_v54  ;;  %v989_v10 = vpop.f32.mrf.mxu0 }
 0x162   : > { %v4443_v34 = vadd.f32 %v1379_v37, %v4347_v17  ;;  %v4446_v1 = vadd.f32 %v4340_v58, %v989_v10  ;;  %2058 = vmatprep.mubr.f32.mxu1 %v1785_v60  ;;  %v1754_v17 = vld [vmem:[#allocation2 + $0x158] sm:$0xff]  ;;  %v1787_v58 = vld [vmem:[#allocation2 + $0x169] sm:$0xff] }
 0x163   : > { %v1381_v11 = vpop.f32.mrf.mxu1  ;;  %v991_v50 = vpop.f32.mrf.mxu0 }
 0x165   : > { %v1384_v27 = vpop.f32.mrf.mxu1  ;;  %2059 = vmatmul.mubr.f32.gmra.mxu1 %v1753_v43  ;;  %v994_v29 = vpop.f32.mrf.mxu0 }
 0x166   : > { %v4449_v28 = vadd.f32 %v1384_v27, %v4356_v2  ;;  %v4452_v19 = vadd.f32 %v4353_v32, %v994_v29  ;;  %2063 = vmatprep.mubr.f32.mxu1 %v1786_v36  ;;  %v1755_v2 = vld [vmem:[#allocation2 + $0x168] sm:$0xff]  ;;  %v1788_v32 = vld [vmem:[#allocation2 + $0x171] sm:$0xff] }
 0x167   : > { %v1386_v7 = vpop.f32.mrf.mxu1  ;;  %v996_v30 = vpop.f32.mrf.mxu0 }
 0x169   : > { %v1389_v26 = vpop.f32.mrf.mxu1  ;;  %2064 = vmatmul.mubr.f32.gmra.mxu1 %v1754_v17  ;;  %v999_v18 = vpop.f32.mrf.mxu0 }
 0x16a   : > { %v4455_v14 = vadd.f32 %v1389_v26, %v4365_v9  ;;  %v4458_v21 = vadd.f32 %v4349_v49, %v999_v18  ;;  %2068 = vmatprep.mubr.f32.mxu1 %v1787_v58  ;;  %v1756_v9 = vld [vmem:[#allocation2 + $0x170] sm:$0xff]  ;;  %v1789_v49 = vld [vmem:[#allocation2 + $0x181] sm:$0xff] }
 0x16b   : > { %v1391_v6 = vpop.f32.mrf.mxu1  ;;  %v1001_v24 = vpop.f32.mrf.mxu0  ;;  %v3129_v26 = vld [vmem:[#allocation2] sm:$0xff] }
 0x16d   : > { %v1394_v15 = vpop.f32.mrf.mxu1  ;;  %2069 = vmatmul.mubr.f32.gmra.mxu1 %v1755_v2  ;;  %v1004_v35 = vpop.f32.mrf.mxu0 }
 0x16e   : > { %v4461_v20 = vadd.f32 %v1394_v15, %v4374_v41  ;;  %v4464_v61 = vadd.f32 %v4362_v39, %v1004_v35  ;;  %2073 = vmatprep.mubr.f32.mxu1 %v1788_v32  ;;  %v1757_v41 = vld [vmem:[#allocation2 + $0x180] sm:$0xff]  ;;  %v1790_v39 = vld [vmem:[#allocation2 + $0x189] sm:$0xff] }
 0x16f   : > { %v1396_v44 = vpop.f32.mrf.mxu1  ;;  %v1006_v46 = vpop.f32.mrf.mxu0 }
 0x171   : > { %v1399_v0 = vpop.f32.mrf.mxu1  ;;  %2074 = vmatmul.mubr.f32.gmra.mxu1 %v1756_v9  ;;  %v1009_v59 = vpop.f32.mrf.mxu0 }
 0x172   : > { %v4467_v54 = vadd.f32 %v1399_v0, %v4389_v23  ;;  %v4470_v8 = vadd.f32 %v4358_v38, %v1009_v59  ;;  %2078 = vmatprep.mubr.f32.mxu1 %v1789_v49  ;;  %v1758_v23 = vld [vmem:[#allocation2 + $0x188] sm:$0xff]  ;;  %v1791_v38 = vld [vmem:[#allocation2 + $0x199] sm:$0xff] }
 0x173   : > { %v1401_v16 = vpop.f32.mrf.mxu1  ;;  %v1011_v60 = vpop.f32.mrf.mxu0 }
 0x175   : > { %v1404_v37 = vpop.f32.mrf.mxu1  ;;  %2079 = vmatmul.mubr.f32.gmra.mxu1 %v1757_v41  ;;  %v1014_v10 = vpop.f32.mrf.mxu0 }
 0x176   : > { %v4473_v43 = vadd.f32 %v1404_v37, %v4398_v55  ;;  %v4476_v11 = vadd.f32 %v4371_v62, %v1014_v10  ;;  %2083 = vmatprep.mubr.f32.mxu1 %v1790_v39  ;;  %v1792_v55 = vld [vmem:[#allocation2 + $0x1a1] sm:$0xff] }
 0x177   : > { %v1406_v50 = vpop.f32.mrf.mxu1  ;;  %v1016_v36 = vpop.f32.mrf.mxu0 }
 0x179   : > { %v1409_v27 = vpop.f32.mrf.mxu1  ;;  %2084 = vmatmul.mubr.f32.gmra.mxu1 %v1758_v23  ;;  %v4478_v29 = vpop.f32.mrf.mxu0 }
 0x17a   : > { %v4481_v17 = vadd.f32 %v1409_v27, %v4410_v53  ;;  %2088 = vmatprep.mubr.f32.mxu1 %v1791_v38 }
 0x17b   : > { %v1411_v7 = vpop.f32.mrf.mxu1  ;;  %v1021_v30 = vpop.f32.mrf.mxu0 }
 0x17d   : > { %v1414_v58 = vpop.f32.mrf.mxu1  ;;  %2089 = vmatmul.mubr.f32.gmra.mxu1 %v3129_v26  ;;  %v4483_v62 = vpop.f32.mrf.mxu0 }
 0x17e   : > { %v4486_v18 = vadd.f32 %v1414_v58, %v4416_v31  ;;  %2093 = vmatprep.mubr.f32.mxu1 %v1792_v55 }
 0x17f   : > { %v1416_v2 = vpop.f32.mrf.mxu1  ;;  %v1026_v6 = vpop.f32.mrf.mxu0 }
 0x181   : > { %v1419_v24 = vpop.f32.mrf.mxu1  ;;  %2094 = vmatmul.mubr.f32.gmra.mxu1 %v3129_v26  ;;  %v4488_v32 = vpop.f32.mrf.mxu0 }
 0x182   : > { %v4491_v53 = vadd.f32 %v1419_v24, %v4422_v3 }
 0x183   : > { %v1421_v15 = vpop.f32.mrf.mxu1  ;;  %v1031_v35 = vpop.f32.mrf.mxu0 }
 0x185   : > { %v1424_v9 = vpop.f32.mrf.mxu1  ;;  %v4493_v44 = vpop.f32.mrf.mxu0 }
 0x186   : > { %v4496_v46 = vadd.f32 %v1424_v9, %v4428_v47 }
 0x187   : > { %v1426_v31 = vpop.f32.mrf.mxu1  ;;  %v1036_v49 = vpop.f32.mrf.mxu0 }
 0x189   : > { %v1429_v0 = vpop.f32.mrf.mxu1  ;;  %v4498_v59 = vpop.f32.mrf.mxu0 }
 0x18a   : > { %v4501_v41 = vadd.f32 %v1429_v0, %v4434_v51 }
 0x18b   : > { %v1431_v16 = vpop.f32.mrf.mxu1  ;;  %v1041_v60 = vpop.f32.mrf.mxu0 }
 0x18d   : > { %v1434_v3 = vpop.f32.mrf.mxu1  ;;  %v4503_v39 = vpop.f32.mrf.mxu0 }
 0x18e   : > { %v4506_v37 = vadd.f32 %v1434_v3, %v4440_v56 }
 0x18f   : > { %v1436_v10 = vpop.f32.mrf.mxu1  ;;  %v1046_v23 = vpop.f32.mrf.mxu0 }
 0x191   : > { %v1439_v47 = vpop.f32.mrf.mxu1  ;;  %v4508_v50 = vpop.f32.mrf.mxu0 }
 0x192   : > { %v4511_v36 = vadd.f32 %v1439_v47, %v4446_v1 }
 0x193   : > { %v1441_v38 = vpop.f32.mrf.mxu1  ;;  %v1051_v27 = vpop.f32.mrf.mxu0 }
 0x195   : > { %v1444_v51 = vpop.f32.mrf.mxu1  ;;  %v2990_v7 = vpop.f32.mrf.mxu0 }
 0x196   : > { %v4514_v30 = vadd.f32 %v1444_v51, %v4452_v19  ;;  %v4517_v55 = vadd.f32 %v2990_v7, %v4407_v25 }
 0x197   : > { %v1446_v56 = vpop.f32.mrf.mxu1  ;;  %v1569_v58 = vpop.f32.mrf.mxu0 }
 0x198   : > { %v4520_v26 = vadd.f32 %v1569_v58, %v4402_v12 }
 0x199   : > { %v1449_v2 = vpop.f32.mrf.mxu1  ;;  %v2993_v6 = vpop.f32.mrf.mxu0 }
 0x19a   : > { %v4523_v1 = vadd.f32 %v1449_v2, %v4458_v21  ;;  %v4526_v24 = vadd.f32 %v2993_v6, %v4419_v52 }
 0x19b   : > { %v1451_v15 = vpop.f32.mrf.mxu1  ;;  %v1579_v35 = vpop.f32.mrf.mxu0 }
 0x19c   : > { %v4529_v19 = vadd.f32 %v1579_v35, %v4413_v42 }
 0x19d   : > { %v1454_v25 = vpop.f32.mrf.mxu1  ;;  %v2996_v9 = vpop.f32.mrf.mxu0 }
 0x19e   : > { %v4532_v31 = vadd.f32 %v1454_v25, %v4464_v61  ;;  %v4535_v12 = vadd.f32 %v2996_v9, %v4431_v48 }
 0x19f   : > { %v1456_v49 = vpop.f32.mrf.mxu1  ;;  %v1589_v0 = vpop.f32.mrf.mxu0 }
 0x1a0   : > { %v4538_v21 = vadd.f32 %v1589_v0, %v4425_v57 }
 0x1a1   : > { %v1459_v52 = vpop.f32.mrf.mxu1  ;;  %v2999_v16 = vpop.f32.mrf.mxu0 }
 0x1a2   : > { %v4541_v60 = vadd.f32 %v1459_v52, %v4470_v8  ;;  %v4544_v42 = vadd.f32 %v2999_v16, %v4443_v34  ;;  %v1245_v8 = vadd.f32 %v4367_v63, %v4478_v29 }
 0x1a3   : > { %v1461_v3 = vpop.f32.mrf.mxu1  ;;  %v1599_v10 = vpop.f32.mrf.mxu0 }
 0x1a4   : > { %v4547_v61 = vadd.f32 %v1599_v10, %v4437_v45 }
 0x1a5   : > { %v1464_v48 = vpop.f32.mrf.mxu1  ;;  %v3002_v23 = vpop.f32.mrf.mxu0 }
 0x1a6   : > { %v4550_v47 = vadd.f32 %v1464_v48, %v4476_v11  ;;  %v4553_v57 = vadd.f32 %v3002_v23, %v4455_v14  ;;  %v1250_v14 = vadd.f32 %v4380_v4, %v4483_v62 }
 0x1a7   : > { %v1466_v38 = vpop.f32.mrf.mxu1  ;;  %v1609_v27 = vpop.f32.mrf.mxu0 }
 0x1a8   : > { %v4558_v34 = vadd.f32 %v1609_v27, %v4449_v28 }
 0x1a9   : > { %v1469_v51 = vpop.f32.mrf.mxu1  ;;  %v3005_v7 = vpop.f32.mrf.mxu0 }
 0x1aa   : > { %v1470_v45 = vadd.f32 %v1469_v51, %v1245_v8  ;;  %v4561_v56 = vadd.f32 %v3005_v7, %v4467_v54  ;;  %v1255_v54 = vadd.f32 %v4376_v13, %v4488_v32 }
 0x1ab   : > { %v1471_v58 = vpop.f32.mrf.mxu1  ;;  %v1619_v11 = vpop.f32.mrf.mxu0 }
 0x1ac   : > { %v4566_v2 = vadd.f32 %v1619_v11, %v4461_v20 }
 0x1ad   : > { %v1474_v6 = vpop.f32.mrf.mxu1  ;;  %v3008_v15 = vpop.f32.mrf.mxu0 }
 0x1ae   : > { %v1475_v63 = vadd.f32 %v1474_v6, %v1250_v14  ;;  %v4569_v28 = vadd.f32 %v3008_v15, %v4481_v17  ;;  %v1260_v17 = vadd.f32 %v4386_v40, %v4493_v44 }
 0x1af   : > { %v1476_v29 = vpop.f32.mrf.mxu1  ;;  %v1629_v35 = vpop.f32.mrf.mxu0 }
 0x1b0   : > { %v4574_v25 = vadd.f32 %v1629_v35, %v4473_v43 }
 0x1b1   : > { %v1479_v9 = vpop.f32.mrf.mxu1  ;;  %v3011_v49 = vpop.f32.mrf.mxu0 }
 0x1b2   : > { %v1480_v4 = vadd.f32 %v1479_v9, %v1255_v54  ;;  %v4577_v20 = vadd.f32 %v3011_v49, %v4491_v53  ;;  %v1265_v53 = vadd.f32 %v4382_v33, %v4498_v59 }
 0x1b3   : > { %v1481_v62 = vpop.f32.mrf.mxu1  ;;  %v1639_v0 = vpop.f32.mrf.mxu0 }
 0x1b4   : > { %v4582_v52 = vadd.f32 %v1639_v0, %v4486_v18 }
 0x1b5   : > { %v1484_v16 = vpop.f32.mrf.mxu1  ;;  %v3014_v3 = vpop.f32.mrf.mxu0 }
 0x1b6   : > { %v1485_v13 = vadd.f32 %v1484_v16, %v1260_v17  ;;  %v4585_v43 = vadd.f32 %v3014_v3, %v4501_v41  ;;  %v1270_v41 = vadd.f32 %v4395_v22, %v4503_v39 }
 0x1b7   : > { %v1486_v32 = vpop.f32.mrf.mxu1  ;;  %v1649_v10 = vpop.f32.mrf.mxu0 }
 0x1b8   : > { %v4590_v48 = vadd.f32 %v1649_v10, %v4496_v46 }
 0x1b9   : > { %v1489_v23 = vpop.f32.mrf.mxu1  ;;  %v3017_v38 = vpop.f32.mrf.mxu0 }
 0x1ba   : > { %v1490_v40 = vadd.f32 %v1489_v23, %v1265_v53  ;;  %v4593_v18 = vadd.f32 %v3017_v38, %v4511_v36  ;;  %v1275_v36 = vadd.f32 %v4391_v5, %v4508_v50 }
 0x1bb   : > { %v1491_v44 = vpop.f32.mrf.mxu1  ;;  %v1659_v27 = vpop.f32.mrf.mxu0 }
 0x1bc   : > { %v4598_v8 = vadd.f32 %v1659_v27, %v4506_v37 }
 0x1bd   : > { %v1494_v51 = vpop.f32.mrf.mxu1  ;;  %v3020_v7 = vpop.f32.mrf.mxu0 }
 0x1be   : > { %v1495_v33 = vadd.f32 %v1494_v51, %v1270_v41  ;;  %v4601_v46 = vadd.f32 %v3020_v7, %v4523_v1 }
 0x1bf   : > { %v1496_v59 = vpop.f32.mrf.mxu1  ;;  %v1669_v58 = vpop.f32.mrf.mxu0 }
 0x1c0   : > { %v4606_v11 = vadd.f32 %v1669_v58, %v4514_v30 }
 0x1c1   : > { %v1499_v14 = vpop.f32.mrf.mxu1  ;;  %v3023_v6 = vpop.f32.mrf.mxu0 }
 0x1c2   : > { %v1500_v22 = vadd.f32 %v1499_v14, %v1275_v36  ;;  %v4609_v39 = vadd.f32 %v3023_v6, %v4541_v60 }
 0x1c3   : > { %v1501_v37 = vpop.f32.mrf.mxu1  ;;  %v1679_v15 = vpop.f32.mrf.mxu0 }
 0x1c4   : > { %v4612_v29 = vadd.f32 %v1679_v15, %v4532_v31 }
 0x1c5   : > { %v1940_v1 = vpop.f32.mrf.mxu1  ;;  %v3026_v35 = vpop.f32.mrf.mxu0 }
 0x1c6   : > { %v4614_v54 = vadd.f32 %v3026_v35, %v1470_v45 }
 0x1c7   : > { %v1942_v9 = vpop.f32.mrf.mxu1  ;;  %v1689_v5 = vpop.f32.mrf.mxu0 }
 0x1c8   : > { %v4617_v50 = vadd.f32 %v1689_v5, %v4550_v47 }
 0x1c9   : > { %v1945_v30 = vpop.f32.mrf.mxu1  ;;  %v3029_v49 = vpop.f32.mrf.mxu0 }
 0x1ca   : > { %v4619_v62 = vadd.f32 %v3029_v49, %v1480_v4 }
 0x1cb   : > { %v1947_v60 = vpop.f32.mrf.mxu1  ;;  %v1699_v0 = vpop.f32.mrf.mxu0 }
 0x1cc   : > { %v4621_v17 = vadd.f32 %v1699_v0, %v1475_v63 }
 0x1cd   : > { %v1950_v16 = vpop.f32.mrf.mxu1  ;;  %v3032_v31 = vpop.f32.mrf.mxu0 }
 0x1ce   : > { %v4623_v3 = vadd.f32 %v3032_v31, %v1490_v40  ;;  %v4634_v40 = vld [vmem:[%s4751_s5] ss:$0 sm:$0xff] }
 0x1cf   : > { %v1952_v32 = vpop.f32.mrf.mxu1  ;;  %v1709_v45 = vpop.f32.mrf.mxu0 }
 0x1d0   : > { %v4625_v10 = vadd.f32 %v1709_v45, %v1485_v13 }
 0x1d1   : > { %v1955_v53 = vpop.f32.mrf.mxu1  ;;  %v3035_v47 = vpop.f32.mrf.mxu0 }
 0x1d2   : > { %v4627_v23 = vadd.f32 %v3035_v47, %v1500_v22 }
 0x1d3   : > { %v1957_v38 = vpop.f32.mrf.mxu1  ;;  %v1719_v4 = vpop.f32.mrf.mxu0 }
 0x1d4   : > { %v4629_v44 = vadd.f32 %v1719_v4, %v1495_v33 }
 0x1d5   : > { %v1960_v27 = vpop.f32.mrf.mxu1  ;;  %v3070_v63 = vpop.f32.mrf.mxu0 }
 0x1d6   : > { %v2171_v41 = vadd.f32 %v3070_v63, %v1945_v30 }
 0x1d7   : > { %v1962_v51 = vpop.f32.mrf.mxu1  ;;  %v2165_v7 = vpop.f32.mrf.mxu0 }
 0x1d8   : > { %v2325_v13 = vadd.f32 %v2171_v41, %v4517_v55  ;;  %v2166_v59 = vadd.f32 %v2165_v7, %v1940_v1 }
 0x1d9   : > { %v1965_v33 = vpop.f32.mrf.mxu1  ;;  %v3073_v58 = vpop.f32.mrf.mxu0 }
 0x1da   : > { %v2364_v36 = vadd.f32 %v4634_v40, %v2325_v13  ;;  %v2324_v14 = vadd.f32 %v2166_v59, %v4520_v26  ;;  %v2181_v6 = vadd.f32 %v3073_v58, %v1955_v53 }
 0x1db   : > { %v1967_v22 = vpop.f32.mrf.mxu1  ;;  %v2175_v37 = vpop.f32.mrf.mxu0 }
 0x1dc   : > { %2396 = vst [vmem:[%s4642_s9 + $0x8] sm:$0xff] %v2364_v36  ;;  %v2363_v55 = vadd.f32 %v4634_v40, %v2324_v14  ;;  %v2327_v15 = vadd.f32 %v2181_v6, %v4526_v24  ;;  %v2176_v1 = vadd.f32 %v2175_v37, %v1950_v16  ;;  %v2466_v35 = vmul.f32 %v2364_v36, %v2364_v36 }
 0x1dd   : > { %v1970_v9 = vpop.f32.mrf.mxu1  ;;  %v3076_v5 = vpop.f32.mrf.mxu0 }
 0x1de   : > { %2395 = vst [vmem:[%s4642_s9] sm:$0xff] %v2363_v55  ;;  %v2427_v30 = vadd.f32 %v2364_v36, %v2363_v55  ;;  %v2465_v49 = vmul.f32 %v2363_v55, %v2363_v55  ;;  %v2366_v60 = vadd.f32 %v4634_v40, %v2327_v15  ;;  %v2326_v26 = vadd.f32 %v2176_v1, %v4529_v19 }
 0x1df   : > { %v1972_v0 = vpop.f32.mrf.mxu1  ;;  %v2191_v31 = vadd.f32 %v3076_v5, %v1965_v33  ;;  %v2185_v32 = vpop.f32.mrf.mxu0 }
 0x1e0   : > { %v2497_v45 = vadd.f32 %v2466_v35, %v2465_v49  ;;  %2398 = vst [vmem:[%s4642_s9 + $0x18] sm:$0xff] %v2366_v60  ;;  %v2365_v53 = vadd.f32 %v4634_v40, %v2326_v26  ;;  %v2186_v24 = vadd.f32 %v2185_v32, %v1960_v27  ;;  %v2468_v51 = vmul.f32 %v2366_v60, %v2366_v60 }
 0x1e1   : > { %v2329_v16 = vadd.f32 %v2191_v31, %v4535_v12  ;;  %v1975_v47 = vpop.f32.mrf.mxu1  ;;  %v3079_v38 = vpop.f32.mrf.mxu0 }
 0x1e2   : > { %2397 = vst [vmem:[%s4642_s9 + $0x10] sm:$0xff] %v2365_v53  ;;  %v2428_v4 = vadd.f32 %v2427_v30, %v2365_v53  ;;  %v2467_v63 = vmul.f32 %v2365_v53, %v2365_v53  ;;  %v2328_v41 = vadd.f32 %v2186_v24, %v4538_v21  ;;  %v2201_v19 = vadd.f32 %v3079_v38, %v1975_v47 }
 0x1e3   : > { %v2368_v7 = vadd.f32 %v4634_v40, %v2329_v16  ;;  %v1977_v13 = vpop.f32.mrf.mxu1  ;;  %v2195_v59 = vpop.f32.mrf.mxu0 }
 0x1e4   : > { %v2498_v33 = vadd.f32 %v2497_v45, %v2467_v63  ;;  %v2367_v27 = vadd.f32 %v4634_v40, %v2328_v41  ;;  %v2429_v58 = vadd.f32 %v2428_v4, %v2366_v60  ;;  %v2331_v12 = vadd.f32 %v2201_v19, %v4544_v42 }
 0x1e5   : > { %2400 = vst [vmem:[%s4642_s9 + $0x28] sm:$0xff] %v2368_v7  ;;  %v1980_v36 = vpop.f32.mrf.mxu1  ;;  %v2196_v14 = vadd.f32 %v2195_v59, %v1970_v9  ;;  %v3082_v6 = vpop.f32.mrf.mxu0  ;;  %v2470_v5 = vmul.f32 %v2368_v7, %v2368_v7 }
 0x1e6   : > { %2399 = vst [vmem:[%s4642_s9 + $0x20] sm:$0xff] %v2367_v27  ;;  %v2430_v22 = vadd.f32 %v2429_v58, %v2367_v27  ;;  %v2469_v21 = vmul.f32 %v2367_v27, %v2367_v27  ;;  %v2499_v37 = vadd.f32 %v2498_v33, %v2468_v51  ;;  %v2370_v55 = vadd.f32 %v4634_v40, %v2331_v12 }
 0x1e7   : > { %v2330_v15 = vadd.f32 %v2196_v14, %v4547_v61  ;;  %v1982_v1 = vpop.f32.mrf.mxu1  ;;  %v2205_v35 = vpop.f32.mrf.mxu0 }
 0x1e8   : > { %v2500_v30 = vadd.f32 %v2499_v37, %v2469_v21  ;;  %2402 = vst [vmem:[%s4642_s9 + $0x38] sm:$0xff] %v2370_v55  ;;  %v2431_v49 = vadd.f32 %v2430_v22, %v2368_v7  ;;  %v2206_v42 = vadd.f32 %v2205_v35, %v1980_v36  ;;  %v2472_v38 = vmul.f32 %v2370_v55, %v2370_v55 }
 0x1e9   : > { %v2369_v60 = vadd.f32 %v4634_v40, %v2330_v15  ;;  %v1985_v9 = vpop.f32.mrf.mxu1  ;;  %v3085_v26 = vpop.f32.mrf.mxu0 }
 0x1ea   : > { %v2501_v0 = vadd.f32 %v2500_v30, %v2470_v5  ;;  %v2211_v31 = vadd.f32 %v3082_v6, %v1985_v9  ;;  %v2332_v32 = vadd.f32 %v2206_v42, %v4558_v34 }
 0x1eb   : > { %2401 = vst [vmem:[%s4642_s9 + $0x30] sm:$0xff] %v2369_v60  ;;  %v2432_v45 = vadd.f32 %v2431_v49, %v2369_v60  ;;  %v2471_v53 = vmul.f32 %v2369_v60, %v2369_v60  ;;  %v1987_v61 = vpop.f32.mrf.mxu1  ;;  %v2215_v24 = vpop.f32.mrf.mxu0 }
 0x1ec   : > { %v2333_v16 = vadd.f32 %v2211_v31, %v4553_v57  ;;  %v2371_v47 = vadd.f32 %v4634_v40, %v2332_v32 }
 0x1ed   : > { %v2502_v4 = vadd.f32 %v2501_v0, %v2471_v53  ;;  %v2433_v63 = vadd.f32 %v2432_v45, %v2370_v55  ;;  %v1990_v41 = vpop.f32.mrf.mxu1  ;;  %v3088_v33 = vpop.f32.mrf.mxu0 }
 0x1ee   : > { %v2372_v19 = vadd.f32 %v4634_v40, %v2333_v16  ;;  %2403 = vst [vmem:[%s4642_s9 + $0x40] sm:$0xff] %v2371_v47  ;;  %v2473_v51 = vmul.f32 %v2371_v47, %v2371_v47  ;;  %v2216_v7 = vadd.f32 %v2215_v24, %v1990_v41 }
 0x1ef   : > { %v2434_v34 = vadd.f32 %v2433_v63, %v2371_v47  ;;  %v2503_v13 = vadd.f32 %v2502_v4, %v2472_v38  ;;  %v1992_v59 = vpop.f32.mrf.mxu1  ;;  %v2225_v37 = vpop.f32.mrf.mxu0 }
 0x1f0   : > { %2404 = vst [vmem:[%s4642_s9 + $0x48] sm:$0xff] %v2372_v19  ;;  %v2334_v27 = vadd.f32 %v2216_v7, %v4566_v2  ;;  %v2474_v57 = vmul.f32 %v2372_v19, %v2372_v19 }
 0x1f1   : > { %v2504_v58 = vadd.f32 %v2503_v13, %v2473_v51  ;;  %v2435_v12 = vadd.f32 %v2434_v34, %v2372_v19  ;;  %v1995_v36 = vpop.f32.mrf.mxu1  ;;  %v3091_v42 = vpop.f32.mrf.mxu0 }
 0x1f2   : > { %v2373_v14 = vadd.f32 %v4634_v40, %v2334_v27  ;;  %v2221_v6 = vadd.f32 %v3085_v26, %v1995_v36 }
 0x1f3   : > { %v2505_v22 = vadd.f32 %v2504_v58, %v2474_v57  ;;  %v1997_v21 = vpop.f32.mrf.mxu1  ;;  %v2235_v53 = vpop.f32.mrf.mxu0 }
 0x1f4   : > { %2405 = vst [vmem:[%s4642_s9 + $0x50] sm:$0xff] %v2373_v14  ;;  %v2436_v55 = vadd.f32 %v2435_v12, %v2373_v14  ;;  %v2475_v15 = vmul.f32 %v2373_v14, %v2373_v14  ;;  %v2335_v1 = vadd.f32 %v2221_v6, %v4561_v56 }
 0x1f5   : > { %v2000_v35 = vpop.f32.mrf.mxu1  ;;  %v3094_v41 = vpop.f32.mrf.mxu0 }
 0x1f6   : > { %v2506_v5 = vadd.f32 %v2505_v22, %v2475_v15  ;;  %v2374_v2 = vadd.f32 %v4634_v40, %v2335_v1  ;;  %v2226_v30 = vadd.f32 %v2225_v37, %v2000_v35 }
 0x1f7   : > { %v2002_v49 = vpop.f32.mrf.mxu1  ;;  %v2245_v27 = vpop.f32.mrf.mxu0 }
 0x1f8   : > { %2406 = vst [vmem:[%s4642_s9 + $0x58] sm:$0xff] %v2374_v2  ;;  %v2437_v60 = vadd.f32 %v2436_v55, %v2374_v2  ;;  %v2476_v9 = vmul.f32 %v2374_v2, %v2374_v2  ;;  %v2336_v26 = vadd.f32 %v2226_v30, %v4574_v25 }
 0x1f9   : > { %v2005_v0 = vpop.f32.mrf.mxu1  ;;  %v3097_v21 = vpop.f32.mrf.mxu0 }
 0x1fa   : > { %v2507_v31 = vadd.f32 %v2506_v5, %v2476_v9  ;;  %v2375_v32 = vadd.f32 %v4634_v40, %v2336_v26  ;;  %v2231_v45 = vadd.f32 %v3088_v33, %v2005_v0 }
 0x1fb   : > { %v2007_v56 = vpop.f32.mrf.mxu1  ;;  %v2255_v30 = vpop.f32.mrf.mxu0 }
 0x1fc   : > { %2407 = vst [vmem:[%s4642_s9 + $0x60] sm:$0xff] %v2375_v32  ;;  %v2438_v61 = vadd.f32 %v2437_v60, %v2375_v32  ;;  %v2477_v24 = vmul.f32 %v2375_v32, %v2375_v32  ;;  %v2337_v16 = vadd.f32 %v2231_v45, %v4569_v28 }
 0x1fd   : > { %v2010_v47 = vpop.f32.mrf.mxu1  ;;  %v3100_v32 = vpop.f32.mrf.mxu0 }
 0x1fe   : > { %v2508_v38 = vadd.f32 %v2507_v31, %v2477_v24  ;;  %v2376_v4 = vadd.f32 %v4634_v40, %v2337_v16  ;;  %v2236_v63 = vadd.f32 %v2235_v53, %v2010_v47 }
 0x1ff   : > { %v2012_v25 = vpop.f32.mrf.mxu1 }
 0x200   : > { %2408 = vst [vmem:[%s4642_s9 + $0x68] sm:$0xff] %v2376_v4  ;;  %v2439_v19 = vadd.f32 %v2438_v61, %v2376_v4  ;;  %v2478_v51 = vmul.f32 %v2376_v4, %v2376_v4  ;;  %v2338_v7 = vadd.f32 %v2236_v63, %v4582_v52 }
 0x201   : > { %v2015_v34 = vpop.f32.mrf.mxu1 }
 0x202   : > { %v2509_v13 = vadd.f32 %v2508_v38, %v2478_v51  ;;  %v2377_v59 = vadd.f32 %v4634_v40, %v2338_v7  ;;  %v2241_v33 = vadd.f32 %v3091_v42, %v2015_v34  ;;  %v2265_v38 = vpop.f32.mrf.mxu0 }
 0x203   : > { %v2017_v28 = vpop.f32.mrf.mxu1 }
 0x204   : > { %2409 = vst [vmem:[%s4642_s9 + $0x70] sm:$0xff] %v2377_v59  ;;  %v2440_v57 = vadd.f32 %v2439_v19, %v2377_v59  ;;  %v2479_v58 = vmul.f32 %v2377_v59, %v2377_v59  ;;  %v2339_v12 = vadd.f32 %v2241_v33, %v4577_v20  ;;  %v3103_v34 = vpop.f32.mrf.mxu0 }
 0x205   : > { %v2020_v36 = vpop.f32.mrf.mxu1 }
 0x206   : > { %v2510_v14 = vadd.f32 %v2509_v13, %v2479_v58  ;;  %v2378_v6 = vadd.f32 %v4634_v40, %v2339_v12  ;;  %v2246_v22 = vadd.f32 %v2245_v27, %v2020_v36  ;;  %v2275_v12 = vpop.f32.mrf.mxu0 }
 0x207   : > { %v2022_v52 = vpop.f32.mrf.mxu1 }
 0x208   : > { %2410 = vst [vmem:[%s4642_s9 + $0x78] sm:$0xff] %v2378_v6  ;;  %v2441_v37 = vadd.f32 %v2440_v57, %v2378_v6  ;;  %v2480_v55 = vmul.f32 %v2378_v6, %v2378_v6  ;;  %v2340_v15 = vadd.f32 %v2246_v22, %v4590_v48 }
 0x209   : > { %v2025_v1 = vpop.f32.mrf.mxu1 }
 0x20a   : > { %v2511_v35 = vadd.f32 %v2510_v14, %v2480_v55  ;;  %v2379_v5 = vadd.f32 %v4634_v40, %v2340_v15  ;;  %v2251_v2 = vadd.f32 %v3094_v41, %v2025_v1  ;;  %v3106_v55 = vpop.f32.mrf.mxu0 }
 0x20b   : > { %v2027_v20 = vpop.f32.mrf.mxu1 }
 0x20c   : > { %2411 = vst [vmem:[%s4642_s9 + $0x80] sm:$0xff] %v2379_v5  ;;  %v2442_v49 = vadd.f32 %v2441_v37, %v2379_v5  ;;  %v2481_v42 = vmul.f32 %v2379_v5, %v2379_v5  ;;  %v2341_v60 = vadd.f32 %v2251_v2, %v4585_v43 }
 0x20d   : > { %v2030_v9 = vpop.f32.mrf.mxu1 }
 0x20e   : > { %v2512_v26 = vadd.f32 %v2511_v35, %v2481_v42  ;;  %v2380_v0 = vadd.f32 %v4634_v40, %v2341_v60  ;;  %v2256_v31 = vadd.f32 %v2255_v30, %v2030_v9 }
 0x20f   : > { %v2032_v48 = vpop.f32.mrf.mxu1 }
 0x210   : > { %2412 = vst [vmem:[%s4642_s9 + $0x88] sm:$0xff] %v2380_v0  ;;  %v2443_v45 = vadd.f32 %v2442_v49, %v2380_v0  ;;  %v2482_v56 = vmul.f32 %v2380_v0, %v2380_v0  ;;  %v2342_v53 = vadd.f32 %v2256_v31, %v4598_v8  ;;  %v2285_v49 = vpop.f32.mrf.mxu0 }
 0x211   : > { %v2035_v61 = vpop.f32.mrf.mxu1 }
 0x212   : > { %v2513_v24 = vadd.f32 %v2512_v26, %v2482_v56  ;;  %v2381_v16 = vadd.f32 %v4634_v40, %v2342_v53  ;;  %v2261_v47 = vadd.f32 %v3097_v21, %v2035_v61 }
 0x213   : > { %v2037_v43 = vpop.f32.mrf.mxu1 }
 0x214   : > { %2413 = vst [vmem:[%s4642_s9 + $0x90] sm:$0xff] %v2381_v16  ;;  %v2444_v4 = vadd.f32 %v2443_v45, %v2381_v16  ;;  %v2483_v63 = vmul.f32 %v2381_v16, %v2381_v16  ;;  %v2343_v25 = vadd.f32 %v2261_v47, %v4593_v18 }
 0x215   : > { %v2040_v41 = vpop.f32.mrf.mxu1 }
 0x216   : > { %v2514_v19 = vadd.f32 %v2513_v24, %v2483_v63  ;;  %v2382_v51 = vadd.f32 %v4634_v40, %v2343_v25  ;;  %v2266_v7 = vadd.f32 %v2265_v38, %v2040_v41 }
 0x217   : > { %v2042_v8 = vpop.f32.mrf.mxu1 }
 0x218   : > { %2414 = vst [vmem:[%s4642_s9 + $0x98] sm:$0xff] %v2382_v51  ;;  %v2445_v13 = vadd.f32 %v2444_v4, %v2382_v51  ;;  %v2484_v59 = vmul.f32 %v2382_v51, %v2382_v51  ;;  %v2344_v33 = vadd.f32 %v2266_v7, %v4606_v11 }
 0x219   : > { %v2045_v28 = vpop.f32.mrf.mxu1 }
 0x21a   : > { %v2515_v27 = vadd.f32 %v2514_v19, %v2484_v59  ;;  %v2383_v57 = vadd.f32 %v4634_v40, %v2344_v33  ;;  %v2271_v58 = vadd.f32 %v3100_v32, %v2045_v28  ;;  %v3109_v32 = vpop.f32.mrf.mxu0 }
 0x21b   : > { %v2047_v18 = vpop.f32.mrf.mxu1 }
 0x21c   : > { %2415 = vst [vmem:[%s4642_s9 + $0xa0] sm:$0xff] %v2383_v57  ;;  %v2446_v36 = vadd.f32 %v2445_v13, %v2383_v57  ;;  %v2485_v14 = vmul.f32 %v2383_v57, %v2383_v57  ;;  %v2345_v6 = vadd.f32 %v2271_v58, %v4601_v46  ;;  %v2295_v43 = vpop.f32.mrf.mxu0 }
 0x21d   : > { %v2050_v22 = vpop.f32.mrf.mxu1 }
 0x21e   : > { %v2516_v52 = vadd.f32 %v2515_v27, %v2485_v14  ;;  %v2384_v21 = vadd.f32 %v4634_v40, %v2345_v6  ;;  %v2276_v37 = vadd.f32 %v2275_v12, %v2050_v22  ;;  %v3112_v7 = vpop.f32.mrf.mxu0 }
 0x21f   : > { %v2052_v11 = vpop.f32.mrf.mxu1 }
 0x220   : > { %2416 = vst [vmem:[%s4642_s9 + $0xa8] sm:$0xff] %v2384_v21  ;;  %v2447_v15 = vadd.f32 %v2446_v36, %v2384_v21  ;;  %v2486_v1 = vmul.f32 %v2384_v21, %v2384_v21  ;;  %v2346_v35 = vadd.f32 %v2276_v37, %v4612_v29  ;;  %v2305_v57 = vpop.f32.mrf.mxu0 }
 0x221   : > { %v2055_v5 = vpop.f32.mrf.mxu1 }
 0x222   : > { %v2517_v2 = vadd.f32 %v2516_v52, %v2486_v1  ;;  %v2385_v20 = vadd.f32 %v4634_v40, %v2346_v35  ;;  %v2281_v30 = vadd.f32 %v3103_v34, %v2055_v5  ;;  %v3115_v52 = vpop.f32.mrf.mxu0 }
 0x223   : > { %v2057_v46 = vpop.f32.mrf.mxu1 }
 0x224   : > { %2417 = vst [vmem:[%s4642_s9 + $0xb0] sm:$0xff] %v2385_v20  ;;  %v2448_v42 = vadd.f32 %v2447_v15, %v2385_v20  ;;  %v2487_v60 = vmul.f32 %v2385_v20, %v2385_v20  ;;  %v2347_v9 = vadd.f32 %v2281_v30, %v4609_v39  ;;  %v2315_v5 = vpop.f32.mrf.mxu0 }
 0x225   : > { %v2060_v26 = vpop.f32.mrf.mxu1 }
 0x226   : > { %v2518_v0 = vadd.f32 %v2517_v2, %v2487_v60  ;;  %v2386_v31 = vadd.f32 %v4634_v40, %v2347_v9  ;;  %v2286_v48 = vadd.f32 %v2285_v49, %v2060_v26 }
 0x227   : > { %v2062_v29 = vpop.f32.mrf.mxu1 }
 0x228   : > { %2418 = vst [vmem:[%s4642_s9 + $0xb8] sm:$0xff] %v2386_v31  ;;  %v2449_v45 = vadd.f32 %v2448_v42, %v2386_v31  ;;  %v2488_v56 = vmul.f32 %v2386_v31, %v2386_v31  ;;  %v2348_v53 = vadd.f32 %v2286_v48, %v4617_v50 }
 0x229   : > { %v2065_v61 = vpop.f32.mrf.mxu1 }
 0x22a   : > { %v2519_v24 = vadd.f32 %v2518_v0, %v2488_v56  ;;  %v2387_v16 = vadd.f32 %v4634_v40, %v2348_v53  ;;  %v2291_v47 = vadd.f32 %v3106_v55, %v2065_v61 }
 0x22b   : > { %v2067_v39 = vpop.f32.mrf.mxu1 }
 0x22c   : > { %2419 = vst [vmem:[%s4642_s9 + $0xc0] sm:$0xff] %v2387_v16  ;;  %v2450_v38 = vadd.f32 %v2449_v45, %v2387_v16  ;;  %v2489_v4 = vmul.f32 %v2387_v16, %v2387_v16  ;;  %v2349_v63 = vadd.f32 %v2291_v47, %v4614_v54 }
 0x22d   : > { %v2070_v25 = vpop.f32.mrf.mxu1 }
 0x22e   : > { %v2520_v41 = vadd.f32 %v2519_v24, %v2489_v4  ;;  %v2388_v19 = vadd.f32 %v4634_v40, %v2349_v63  ;;  %v2296_v51 = vadd.f32 %v2295_v43, %v2070_v25 }
 0x22f   : > { %v2072_v50 = vpop.f32.mrf.mxu1 }
 0x230   : > { %2420 = vst [vmem:[%s4642_s9 + $0xc8] sm:$0xff] %v2388_v19  ;;  %v2451_v8 = vadd.f32 %v2450_v38, %v2388_v19  ;;  %v2490_v34 = vmul.f32 %v2388_v19, %v2388_v19  ;;  %v2350_v13 = vadd.f32 %v2296_v51, %v4621_v17 }
 0x231   : > { %v2075_v59 = vpop.f32.mrf.mxu1 }
 0x232   : > { %v2521_v33 = vadd.f32 %v2520_v41, %v2490_v34  ;;  %v2389_v28 = vadd.f32 %v4634_v40, %v2350_v13  ;;  %v2301_v27 = vadd.f32 %v3109_v32, %v2075_v59 }
 0x233   : > { %v2077_v54 = vpop.f32.mrf.mxu1 }
 0x234   : > { %2421 = vst [vmem:[%s4642_s9 + $0xd0] sm:$0xff] %v2389_v28  ;;  %v2452_v58 = vadd.f32 %v2451_v8, %v2389_v28  ;;  %v2491_v18 = vmul.f32 %v2389_v28, %v2389_v28  ;;  %v2351_v12 = vadd.f32 %v2301_v27, %v4619_v62 }
 0x235   : > { %v2080_v36 = vpop.f32.mrf.mxu1 }
 0x236   : > { %v2522_v14 = vadd.f32 %v2521_v33, %v2491_v18  ;;  %v2390_v6 = vadd.f32 %v4634_v40, %v2351_v12  ;;  %v2306_v22 = vadd.f32 %v2305_v57, %v2080_v36 }
 0x237   : > { %v2082_v17 = vpop.f32.mrf.mxu1 }
 0x238   : > { %2422 = vst [vmem:[%s4642_s9 + $0xd8] sm:$0xff] %v2390_v6  ;;  %v2453_v21 = vadd.f32 %v2452_v58, %v2390_v6  ;;  %v2492_v37 = vmul.f32 %v2390_v6, %v2390_v6  ;;  %v2352_v11 = vadd.f32 %v2306_v22, %v4625_v10 }
 0x239   : > { %v2085_v55 = vpop.f32.mrf.mxu1 }
 0x23a   : > { %v2523_v15 = vadd.f32 %v2522_v14, %v2492_v37  ;;  %v2391_v1 = vadd.f32 %v4634_v40, %v2352_v11  ;;  %v2311_v35 = vadd.f32 %v3112_v7, %v2085_v55 }
 0x23b   : > { %v2087_v62 = vpop.f32.mrf.mxu1 }
 0x23c   : > { %2423 = vst [vmem:[%s4642_s9 + $0xe0] sm:$0xff] %v2391_v1  ;;  %v2454_v2 = vadd.f32 %v2453_v21, %v2391_v1  ;;  %v2493_v20 = vmul.f32 %v2391_v1, %v2391_v1  ;;  %v2353_v30 = vadd.f32 %v2311_v35, %v4623_v3 }
 0x23d   : > { %v2090_v46 = vpop.f32.mrf.mxu1 }
 0x23e   : > { %v2524_v49 = vadd.f32 %v2523_v15, %v2493_v20  ;;  %v2392_v42 = vadd.f32 %v4634_v40, %v2353_v30  ;;  %v2316_v60 = vadd.f32 %v2315_v5, %v2090_v46 }
 0x23f   : > { %v2092_v10 = vpop.f32.mrf.mxu1 }
 0x240   : > { %2424 = vst [vmem:[%s4642_s9 + $0xe8] sm:$0xff] %v2392_v42  ;;  %v2455_v9 = vadd.f32 %v2454_v2, %v2392_v42  ;;  %v2494_v26 = vmul.f32 %v2392_v42, %v2392_v42  ;;  %v2354_v0 = vadd.f32 %v2316_v60, %v4629_v44 }
 0x241   : > { %v2095_v31 = vpop.f32.mrf.mxu1 }
 0x242   : > { %v2525_v48 = vadd.f32 %v2524_v49, %v2494_v26  ;;  %v2393_v29 = vadd.f32 %v4634_v40, %v2354_v0  ;;  %v2321_v32 = vadd.f32 %v3115_v52, %v2095_v31 }
 0x243   : > { %v2097_v45 = vpop.f32.mrf.mxu1 }
 0x244   : > { %2425 = vst [vmem:[%s4642_s9 + $0xf0] sm:$0xff] %v2393_v29  ;;  %v2456_v3 = vadd.f32 %v2455_v9, %v2393_v29  ;;  %v2495_v56 = vmul.f32 %v2393_v29, %v2393_v29  ;;  %v2355_v53 = vadd.f32 %v2321_v32, %v4627_v23 }
 0x246   : > { %v2526_v61 = vadd.f32 %v2525_v48, %v2495_v56  ;;  %v2394_v24 = vadd.f32 %v4634_v40, %v2355_v53 }
 0x248   : > { %2426 = vst [vmem:[%s4642_s9 + $0xf8] sm:$0xff] %v2394_v24  ;;  %v2457_v16 = vadd.f32 %v2456_v3, %v2394_v24  ;;  %v2496_v47 = vmul.f32 %v2394_v24, %v2394_v24 }
 0x24a   : > { %v2458_v39 = vrot.slane %v2457_v16, 4  ;;  %v2527_v44 = vadd.f32 %v2526_v61, %v2496_v47 }
 0x24c   : > { %v2459_v43 = vadd.f32 %v2458_v39, %v2457_v16  ;;  %v2528_v38 = vrot.slane %v2527_v44, 4 }
 0x24e   : > { %v2460_v4 = vrot.slane %v2459_v43, 2  ;;  %v2529_v63 = vadd.f32 %v2528_v38, %v2527_v44 }
 0x250   : > { %v2461_v25 = vadd.f32 %v2460_v4, %v2459_v43  ;;  %v2530_v41 = vrot.slane %v2529_v63, 2 }
 0x252   : > { %v2462_v19 = vrot.slane %v2461_v25, 1  ;;  %v2531_v51 = vadd.f32 %v2530_v41, %v2529_v63 }
 0x254   : > { %v2463_v23 = vadd.f32 %v2462_v19, %v2461_v25  ;;  %v2532_v40 = vrot.slane %v2531_v51, 1 }
 0x256   : > { %2464 = vst [vmem:[%s289_s12] sm:$0x1] %v2463_v23  ;;  %v2533_v50 = vadd.f32 %v2532_v40, %v2531_v51 }
 0x258   : > { %2534 = vst [vmem:[%s289_s12 + $0x1] sm:$0x1] %v2533_v50 }
 0x259 PF: > { %s18_s24 = sadd.s32 1, %s3136_s24  }
 0x25a   : > { %p15_p4 = scmp.ge.s32.totalorder %s18_s24, 4  }
 0x25c   :  { %17 = sbr.rel (!%p15_p4) target bundleno = 1 (0x1), region = 90 }

</bundles_post_ra>
